<compile_context>
chip_gen: v6e
topology: v6e:2x2x1
jax: 0.10.0
libtpu: 0.0.40
codegen_flags: <defaults>
</compile_context>

<pallas_src>
import functools
import math

import jax
import jax.numpy as jnp
from jax.experimental import pallas as pl
from jax.experimental.pallas import tpu as pltpu


# ----------------------------------------------------------------------------
# Shared math helpers (used in-kernel and in the plain-JAX embedding path)
# ----------------------------------------------------------------------------

def _layernorm(x, g, b):
    mu = jnp.mean(x, axis=-1, keepdims=True)
    var = jnp.mean(jnp.square(x - mu), axis=-1, keepdims=True)
    return (x - mu) * jax.lax.rsqrt(var + 1e-12) * g + b


def _gelu(x):
    c = jnp.float32(math.sqrt(2.0 / math.pi))
    return 0.5 * x * (1.0 + jnp.tanh(c * (x + 0.044715 * x * x * x)))


# ----------------------------------------------------------------------------
# Fused transformer-layer Pallas kernel
# ----------------------------------------------------------------------------
# One grid step = one chunk of `chunk_b` sub-batch sequences, flattened into a
# (chunk_b*S, H) activation slab. Everything for the layer stays in VMEM.

def bert_layer_kernel(x_ref, bias_ref, wqkv_ref, bqkv_ref, wo_ref, bo_ref,
                      ln1g_ref, ln1b_ref, w1_ref, b1_ref, w2_ref, b2_ref,
                      ln2g_ref, ln2b_ref, o_ref, ctx_ref,
                      *, num_heads, head_dim, seq_len, chunk_b, scale):
    x = x_ref[...]                               # (chunk_b*S, H) f32
    x_bf = x.astype(jnp.bfloat16)
    bias = bias_ref[...]                         # (chunk_b, 1, S) f32 additive mask
    wqkv = wqkv_ref[...]                         # (3, heads, H, Dh) bf16
    bqkv = bqkv_ref[...]                         # (3, heads, 1, Dh) f32

    # ---- multi-head self-attention ---------------------------------------
    # Heads / Q-K-V are selected along leading weight axes (lane-aligned).
    # Per-head context is written into a (chunk_b*S, H) VMEM scratch at its
    # head offset so the output projection is a single full-K matmul.
    for hd in range(num_heads):
        lo = hd * head_dim
        q = jnp.dot(x_bf, wqkv[0, hd], preferred_element_type=jnp.float32) + bqkv[0, hd]
        k = jnp.dot(x_bf, wqkv[1, hd], preferred_element_type=jnp.float32) + bqkv[1, hd]
        v = jnp.dot(x_bf, wqkv[2, hd], preferred_element_type=jnp.float32) + bqkv[2, hd]
        q = q * scale                            # fold scale into q (S*Dh muls, not S*S)
        for j in range(chunk_b):                 # attention never crosses sequences
            rows = slice(j * seq_len, (j + 1) * seq_len)
            qj = q[rows].astype(jnp.bfloat16)    # f32 row slices are sublane-aligned
            kj = k[rows].astype(jnp.bfloat16)
            vj = v[rows].astype(jnp.bfloat16)
            sc = jax.lax.dot_general(qj, kj, (((1,), (1,)), ((), ())),
                                     preferred_element_type=jnp.float32)
            sc = sc + bias[j]                    # (S,S) + (1,S)
            sc = sc - jnp.max(sc, axis=-1, keepdims=True)
            pr = jnp.exp(sc)
            # approx reciprocal -> EUP slot; rows sum to ~1 (documented).
            pr = pr * pl.reciprocal(jnp.sum(pr, axis=-1, keepdims=True), approx=True)
            ctx = jnp.dot(pr.astype(jnp.bfloat16), vj,
                          preferred_element_type=jnp.float32)
            ctx_ref[rows, lo:lo + head_dim] = ctx

    # Single full-K output projection over the assembled per-head context.
    attn = jnp.dot(ctx_ref[...].astype(jnp.bfloat16), wo_ref[...],
                   preferred_element_type=jnp.float32) + bo_ref[...]

    # Residual + LayerNorm (f32, fused -> no HBM round trip).
    x1 = _layernorm(attn + x, ln1g_ref[...], ln1b_ref[...])

    # FFN up-proj + GELU + down-proj, residual + LayerNorm.
    up = jnp.dot(x1.astype(jnp.bfloat16), w1_ref[...],
                 preferred_element_type=jnp.float32) + b1_ref[...]
    up = _gelu(up)
    down = jnp.dot(up.astype(jnp.bfloat16), w2_ref[...],
                   preferred_element_type=jnp.float32) + b2_ref[...]
    o_ref[...] = _layernorm(down + x1, ln2g_ref[...], ln2b_ref[...])


# ----------------------------------------------------------------------------
# Pallas wrapper
# ----------------------------------------------------------------------------

def pallas_bert_layer(x, bias, p, num_heads, head_dim):
    """x: (B_sub, S, H) f32; bias: (B_sub, 1, S) f32. One fused kernel per layer."""
    b, s, h = x.shape
    assert s % 8 == 0, "assembled sequence length must be sublane-aligned"
    # Two "parallel" grid steps so both v7x TensorCores get work; on v5e/v6e
    # (1 TC) the extra step costs ~0.35us and the marking is a no-op.
    n_chunks = 2 if (b % 2 == 0 and b >= 2) else 1
    chunk_b = b // n_chunks
    x2d = x.reshape(b * s, h)                    # lane-dense flattened slab

    kern = functools.partial(bert_layer_kernel, num_heads=num_heads,
                             head_dim=head_dim, seq_len=s, chunk_b=chunk_b,
                             scale=1.0 / math.sqrt(head_dim))

    def full(a):
        nd = a.ndim
        return pl.BlockSpec(a.shape, lambda i, _nd=nd: (0,) * _nd)

    out = pl.pallas_call(
        kern,
        out_shape=jax.ShapeDtypeStruct((b * s, h), jnp.float32),
        grid=(n_chunks,),
        in_specs=[
            pl.BlockSpec((chunk_b * s, h), lambda i: (i, 0)),     # activations
            pl.BlockSpec((chunk_b, 1, s), lambda i: (i, 0, 0)),   # attention bias
            full(p["wqkv"]), full(p["bqkv"]),                     # (3,H_heads,H,Dh) bf16
            full(p["wo"]), full(p["bo"]),
            full(p["ln1_g"]), full(p["ln1_b"]),
            full(p["w1"]), full(p["b1"]),
            full(p["w2"]), full(p["b2"]),
            full(p["ln2_g"]), full(p["ln2_b"]),
        ],
        out_specs=pl.BlockSpec((chunk_b * s, h), lambda i: (i, 0)),
        scratch_shapes=[pltpu.VMEM((chunk_b * s, h), jnp.float32)],  # ctx scratch
        compiler_params=pltpu.CompilerParams(
            dimension_semantics=("parallel",),
            vmem_limit_bytes=48 * 1024 * 1024),
    )(x2d, bias, p["wqkv"], p["bqkv"], p["wo"], p["bo"],
      p["ln1_g"], p["ln1_b"], p["w1"], p["b1"], p["w2"], p["b2"],
      p["ln2_g"], p["ln2_b"])
    return out.reshape(b, s, h)


# ----------------------------------------------------------------------------
# modeling_util.subbatch / un_subbatch (static-shape glue, plain JAX)
# ----------------------------------------------------------------------------

def subbatch(toks, maxlen):
    _, dlen = toks.shape
    sb = math.ceil(dlen / maxlen)
    s = math.ceil(dlen / sb)
    if sb == 1:
        return toks, 1
    pad = s * sb - dlen
    if pad:
        toks = jnp.concatenate([toks, jnp.zeros_like(toks[:, :pad])], axis=1)
    stack = [toks[:, i * s:(i + 1) * s] for i in range(sb)]
    return jnp.concatenate(stack, axis=0), sb


def un_subbatch(embed, toks, maxlen):
    batch, dlen = toks.shape
    sb = math.ceil(dlen / maxlen)
    if sb == 1:
        return embed
    stack = [embed[i * batch:(i + 1) * batch] for i in range(sb)]
    embed = jnp.concatenate(stack, axis=1)
    return embed[:, :dlen]


# ----------------------------------------------------------------------------
# Synthetic BERT encoder (layer compute fused into one Pallas kernel per layer)
# ----------------------------------------------------------------------------

def bert_encoder(params, toks, mask, segment_ids, cfg):
    """Returns the tuple of hidden states (embeddings + one per layer)."""
    b, s = toks.shape
    h = cfg["hidden"]
    num_heads = cfg["heads"]
    head_dim = h // num_heads

    x = (params["word_emb"][toks]
         + params["pos_emb"][:s][None, :, :]
         + params["type_emb"][segment_ids])
    # Embedding LayerNorm left to XLA: a tiny pure-VPU pallas_call would be
    # dominated by launch overhead plus an extra HBM write+read of activations.
    x = _layernorm(x, params["emb_ln_g"], params["emb_ln_b"])

    bias = ((1.0 - mask.astype(jnp.float32)) * -10000.0)[:, None, :]   # (B, 1, S)

    hidden_states = [x]
    for layer_p in params["layers"]:
        x = pallas_bert_layer(x, bias, layer_p, num_heads, head_dim)
        hidden_states.append(x)
    return hidden_states


# ----------------------------------------------------------------------------
# BertRanker.encode_bert semantics
# ----------------------------------------------------------------------------

CLS_ID = 101
SEP_ID = 102


def encode_bert(params, query_tok, query_mask, doc_tok, doc_mask, cfg):
    batch, qlen = query_tok.shape
    diff = 3
    maxlen = cfg["max_position_embeddings"]
    max_doc_tok_len = maxlen - qlen - diff

    doc_toks, sbcount = subbatch(doc_tok, max_doc_tok_len)
    doc_mask_sb, _ = subbatch(doc_mask, max_doc_tok_len)
    query_toks = jnp.concatenate([query_tok] * sbcount, axis=0)
    query_mask_sb = jnp.concatenate([query_mask] * sbcount, axis=0)

    clss = jnp.full_like(query_toks[:, :1], CLS_ID)
    seps = jnp.full_like(query_toks[:, :1], SEP_ID)
    ones = jnp.ones_like(query_mask_sb[:, :1])
    nils = jnp.zeros_like(query_mask_sb[:, :1])

    doc_sub_len = doc_toks.shape[1]
    toks = jnp.concatenate([clss, query_toks, seps, doc_toks, seps], axis=1)
    mask = jnp.concatenate([ones, query_mask_sb, ones, doc_mask_sb, ones], axis=1)
    segment_ids = jnp.concatenate([nils] * (2 + qlen)
                                  + [ones] * (1 + doc_sub_len), axis=1)
    toks = jnp.where(toks == -1, 0, toks)

    # Pad the assembled sequence to a sublane-aligned length (multiple of 8);
    # padded positions carry mask=0 so the -10000 attention bias removes them
    # as keys, and they are never read back out below.
    s0 = toks.shape[1]
    s_pad = (s0 + 7) // 8 * 8
    assert s_pad <= params["pos_emb"].shape[0]
    if s_pad != s0:
        pad = s_pad - s0
        toks = jnp.pad(toks, ((0, 0), (0, pad)))
        mask = jnp.pad(mask, ((0, 0), (0, pad)))
        segment_ids = jnp.pad(segment_ids, ((0, 0), (0, pad)))

    result = bert_encoder(params, toks, mask,
                          segment_ids.astype(jnp.int32), cfg)

    query_results = [r[:batch, 1:qlen + 1] for r in result]
    # [qlen+2 : qlen+2+doc_sub_len] == the original [qlen+2:-1] on the unpadded seq.
    doc_results = [r[:, qlen + 2:qlen + 2 + doc_sub_len] for r in result]
    doc_results = [un_subbatch(r, doc_tok, max_doc_tok_len) for r in doc_results]

    h = cfg["hidden"]
    cls_results = []
    for layer in result:
        cls_output = layer[:, 0]                              # (sbcount*batch, H)
        # mean over sub-batches; tiny -> plain JAX (no kernel dispatch).
        cls_results.append(cls_output.reshape(sbcount, batch, h).mean(axis=0))
    return cls_results, query_results, doc_results


# ----------------------------------------------------------------------------
# Deterministic parameter init (synthetic, scaled-down bert-base)
# ----------------------------------------------------------------------------

def init_params(key, cfg):
    h, f = cfg["hidden"], cfg["ffn"]
    nh = cfg["heads"]
    dh = h // nh
    v = cfg["vocab"]
    p_rows = ((cfg["max_position_embeddings"] + 7) // 8) * 8
    keys = iter(jax.random.split(key, 3 + 4 * cfg["layers"]))

    def nrm(shape, dtype=jnp.float32):
        return (jax.random.normal(next(keys), shape, jnp.float32) * 0.02).astype(dtype)

    params = {
        "word_emb": nrm((v, h)),
        "pos_emb": nrm((p_rows, h)),
        "type_emb": nrm((2, h)),
        "emb_ln_g": jnp.ones((1, h), jnp.float32),
        "emb_ln_b": jnp.zeros((1, h), jnp.float32),
        "layers": [],
    }
    for _ in range(cfg["layers"]):
        params["layers"].append({
            # QKV weights laid out (3, heads, H, Dh): Q/K/V + head selected along
            # leading axes in-kernel (lane-aligned); matmul operands stored bf16.
            "wqkv": nrm((3, nh, h, dh), jnp.bfloat16),
            "bqkv": jnp.zeros((3, nh, 1, dh), jnp.float32),
            "wo": nrm((h, h), jnp.bfloat16), "bo": jnp.zeros((1, h), jnp.float32),
            "ln1_g": jnp.ones((1, h), jnp.float32),
            "ln1_b": jnp.zeros((1, h), jnp.float32),
            "w1": nrm((h, f), jnp.bfloat16), "b1": jnp.zeros((1, f), jnp.float32),
            "w2": nrm((f, h), jnp.bfloat16), "b2": jnp.zeros((1, h), jnp.float32),
            "ln2_g": jnp.ones((1, h), jnp.float32),
            "ln2_b": jnp.zeros((1, h), jnp.float32),
        })
    return params


# ----------------------------------------------------------------------------
# Main
# ----------------------------------------------------------------------------

if __name__ == "__main__":
    cfg = dict(hidden=64, ffn=128, heads=2, layers=2,     # CHANNELS = layers + 1 = 3
               vocab=128, max_position_embeddings=40)

    key = jax.random.PRNGKey(0)
    kp, kq, kd = jax.random.split(key, 3)
    params = init_params(kp, cfg)

    BATCH, QLEN, DLEN = 2, 8, 48
    query_tok = jax.random.randint(kq, (BATCH, QLEN), 0, cfg["vocab"], dtype=jnp.int32)
    doc_tok = jax.random.randint(kd, (BATCH, DLEN), 0, cfg["vocab"], dtype=jnp.int32)
    doc_tok = doc_tok.at[:, -4:].set(-1)                 # padding, exercises toks[toks==-1]=0
    query_mask = jnp.ones((BATCH, QLEN), jnp.float32)
    doc_mask = jnp.ones((BATCH, DLEN), jnp.float32).at[:, -4:].set(0.0)

    cls_results, query_results, doc_results = encode_bert(
        params, query_tok, query_mask, doc_tok, doc_mask, cfg)
    jax.block_until_ready((cls_results, query_results, doc_results))

    # shape / sanity checks
    n_channels = cfg["layers"] + 1
    assert len(cls_results) == n_channels
    assert all(c.shape == (BATCH, cfg["hidden"]) for c in cls_results)
    assert all(q.shape == (BATCH, QLEN, cfg["hidden"]) for q in query_results)
    assert all(d.shape == (BATCH, DLEN, cfg["hidden"]) for d in doc_results)
    assert all(bool(jnp.all(jnp.isfinite(c))) for c in cls_results)
    assert all(bool(jnp.all(jnp.isfinite(q))) for q in query_results)
    assert all(bool(jnp.all(jnp.isfinite(d))) for d in doc_results)

    print("KERNEL_OK")
</pallas_src>

<mosaic_0001>
module attributes {stable_mosaic.version = 11 : i64} {
  func.func @bert_layer_kernel(%arg0: i32, %arg1: memref<80x64xf32, #tpu.memory_space<vmem>>, %arg2: memref<2x1x40xf32, #tpu.memory_space<vmem>>, %arg3: memref<3x2x64x32xbf16, #tpu.memory_space<vmem>>, %arg4: memref<3x2x1x32xf32, #tpu.memory_space<vmem>>, %arg5: memref<64x64xbf16, #tpu.memory_space<vmem>>, %arg6: memref<1x64xf32, #tpu.memory_space<vmem>>, %arg7: memref<1x64xf32, #tpu.memory_space<vmem>>, %arg8: memref<1x64xf32, #tpu.memory_space<vmem>>, %arg9: memref<64x128xbf16, #tpu.memory_space<vmem>>, %arg10: memref<1x128xf32, #tpu.memory_space<vmem>>, %arg11: memref<128x64xbf16, #tpu.memory_space<vmem>>, %arg12: memref<1x64xf32, #tpu.memory_space<vmem>>, %arg13: memref<1x64xf32, #tpu.memory_space<vmem>>, %arg14: memref<1x64xf32, #tpu.memory_space<vmem>>, %arg15: memref<80x64xf32, #tpu.memory_space<vmem>>, %arg16: memref<80x64xf32, #tpu.memory_space<vmem>>) attributes {dimension_semantics = [#tpu.dimension_semantics<parallel>], iteration_bounds = array<i64: 2>, scalar_prefetch = 0 : i64, scratch_operands = 1 : i64, tpu.core_type = #tpu.core_type<tc>, window_params = [{transform_indices = @transform_0, window_bounds = array<i64: 80, 64>}, {transform_indices = @transform_1, window_bounds = array<i64: 2, 1, 40>}, {pipeline_mode = #tpu.pipeline_mode<synchronous>, transform_indices = @transform_2, window_bounds = array<i64: 3, 2, 64, 32>}, {pipeline_mode = #tpu.pipeline_mode<synchronous>, transform_indices = @transform_3, window_bounds = array<i64: 3, 2, 1, 32>}, {pipeline_mode = #tpu.pipeline_mode<synchronous>, transform_indices = @transform_4, window_bounds = array<i64: 64, 64>}, {pipeline_mode = #tpu.pipeline_mode<synchronous>, transform_indices = @transform_5, window_bounds = array<i64: 1, 64>}, {pipeline_mode = #tpu.pipeline_mode<synchronous>, transform_indices = @transform_6, window_bounds = array<i64: 1, 64>}, {pipeline_mode = #tpu.pipeline_mode<synchronous>, transform_indices = @transform_7, window_bounds = array<i64: 1, 64>}, {pipeline_mode = #tpu.pipeline_mode<synchronous>, transform_indices = @transform_8, window_bounds = array<i64: 64, 128>}, {pipeline_mode = #tpu.pipeline_mode<synchronous>, transform_indices = @transform_9, window_bounds = array<i64: 1, 128>}, {pipeline_mode = #tpu.pipeline_mode<synchronous>, transform_indices = @transform_10, window_bounds = array<i64: 128, 64>}, {pipeline_mode = #tpu.pipeline_mode<synchronous>, transform_indices = @transform_11, window_bounds = array<i64: 1, 64>}, {pipeline_mode = #tpu.pipeline_mode<synchronous>, transform_indices = @transform_12, window_bounds = array<i64: 1, 64>}, {pipeline_mode = #tpu.pipeline_mode<synchronous>, transform_indices = @transform_13, window_bounds = array<i64: 1, 64>}, {transform_indices = @transform_14, window_bounds = array<i64: 80, 64>}]} {
    %c0 = arith.constant 0 : index
    %c0_0 = arith.constant 0 : index
    %0 = vector.load %arg1[%c0, %c0_0] : memref<80x64xf32, #tpu.memory_space<vmem>>, vector<80x64xf32>
    %1 = arith.truncf %0 : vector<80x64xf32> to vector<80x64xbf16>
    %c0_1 = arith.constant 0 : index
    %c0_2 = arith.constant 0 : index
    %c0_3 = arith.constant 0 : index
    %2 = vector.load %arg2[%c0_1, %c0_2, %c0_3] : memref<2x1x40xf32, #tpu.memory_space<vmem>>, vector<2x1x40xf32>
    %c0_4 = arith.constant 0 : index
    %c0_5 = arith.constant 0 : index
    %c0_6 = arith.constant 0 : index
    %c0_7 = arith.constant 0 : index
    %3 = vector.load %arg3[%c0_4, %c0_5, %c0_6, %c0_7] : memref<3x2x64x32xbf16, #tpu.memory_space<vmem>>, vector<3x2x64x32xbf16>
    %c0_8 = arith.constant 0 : index
    %c0_9 = arith.constant 0 : index
    %c0_10 = arith.constant 0 : index
    %c0_11 = arith.constant 0 : index
    %4 = vector.load %arg4[%c0_8, %c0_9, %c0_10, %c0_11] : memref<3x2x1x32xf32, #tpu.memory_space<vmem>>, vector<3x2x1x32xf32>
    %5 = vector.extract_strided_slice %3 {offsets = [0, 0, 0, 0], sizes = [1, 1, 64, 32], strides = [1, 1, 1, 1]} : vector<3x2x64x32xbf16> to vector<1x1x64x32xbf16>
    %6 = vector.shape_cast %5 : vector<1x1x64x32xbf16> to vector<64x32xbf16>
    %cst = arith.constant dense<0.000000e+00> : vector<80x32xf32>
    %7 = tpu.matmul %1, %6, %cst {dimension_numbers = #tpu.dot_dimension_numbers<[1], [0], [0], [1], [0, 0, 1, 1], [], []>} : vector<80x64xbf16>, vector<64x32xbf16>, vector<80x32xf32> -> vector<80x32xf32>
    %8 = vector.extract_strided_slice %4 {offsets = [0, 0, 0, 0], sizes = [1, 1, 1, 32], strides = [1, 1, 1, 1]} : vector<3x2x1x32xf32> to vector<1x1x1x32xf32>
    %9 = vector.shape_cast %8 : vector<1x1x1x32xf32> to vector<1x32xf32>
    %10 = vector.broadcast %9 : vector<1x32xf32> to vector<80x32xf32>
    %11 = arith.addf %7, %10 : vector<80x32xf32>
    %12 = vector.extract_strided_slice %3 {offsets = [1, 0, 0, 0], sizes = [1, 1, 64, 32], strides = [1, 1, 1, 1]} : vector<3x2x64x32xbf16> to vector<1x1x64x32xbf16>
    %13 = vector.shape_cast %12 : vector<1x1x64x32xbf16> to vector<64x32xbf16>
    %cst_12 = arith.constant dense<0.000000e+00> : vector<80x32xf32>
    %14 = tpu.matmul %1, %13, %cst_12 {dimension_numbers = #tpu.dot_dimension_numbers<[1], [0], [0], [1], [0, 0, 1, 1], [], []>} : vector<80x64xbf16>, vector<64x32xbf16>, vector<80x32xf32> -> vector<80x32xf32>
    %15 = vector.extract_strided_slice %4 {offsets = [1, 0, 0, 0], sizes = [1, 1, 1, 32], strides = [1, 1, 1, 1]} : vector<3x2x1x32xf32> to vector<1x1x1x32xf32>
    %16 = vector.shape_cast %15 : vector<1x1x1x32xf32> to vector<1x32xf32>
    %17 = vector.broadcast %16 : vector<1x32xf32> to vector<80x32xf32>
    %18 = arith.addf %14, %17 : vector<80x32xf32>
    %19 = vector.extract_strided_slice %3 {offsets = [2, 0, 0, 0], sizes = [1, 1, 64, 32], strides = [1, 1, 1, 1]} : vector<3x2x64x32xbf16> to vector<1x1x64x32xbf16>
    %20 = vector.shape_cast %19 : vector<1x1x64x32xbf16> to vector<64x32xbf16>
    %cst_13 = arith.constant dense<0.000000e+00> : vector<80x32xf32>
    %21 = tpu.matmul %1, %20, %cst_13 {dimension_numbers = #tpu.dot_dimension_numbers<[1], [0], [0], [1], [0, 0, 1, 1], [], []>} : vector<80x64xbf16>, vector<64x32xbf16>, vector<80x32xf32> -> vector<80x32xf32>
    %22 = vector.extract_strided_slice %4 {offsets = [2, 0, 0, 0], sizes = [1, 1, 1, 32], strides = [1, 1, 1, 1]} : vector<3x2x1x32xf32> to vector<1x1x1x32xf32>
    %23 = vector.shape_cast %22 : vector<1x1x1x32xf32> to vector<1x32xf32>
    %24 = vector.broadcast %23 : vector<1x32xf32> to vector<80x32xf32>
    %25 = arith.addf %21, %24 : vector<80x32xf32>
    %cst_14 = arith.constant 0.176776692 : f32
    %26 = vector.broadcast %cst_14 : f32 to vector<80x32xf32>
    %27 = arith.mulf %11, %26 : vector<80x32xf32>
    %28 = vector.extract_strided_slice %27 {offsets = [0, 0], sizes = [40, 32], strides = [1, 1]} : vector<80x32xf32> to vector<40x32xf32>
    %29 = arith.truncf %28 : vector<40x32xf32> to vector<40x32xbf16>
    %30 = vector.extract_strided_slice %18 {offsets = [0, 0], sizes = [40, 32], strides = [1, 1]} : vector<80x32xf32> to vector<40x32xf32>
    %31 = arith.truncf %30 : vector<40x32xf32> to vector<40x32xbf16>
    %32 = vector.extract_strided_slice %25 {offsets = [0, 0], sizes = [40, 32], strides = [1, 1]} : vector<80x32xf32> to vector<40x32xf32>
    %33 = arith.truncf %32 : vector<40x32xf32> to vector<40x32xbf16>
    %cst_15 = arith.constant dense<0.000000e+00> : vector<40x40xf32>
    %34 = tpu.matmul %29, %31, %cst_15 {dimension_numbers = #tpu.dot_dimension_numbers<[1], [1], [0], [0], [0, 0, 1, 0], [], []>} : vector<40x32xbf16>, vector<40x32xbf16>, vector<40x40xf32> -> vector<40x40xf32>
    %35 = vector.extract_strided_slice %2 {offsets = [0, 0, 0], sizes = [1, 1, 40], strides = [1, 1, 1]} : vector<2x1x40xf32> to vector<1x1x40xf32>
    %36 = vector.shape_cast %35 : vector<1x1x40xf32> to vector<1x40xf32>
    %37 = vector.broadcast %36 : vector<1x40xf32> to vector<40x40xf32>
    %38 = arith.addf %34, %37 : vector<40x40xf32>
    %cst_16 = arith.constant dense<0xFF800000> : vector<40xf32>
    %39 = vector.multi_reduction <maximumf>, %38, %cst_16 [1] : vector<40x40xf32> to vector<40xf32>
    %40 = vector.shape_cast %39 : vector<40xf32> to vector<40x1xf32>
    %41 = vector.broadcast %40 : vector<40x1xf32> to vector<40x40xf32>
    %42 = arith.subf %38, %41 : vector<40x40xf32>
    %43 = math.exp %42 : vector<40x40xf32>
    %cst_17 = arith.constant dense<0.000000e+00> : vector<40xf32>
    %44 = vector.multi_reduction <add>, %43, %cst_17 [1] : vector<40x40xf32> to vector<40xf32>
    %45 = vector.shape_cast %44 : vector<40xf32> to vector<40x1xf32>
    %46 = tpu.reciprocal %45 {approx = true} : vector<40x1xf32> -> vector<40x1xf32>
    %47 = vector.broadcast %46 : vector<40x1xf32> to vector<40x40xf32>
    %48 = arith.mulf %43, %47 : vector<40x40xf32>
    %49 = arith.truncf %48 : vector<40x40xf32> to vector<40x40xbf16>
    %cst_18 = arith.constant dense<0.000000e+00> : vector<40x32xf32>
    %50 = tpu.matmul %49, %33, %cst_18 {dimension_numbers = #tpu.dot_dimension_numbers<[1], [0], [0], [1], [0, 0, 1, 1], [], []>} : vector<40x40xbf16>, vector<40x32xbf16>, vector<40x32xf32> -> vector<40x32xf32>
    %c0_19 = arith.constant 0 : index
    %c0_20 = arith.constant 0 : index
    %51 = vector.load %arg16[%c0_19, %c0_20] : memref<80x64xf32, #tpu.memory_space<vmem>>, vector<40x32xf32>
    tpu.vector_store %arg16[%c0_19, %c0_20], %50 {strides = array<i32>} : memref<80x64xf32, #tpu.memory_space<vmem>>, vector<40x32xf32>,
    %52 = vector.extract_strided_slice %27 {offsets = [40, 0], sizes = [40, 32], strides = [1, 1]} : vector<80x32xf32> to vector<40x32xf32>
    %53 = arith.truncf %52 : vector<40x32xf32> to vector<40x32xbf16>
    %54 = vector.extract_strided_slice %18 {offsets = [40, 0], sizes = [40, 32], strides = [1, 1]} : vector<80x32xf32> to vector<40x32xf32>
    %55 = arith.truncf %54 : vector<40x32xf32> to vector<40x32xbf16>
    %56 = vector.extract_strided_slice %25 {offsets = [40, 0], sizes = [40, 32], strides = [1, 1]} : vector<80x32xf32> to vector<40x32xf32>
    %57 = arith.truncf %56 : vector<40x32xf32> to vector<40x32xbf16>
    %cst_21 = arith.constant dense<0.000000e+00> : vector<40x40xf32>
    %58 = tpu.matmul %53, %55, %cst_21 {dimension_numbers = #tpu.dot_dimension_numbers<[1], [1], [0], [0], [0, 0, 1, 0], [], []>} : vector<40x32xbf16>, vector<40x32xbf16>, vector<40x40xf32> -> vector<40x40xf32>
    %59 = vector.extract_strided_slice %2 {offsets = [1, 0, 0], sizes = [1, 1, 40], strides = [1, 1, 1]} : vector<2x1x40xf32> to vector<1x1x40xf32>
    %60 = vector.shape_cast %59 : vector<1x1x40xf32> to vector<1x40xf32>
    %61 = vector.broadcast %60 : vector<1x40xf32> to vector<40x40xf32>
    %62 = arith.addf %58, %61 : vector<40x40xf32>
    %cst_22 = arith.constant dense<0xFF800000> : vector<40xf32>
    %63 = vector.multi_reduction <maximumf>, %62, %cst_22 [1] : vector<40x40xf32> to vector<40xf32>
    %64 = vector.shape_cast %63 : vector<40xf32> to vector<40x1xf32>
    %65 = vector.broadcast %64 : vector<40x1xf32> to vector<40x40xf32>
    %66 = arith.subf %62, %65 : vector<40x40xf32>
    %67 = math.exp %66 : vector<40x40xf32>
    %cst_23 = arith.constant dense<0.000000e+00> : vector<40xf32>
    %68 = vector.multi_reduction <add>, %67, %cst_23 [1] : vector<40x40xf32> to vector<40xf32>
    %69 = vector.shape_cast %68 : vector<40xf32> to vector<40x1xf32>
    %70 = tpu.reciprocal %69 {approx = true} : vector<40x1xf32> -> vector<40x1xf32>
    %71 = vector.broadcast %70 : vector<40x1xf32> to vector<40x40xf32>
    %72 = arith.mulf %67, %71 : vector<40x40xf32>
    %73 = arith.truncf %72 : vector<40x40xf32> to vector<40x40xbf16>
    %cst_24 = arith.constant dense<0.000000e+00> : vector<40x32xf32>
    %74 = tpu.matmul %73, %57, %cst_24 {dimension_numbers = #tpu.dot_dimension_numbers<[1], [0], [0], [1], [0, 0, 1, 1], [], []>} : vector<40x40xbf16>, vector<40x32xbf16>, vector<40x32xf32> -> vector<40x32xf32>
    %c40 = arith.constant 40 : index
    %c0_25 = arith.constant 0 : index
    %75 = vector.load %arg16[%c40, %c0_25] : memref<80x64xf32, #tpu.memory_space<vmem>>, vector<40x32xf32>
    tpu.vector_store %arg16[%c40, %c0_25], %74 {strides = array<i32>} : memref<80x64xf32, #tpu.memory_space<vmem>>, vector<40x32xf32>,
    %76 = vector.extract_strided_slice %3 {offsets = [0, 1, 0, 0], sizes = [1, 1, 64, 32], strides = [1, 1, 1, 1]} : vector<3x2x64x32xbf16> to vector<1x1x64x32xbf16>
    %77 = vector.shape_cast %76 : vector<1x1x64x32xbf16> to vector<64x32xbf16>
    %cst_26 = arith.constant dense<0.000000e+00> : vector<80x32xf32>
    %78 = tpu.matmul %1, %77, %cst_26 {dimension_numbers = #tpu.dot_dimension_numbers<[1], [0], [0], [1], [0, 0, 1, 1], [], []>} : vector<80x64xbf16>, vector<64x32xbf16>, vector<80x32xf32> -> vector<80x32xf32>
    %79 = vector.extract_strided_slice %4 {offsets = [0, 1, 0, 0], sizes = [1, 1, 1, 32], strides = [1, 1, 1, 1]} : vector<3x2x1x32xf32> to vector<1x1x1x32xf32>
    %80 = vector.shape_cast %79 : vector<1x1x1x32xf32> to vector<1x32xf32>
    %81 = vector.broadcast %80 : vector<1x32xf32> to vector<80x32xf32>
    %82 = arith.addf %78, %81 : vector<80x32xf32>
    %83 = vector.extract_strided_slice %3 {offsets = [1, 1, 0, 0], sizes = [1, 1, 64, 32], strides = [1, 1, 1, 1]} : vector<3x2x64x32xbf16> to vector<1x1x64x32xbf16>
    %84 = vector.shape_cast %83 : vector<1x1x64x32xbf16> to vector<64x32xbf16>
    %cst_27 = arith.constant dense<0.000000e+00> : vector<80x32xf32>
    %85 = tpu.matmul %1, %84, %cst_27 {dimension_numbers = #tpu.dot_dimension_numbers<[1], [0], [0], [1], [0, 0, 1, 1], [], []>} : vector<80x64xbf16>, vector<64x32xbf16>, vector<80x32xf32> -> vector<80x32xf32>
    %86 = vector.extract_strided_slice %4 {offsets = [1, 1, 0, 0], sizes = [1, 1, 1, 32], strides = [1, 1, 1, 1]} : vector<3x2x1x32xf32> to vector<1x1x1x32xf32>
    %87 = vector.shape_cast %86 : vector<1x1x1x32xf32> to vector<1x32xf32>
    %88 = vector.broadcast %87 : vector<1x32xf32> to vector<80x32xf32>
    %89 = arith.addf %85, %88 : vector<80x32xf32>
    %90 = vector.extract_strided_slice %3 {offsets = [2, 1, 0, 0], sizes = [1, 1, 64, 32], strides = [1, 1, 1, 1]} : vector<3x2x64x32xbf16> to vector<1x1x64x32xbf16>
    %91 = vector.shape_cast %90 : vector<1x1x64x32xbf16> to vector<64x32xbf16>
    %cst_28 = arith.constant dense<0.000000e+00> : vector<80x32xf32>
    %92 = tpu.matmul %1, %91, %cst_28 {dimension_numbers = #tpu.dot_dimension_numbers<[1], [0], [0], [1], [0, 0, 1, 1], [], []>} : vector<80x64xbf16>, vector<64x32xbf16>, vector<80x32xf32> -> vector<80x32xf32>
    %93 = vector.extract_strided_slice %4 {offsets = [2, 1, 0, 0], sizes = [1, 1, 1, 32], strides = [1, 1, 1, 1]} : vector<3x2x1x32xf32> to vector<1x1x1x32xf32>
    %94 = vector.shape_cast %93 : vector<1x1x1x32xf32> to vector<1x32xf32>
    %95 = vector.broadcast %94 : vector<1x32xf32> to vector<80x32xf32>
    %96 = arith.addf %92, %95 : vector<80x32xf32>
    %cst_29 = arith.constant 0.176776692 : f32
    %97 = vector.broadcast %cst_29 : f32 to vector<80x32xf32>
    %98 = arith.mulf %82, %97 : vector<80x32xf32>
    %99 = vector.extract_strided_slice %98 {offsets = [0, 0], sizes = [40, 32], strides = [1, 1]} : vector<80x32xf32> to vector<40x32xf32>
    %100 = arith.truncf %99 : vector<40x32xf32> to vector<40x32xbf16>
    %101 = vector.extract_strided_slice %89 {offsets = [0, 0], sizes = [40, 32], strides = [1, 1]} : vector<80x32xf32> to vector<40x32xf32>
    %102 = arith.truncf %101 : vector<40x32xf32> to vector<40x32xbf16>
    %103 = vector.extract_strided_slice %96 {offsets = [0, 0], sizes = [40, 32], strides = [1, 1]} : vector<80x32xf32> to vector<40x32xf32>
    %104 = arith.truncf %103 : vector<40x32xf32> to vector<40x32xbf16>
    %cst_30 = arith.constant dense<0.000000e+00> : vector<40x40xf32>
    %105 = tpu.matmul %100, %102, %cst_30 {dimension_numbers = #tpu.dot_dimension_numbers<[1], [1], [0], [0], [0, 0, 1, 0], [], []>} : vector<40x32xbf16>, vector<40x32xbf16>, vector<40x40xf32> -> vector<40x40xf32>
    %106 = vector.extract_strided_slice %2 {offsets = [0, 0, 0], sizes = [1, 1, 40], strides = [1, 1, 1]} : vector<2x1x40xf32> to vector<1x1x40xf32>
    %107 = vector.shape_cast %106 : vector<1x1x40xf32> to vector<1x40xf32>
    %108 = vector.broadcast %107 : vector<1x40xf32> to vector<40x40xf32>
    %109 = arith.addf %105, %108 : vector<40x40xf32>
    %cst_31 = arith.constant dense<0xFF800000> : vector<40xf32>
    %110 = vector.multi_reduction <maximumf>, %109, %cst_31 [1] : vector<40x40xf32> to vector<40xf32>
    %111 = vector.shape_cast %110 : vector<40xf32> to vector<40x1xf32>
    %112 = vector.broadcast %111 : vector<40x1xf32> to vector<40x40xf32>
    %113 = arith.subf %109, %112 : vector<40x40xf32>
    %114 = math.exp %113 : vector<40x40xf32>
    %cst_32 = arith.constant dense<0.000000e+00> : vector<40xf32>
    %115 = vector.multi_reduction <add>, %114, %cst_32 [1] : vector<40x40xf32> to vector<40xf32>
    %116 = vector.shape_cast %115 : vector<40xf32> to vector<40x1xf32>
    %117 = tpu.reciprocal %116 {approx = true} : vector<40x1xf32> -> vector<40x1xf32>
    %118 = vector.broadcast %117 : vector<40x1xf32> to vector<40x40xf32>
    %119 = arith.mulf %114, %118 : vector<40x40xf32>
    %120 = arith.truncf %119 : vector<40x40xf32> to vector<40x40xbf16>
    %cst_33 = arith.constant dense<0.000000e+00> : vector<40x32xf32>
    %121 = tpu.matmul %120, %104, %cst_33 {dimension_numbers = #tpu.dot_dimension_numbers<[1], [0], [0], [1], [0, 0, 1, 1], [], []>} : vector<40x40xbf16>, vector<40x32xbf16>, vector<40x32xf32> -> vector<40x32xf32>
    %c0_34 = arith.constant 0 : index
    %c32 = arith.constant 32 : index
    %122 = vector.load %arg16[%c0_34, %c32] : memref<80x64xf32, #tpu.memory_space<vmem>>, vector<40x32xf32>
    tpu.vector_store %arg16[%c0_34, %c32], %121 {strides = array<i32>} : memref<80x64xf32, #tpu.memory_space<vmem>>, vector<40x32xf32>,
    %123 = vector.extract_strided_slice %98 {offsets = [40, 0], sizes = [40, 32], strides = [1, 1]} : vector<80x32xf32> to vector<40x32xf32>
    %124 = arith.truncf %123 : vector<40x32xf32> to vector<40x32xbf16>
    %125 = vector.extract_strided_slice %89 {offsets = [40, 0], sizes = [40, 32], strides = [1, 1]} : vector<80x32xf32> to vector<40x32xf32>
    %126 = arith.truncf %125 : vector<40x32xf32> to vector<40x32xbf16>
    %127 = vector.extract_strided_slice %96 {offsets = [40, 0], sizes = [40, 32], strides = [1, 1]} : vector<80x32xf32> to vector<40x32xf32>
    %128 = arith.truncf %127 : vector<40x32xf32> to vector<40x32xbf16>
    %cst_35 = arith.constant dense<0.000000e+00> : vector<40x40xf32>
    %129 = tpu.matmul %124, %126, %cst_35 {dimension_numbers = #tpu.dot_dimension_numbers<[1], [1], [0], [0], [0, 0, 1, 0], [], []>} : vector<40x32xbf16>, vector<40x32xbf16>, vector<40x40xf32> -> vector<40x40xf32>
    %130 = vector.extract_strided_slice %2 {offsets = [1, 0, 0], sizes = [1, 1, 40], strides = [1, 1, 1]} : vector<2x1x40xf32> to vector<1x1x40xf32>
    %131 = vector.shape_cast %130 : vector<1x1x40xf32> to vector<1x40xf32>
    %132 = vector.broadcast %131 : vector<1x40xf32> to vector<40x40xf32>
    %133 = arith.addf %129, %132 : vector<40x40xf32>
    %cst_36 = arith.constant dense<0xFF800000> : vector<40xf32>
    %134 = vector.multi_reduction <maximumf>, %133, %cst_36 [1] : vector<40x40xf32> to vector<40xf32>
    %135 = vector.shape_cast %134 : vector<40xf32> to vector<40x1xf32>
    %136 = vector.broadcast %135 : vector<40x1xf32> to vector<40x40xf32>
    %137 = arith.subf %133, %136 : vector<40x40xf32>
    %138 = math.exp %137 : vector<40x40xf32>
    %cst_37 = arith.constant dense<0.000000e+00> : vector<40xf32>
    %139 = vector.multi_reduction <add>, %138, %cst_37 [1] : vector<40x40xf32> to vector<40xf32>
    %140 = vector.shape_cast %139 : vector<40xf32> to vector<40x1xf32>
    %141 = tpu.reciprocal %140 {approx = true} : vector<40x1xf32> -> vector<40x1xf32>
    %142 = vector.broadcast %141 : vector<40x1xf32> to vector<40x40xf32>
    %143 = arith.mulf %138, %142 : vector<40x40xf32>
    %144 = arith.truncf %143 : vector<40x40xf32> to vector<40x40xbf16>
    %cst_38 = arith.constant dense<0.000000e+00> : vector<40x32xf32>
    %145 = tpu.matmul %144, %128, %cst_38 {dimension_numbers = #tpu.dot_dimension_numbers<[1], [0], [0], [1], [0, 0, 1, 1], [], []>} : vector<40x40xbf16>, vector<40x32xbf16>, vector<40x32xf32> -> vector<40x32xf32>
    %c40_39 = arith.constant 40 : index
    %c32_40 = arith.constant 32 : index
    %146 = vector.load %arg16[%c40_39, %c32_40] : memref<80x64xf32, #tpu.memory_space<vmem>>, vector<40x32xf32>
    tpu.vector_store %arg16[%c40_39, %c32_40], %145 {strides = array<i32>} : memref<80x64xf32, #tpu.memory_space<vmem>>, vector<40x32xf32>,
    %c0_41 = arith.constant 0 : index
    %c0_42 = arith.constant 0 : index
    %147 = vector.load %arg16[%c0_41, %c0_42] : memref<80x64xf32, #tpu.memory_space<vmem>>, vector<80x64xf32>
    %148 = arith.truncf %147 : vector<80x64xf32> to vector<80x64xbf16>
    %c0_43 = arith.constant 0 : index
    %c0_44 = arith.constant 0 : index
    %149 = vector.load %arg5[%c0_43, %c0_44] : memref<64x64xbf16, #tpu.memory_space<vmem>>, vector<64x64xbf16>
    %cst_45 = arith.constant dense<0.000000e+00> : vector<80x64xf32>
    %150 = tpu.matmul %148, %149, %cst_45 {dimension_numbers = #tpu.dot_dimension_numbers<[1], [0], [0], [1], [0, 0, 1, 1], [], []>} : vector<80x64xbf16>, vector<64x64xbf16>, vector<80x64xf32> -> vector<80x64xf32>
    %c0_46 = arith.constant 0 : index
    %c0_47 = arith.constant 0 : index
    %151 = vector.load %arg6[%c0_46, %c0_47] : memref<1x64xf32, #tpu.memory_space<vmem>>, vector<1x64xf32>
    %152 = vector.broadcast %151 : vector<1x64xf32> to vector<80x64xf32>
    %153 = arith.addf %150, %152 : vector<80x64xf32>
    %154 = arith.addf %153, %0 : vector<80x64xf32>
    %c0_48 = arith.constant 0 : index
    %c0_49 = arith.constant 0 : index
    %155 = vector.load %arg7[%c0_48, %c0_49] : memref<1x64xf32, #tpu.memory_space<vmem>>, vector<1x64xf32>
    %c0_50 = arith.constant 0 : index
    %c0_51 = arith.constant 0 : index
    %156 = vector.load %arg8[%c0_50, %c0_51] : memref<1x64xf32, #tpu.memory_space<vmem>>, vector<1x64xf32>
    %cst_52 = arith.constant dense<0.000000e+00> : vector<80xf32>
    %157 = vector.multi_reduction <add>, %154, %cst_52 [1] : vector<80x64xf32> to vector<80xf32>
    %158 = vector.shape_cast %157 : vector<80xf32> to vector<80x1xf32>
    %cst_53 = arith.constant 6.400000e+01 : f32
    %159 = vector.broadcast %cst_53 : f32 to vector<80x1xf32>
    %160 = arith.divf %158, %159 : vector<80x1xf32>
    %161 = vector.broadcast %160 : vector<80x1xf32> to vector<80x64xf32>
    %162 = arith.subf %154, %161 : vector<80x64xf32>
    %163 = arith.mulf %162, %162 : vector<80x64xf32>
    %cst_54 = arith.constant dense<0.000000e+00> : vector<80xf32>
    %164 = vector.multi_reduction <add>, %163, %cst_54 [1] : vector<80x64xf32> to vector<80xf32>
    %165 = vector.shape_cast %164 : vector<80xf32> to vector<80x1xf32>
    %cst_55 = arith.constant 6.400000e+01 : f32
    %166 = vector.broadcast %cst_55 : f32 to vector<80x1xf32>
    %167 = arith.divf %165, %166 : vector<80x1xf32>
    %168 = vector.broadcast %160 : vector<80x1xf32> to vector<80x64xf32>
    %169 = arith.subf %154, %168 : vector<80x64xf32>
    %cst_56 = arith.constant 9.99999996E-13 : f32
    %170 = vector.broadcast %cst_56 : f32 to vector<80x1xf32>
    %171 = arith.addf %167, %170 : vector<80x1xf32>
    %172 = math.rsqrt %171 : vector<80x1xf32>
    %173 = vector.broadcast %172 : vector<80x1xf32> to vector<80x64xf32>
    %174 = arith.mulf %169, %173 : vector<80x64xf32>
    %175 = vector.broadcast %155 : vector<1x64xf32> to vector<80x64xf32>
    %176 = arith.mulf %174, %175 : vector<80x64xf32>
    %177 = vector.broadcast %156 : vector<1x64xf32> to vector<80x64xf32>
    %178 = arith.addf %176, %177 : vector<80x64xf32>
    %179 = arith.truncf %178 : vector<80x64xf32> to vector<80x64xbf16>
    %c0_57 = arith.constant 0 : index
    %c0_58 = arith.constant 0 : index
    %180 = vector.load %arg9[%c0_57, %c0_58] : memref<64x128xbf16, #tpu.memory_space<vmem>>, vector<64x128xbf16>
    %cst_59 = arith.constant dense<0.000000e+00> : vector<80x128xf32>
    %181 = tpu.matmul %179, %180, %cst_59 {dimension_numbers = #tpu.dot_dimension_numbers<[1], [0], [0], [1], [0, 0, 1, 1], [], []>} : vector<80x64xbf16>, vector<64x128xbf16>, vector<80x128xf32> -> vector<80x128xf32>
    %c0_60 = arith.constant 0 : index
    %c0_61 = arith.constant 0 : index
    %182 = vector.load %arg10[%c0_60, %c0_61] : memref<1x128xf32, #tpu.memory_space<vmem>>, vector<1x128xf32>
    %183 = vector.broadcast %182 : vector<1x128xf32> to vector<80x128xf32>
    %184 = arith.addf %181, %183 : vector<80x128xf32>
    %cst_62 = arith.constant 5.000000e-01 : f32
    %185 = vector.broadcast %cst_62 : f32 to vector<80x128xf32>
    %186 = arith.mulf %185, %184 : vector<80x128xf32>
    %cst_63 = arith.constant 4.471500e-02 : f32
    %187 = vector.broadcast %cst_63 : f32 to vector<80x128xf32>
    %188 = arith.mulf %187, %184 : vector<80x128xf32>
    %189 = arith.mulf %188, %184 : vector<80x128xf32>
    %190 = arith.mulf %189, %184 : vector<80x128xf32>
    %191 = arith.addf %184, %190 : vector<80x128xf32>
    %cst_64 = arith.constant 0.797884583 : f32
    %192 = vector.broadcast %cst_64 : f32 to vector<80x128xf32>
    %193 = arith.mulf %192, %191 : vector<80x128xf32>
    %194 = math.tanh %193 : vector<80x128xf32>
    %cst_65 = arith.constant 1.000000e+00 : f32
    %195 = vector.broadcast %cst_65 : f32 to vector<80x128xf32>
    %196 = arith.addf %195, %194 : vector<80x128xf32>
    %197 = arith.mulf %186, %196 : vector<80x128xf32>
    %198 = arith.truncf %197 : vector<80x128xf32> to vector<80x128xbf16>
    %c0_66 = arith.constant 0 : index
    %c0_67 = arith.constant 0 : index
    %199 = vector.load %arg11[%c0_66, %c0_67] : memref<128x64xbf16, #tpu.memory_space<vmem>>, vector<128x64xbf16>
    %cst_68 = arith.constant dense<0.000000e+00> : vector<80x64xf32>
    %200 = tpu.matmul %198, %199, %cst_68 {dimension_numbers = #tpu.dot_dimension_numbers<[1], [0], [0], [1], [0, 0, 1, 1], [], []>} : vector<80x128xbf16>, vector<128x64xbf16>, vector<80x64xf32> -> vector<80x64xf32>
    %c0_69 = arith.constant 0 : index
    %c0_70 = arith.constant 0 : index
    %201 = vector.load %arg12[%c0_69, %c0_70] : memref<1x64xf32, #tpu.memory_space<vmem>>, vector<1x64xf32>
    %202 = vector.broadcast %201 : vector<1x64xf32> to vector<80x64xf32>
    %203 = arith.addf %200, %202 : vector<80x64xf32>
    %204 = arith.addf %203, %178 : vector<80x64xf32>
    %c0_71 = arith.constant 0 : index
    %c0_72 = arith.constant 0 : index
    %205 = vector.load %arg13[%c0_71, %c0_72] : memref<1x64xf32, #tpu.memory_space<vmem>>, vector<1x64xf32>
    %c0_73 = arith.constant 0 : index
    %c0_74 = arith.constant 0 : index
    %206 = vector.load %arg14[%c0_73, %c0_74] : memref<1x64xf32, #tpu.memory_space<vmem>>, vector<1x64xf32>
    %cst_75 = arith.constant dense<0.000000e+00> : vector<80xf32>
    %207 = vector.multi_reduction <add>, %204, %cst_75 [1] : vector<80x64xf32> to vector<80xf32>
    %208 = vector.shape_cast %207 : vector<80xf32> to vector<80x1xf32>
    %cst_76 = arith.constant 6.400000e+01 : f32
    %209 = vector.broadcast %cst_76 : f32 to vector<80x1xf32>
    %210 = arith.divf %208, %209 : vector<80x1xf32>
    %211 = vector.broadcast %210 : vector<80x1xf32> to vector<80x64xf32>
    %212 = arith.subf %204, %211 : vector<80x64xf32>
    %213 = arith.mulf %212, %212 : vector<80x64xf32>
    %cst_77 = arith.constant dense<0.000000e+00> : vector<80xf32>
    %214 = vector.multi_reduction <add>, %213, %cst_77 [1] : vector<80x64xf32> to vector<80xf32>
    %215 = vector.shape_cast %214 : vector<80xf32> to vector<80x1xf32>
    %cst_78 = arith.constant 6.400000e+01 : f32
    %216 = vector.broadcast %cst_78 : f32 to vector<80x1xf32>
    %217 = arith.divf %215, %216 : vector<80x1xf32>
    %218 = vector.broadcast %210 : vector<80x1xf32> to vector<80x64xf32>
    %219 = arith.subf %204, %218 : vector<80x64xf32>
    %cst_79 = arith.constant 9.99999996E-13 : f32
    %220 = vector.broadcast %cst_79 : f32 to vector<80x1xf32>
    %221 = arith.addf %217, %220 : vector<80x1xf32>
    %222 = math.rsqrt %221 : vector<80x1xf32>
    %223 = vector.broadcast %222 : vector<80x1xf32> to vector<80x64xf32>
    %224 = arith.mulf %219, %223 : vector<80x64xf32>
    %225 = vector.broadcast %205 : vector<1x64xf32> to vector<80x64xf32>
    %226 = arith.mulf %224, %225 : vector<80x64xf32>
    %227 = vector.broadcast %206 : vector<1x64xf32> to vector<80x64xf32>
    %228 = arith.addf %226, %227 : vector<80x64xf32>
    %c0_80 = arith.constant 0 : index
    %c0_81 = arith.constant 0 : index
    %229 = vector.load %arg15[%c0_80, %c0_81] : memref<80x64xf32, #tpu.memory_space<vmem>>, vector<80x64xf32>
    tpu.vector_store %arg15[%c0_80, %c0_81], %228 {strides = array<i32>} : memref<80x64xf32, #tpu.memory_space<vmem>>, vector<80x64xf32>,
    return
  }
  func.func @transform_0(%arg0: i32) -> (i32, i32) {
    %c0_i32 = arith.constant 0 : i32
    %c0_i32_0 = arith.constant 0 : i32
    return %arg0, %c0_i32 : i32, i32
  }
  func.func @transform_1(%arg0: i32) -> (i32, i32, i32) {
    %c0_i32 = arith.constant 0 : i32
    %c0_i32_0 = arith.constant 0 : i32
    %c0_i32_1 = arith.constant 0 : i32
    return %arg0, %c0_i32, %c0_i32_0 : i32, i32, i32
  }
  func.func @transform_2(%arg0: i32) -> (i32, i32, i32, i32) {
    %c0_i32 = arith.constant 0 : i32
    %c0_i32_0 = arith.constant 0 : i32
    %c0_i32_1 = arith.constant 0 : i32
    %c0_i32_2 = arith.constant 0 : i32
    %c0_i32_3 = arith.constant 0 : i32
    return %c0_i32, %c0_i32_0, %c0_i32_1, %c0_i32_2 : i32, i32, i32, i32
  }
  func.func @transform_3(%arg0: i32) -> (i32, i32, i32, i32) {
    %c0_i32 = arith.constant 0 : i32
    %c0_i32_0 = arith.constant 0 : i32
    %c0_i32_1 = arith.constant 0 : i32
    %c0_i32_2 = arith.constant 0 : i32
    %c0_i32_3 = arith.constant 0 : i32
    return %c0_i32, %c0_i32_0, %c0_i32_1, %c0_i32_2 : i32, i32, i32, i32
  }
  func.func @transform_4(%arg0: i32) -> (i32, i32) {
    %c0_i32 = arith.constant 0 : i32
    %c0_i32_0 = arith.constant 0 : i32
    %c0_i32_1 = arith.constant 0 : i32
    return %c0_i32, %c0_i32_0 : i32, i32
  }
  func.func @transform_5(%arg0: i32) -> (i32, i32) {
    %c0_i32 = arith.constant 0 : i32
    %c0_i32_0 = arith.constant 0 : i32
    %c0_i32_1 = arith.constant 0 : i32
    return %c0_i32, %c0_i32_0 : i32, i32
  }
  func.func @transform_6(%arg0: i32) -> (i32, i32) {
    %c0_i32 = arith.constant 0 : i32
    %c0_i32_0 = arith.constant 0 : i32
    %c0_i32_1 = arith.constant 0 : i32
    return %c0_i32, %c0_i32_0 : i32, i32
  }
  func.func @transform_7(%arg0: i32) -> (i32, i32) {
    %c0_i32 = arith.constant 0 : i32
    %c0_i32_0 = arith.constant 0 : i32
    %c0_i32_1 = arith.constant 0 : i32
    return %c0_i32, %c0_i32_0 : i32, i32
  }
  func.func @transform_8(%arg0: i32) -> (i32, i32) {
    %c0_i32 = arith.constant 0 : i32
    %c0_i32_0 = arith.constant 0 : i32
    %c0_i32_1 = arith.constant 0 : i32
    return %c0_i32, %c0_i32_0 : i32, i32
  }
  func.func @transform_9(%arg0: i32) -> (i32, i32) {
    %c0_i32 = arith.constant 0 : i32
    %c0_i32_0 = arith.constant 0 : i32
    %c0_i32_1 = arith.constant 0 : i32
    return %c0_i32, %c0_i32_0 : i32, i32
  }
  func.func @transform_10(%arg0: i32) -> (i32, i32) {
    %c0_i32 = arith.constant 0 : i32
    %c0_i32_0 = arith.constant 0 : i32
    %c0_i32_1 = arith.constant 0 : i32
    return %c0_i32, %c0_i32_0 : i32, i32
  }
  func.func @transform_11(%arg0: i32) -> (i32, i32) {
    %c0_i32 = arith.constant 0 : i32
    %c0_i32_0 = arith.constant 0 : i32
    %c0_i32_1 = arith.constant 0 : i32
    return %c0_i32, %c0_i32_0 : i32, i32
  }
  func.func @transform_12(%arg0: i32) -> (i32, i32) {
    %c0_i32 = arith.constant 0 : i32
    %c0_i32_0 = arith.constant 0 : i32
    %c0_i32_1 = arith.constant 0 : i32
    return %c0_i32, %c0_i32_0 : i32, i32
  }
  func.func @transform_13(%arg0: i32) -> (i32, i32) {
    %c0_i32 = arith.constant 0 : i32
    %c0_i32_0 = arith.constant 0 : i32
    %c0_i32_1 = arith.constant 0 : i32
    return %c0_i32, %c0_i32_0 : i32, i32
  }
  func.func @transform_14(%arg0: i32) -> (i32, i32) {
    %c0_i32 = arith.constant 0 : i32
    %c0_i32_0 = arith.constant 0 : i32
    return %arg0, %c0_i32 : i32, i32
  }
}

</mosaic_0001>

<bundles_post_ra>
// kernel: tpu_custom_call.1
= control target key start
LH: loop header
LB: loop body
LE: loop exit
PB: predicated region body
PF: predicated region fallthrough
CT: control target
= control target key end

     0   :  { %s4024_s29 = smov 0   ;;  %s5151_s0 = inlined_call_operand.vmem [shape: f32[160,64], index: 0, kind: input, shape index: {}]   ;;  %s5152_s1 = inlined_call_operand.vmem [shape: f32[4,1,40], index: 1, kind: input, shape index: {}]   ;;  %s5153_s2 = inlined_call_operand.vmem [shape: bf16[3,2,64,32], index: 2, kind: input, shape index: {}]   ;;  %s5154_s3 = inlined_call_operand.vmem [shape: f32[3,2,1,32], index: 3, kind: input, shape index: {}]   ;;  %s5155_s4 = inlined_call_operand.vmem [shape: bf16[64,64], index: 4, kind: input, shape index: {}]   ;;  %s5156_s5 = inlined_call_operand.vmem [shape: f32[1,64], index: 5, kind: input, shape index: {}]   ;;  %s5157_s6 = inlined_call_operand.vmem [shape: f32[1,64], index: 6, kind: input, shape index: {}]   ;;  %s5158_s7 = inlined_call_operand.vmem [shape: f32[1,64], index: 7, kind: input, shape index: {}]   ;;  %s5159_s8 = inlined_call_operand.vmem [shape: bf16[64,128], index: 8, kind: input, shape index: {}]   ;;  %s5160_s9 = inlined_call_operand.vmem [shape: f32[1,128], index: 9, kind: input, shape index: {}]   ;;  %s5161_s10 = inlined_call_operand.vmem [shape: bf16[128,64], index: 10, kind: input, shape index: {}]   ;;  %s5162_s11 = inlined_call_operand.vmem [shape: f32[1,64], index: 11, kind: input, shape index: {}]   ;;  %s5163_s12 = inlined_call_operand.vmem [shape: f32[1,64], index: 12, kind: input, shape index: {}]   ;;  %s5164_s13 = inlined_call_operand.vmem [shape: f32[1,64], index: 13, kind: input, shape index: {}]   ;;  %s5165_s14 = inlined_call_operand.vmem [shape: f32[160,64], index: 14, kind: output, shape index: {}]  }
   0x1 LB: > { %s3065_s30 = sadd.s32 4294967295, %s3944_s29   ;;  %p3069_p0 = scmp.ge.s32.totalorder %s3944_s29, 1  ;;  %s3944_s29 = sphi %s4024_s29, %s24_s29  }
   0x2   : > { %p423_p1 = scmp.lt.s32.totalorder %s3944_s29, 3 }
   0x4   : > { %p424_p2 = pnand %p3069_p0, %p423_p1 }
   0x5   : > { %s473_s19 = smul.u32 (!%p424_p2), 10, %s3065_s30  ;;  %s3071_s26 = sshll.u32 (!%p424_p2), %s3065_s30, 1 }
   0x6   : > { %427 = sbr.rel (%p424_p2) target bundleno = 3678 (0xe5e), region = 76  ;;  %p480_p4 = scmp.lt.s32.totalorder (!%p424_p2), %s3071_s26, 3 }
   0x7   : > { %p474_p3 = scmp.lt.s32.totalorder (!%p424_p2), %s473_s19, 19  ;;  %s3948_s20 = smov (!%p424_p2), 32  }
   0xb   : > { %v3748_v0 = vld [vmem:[%s5153_s2 + $0x58] sm:$0xff]   ;;  %v3946_v1 = vmov 0.0   ;;  %v3749_v2 = vld [vmem:[%s5153_s2 + $0x50] sm:$0xff]   ;;  %vm3947_vm0 = vmmov 0   ;;  %v3750_v4 = vld [vmem:[%s5153_s2 + $0x48] sm:$0xff]   ;;  %s5167_s19 = smov (!%p474_p3, %s473_s19), 19 }
   0xc   : > { %3355 = vmatprep.subr.bf16.mxu1 %v3946_v1  ;;  %3327 = vmatprep.subr.bf16.mxu0 %v3946_v1  ;;  %v3752_v3 = vld [vmem:[%s5153_s2 + $0x18] sm:$0xff]   ;;  %v3753_v5 = vld [vmem:[%s5153_s2 + $0x10] sm:$0xff]   ;;  %v3751_v6 = vld [vmem:[%s5153_s2 + $0x40] sm:$0xff]   ;;  %s3070_s28 = sshll.u32 %s5167_s19, 3  ;;  %vm592_vm1 = vcmask 523264   ;;  %vm912_vm2 = vcmask 261120  }
   0xd   : > { %3356 = vmatpush3.bf16.msra.mxu1 %v3748_v0  ;;  %3363 = vmatprep.mubr.msk.bf16.mxu1 %vm3947_vm0, %v3946_v1  ;;  %s4069_s17 = scalar_lea.vmem %s5151_s0, %s3070_s28  ;;  %v3754_v9 = vld [vmem:[%s5153_s2 + $0x8] sm:$0xff]   ;;  %v3755_v11 = vld [vmem:[%s5153_s2] sm:$0xff]   ;;  %v3756_v24 = vld [vmem:[%s5153_s2 + $0x98] sm:$0xff]   ;;  %vm1055_vm3 = vcmask 1043456   ;;  %s5169_s26 = smov (!%p480_p4, %s3071_s26), 3  ;;  %vm987_vm4 = vcmask 326656  }
   0xe   : > { %3357 = vmatprep.subr.bf16.mxu1 %v3946_v1  ;;  %3335 = vmatprep.mubr.msk.bf16.mxu0 %vm3947_vm0, %v3946_v1  ;;  %v491_v7 = vld [vmem:[%s4069_s17] sm:$0xff]  ;;  %v492_v8 = vld [vmem:[%s4069_s17 + $0x8] sm:$0xff]  ;;  %v493_v12 = vld [vmem:[%s4069_s17 + $0x10] sm:$0xff]  ;;  %s4260_s16 = scalar_lea.vmem %s5152_s1, %s5169_s26  ;;  %vm1888_vm5 = vcmask 523520   ;;  %s5098_s22 = scalar_lea.vmem %s5165_s14, %s3070_s28 }
   0xf   : > { %3328 = vmatpush3.bf16.msra.mxu0 %v3752_v3  ;;  %v4078_v10 = vpack.c.bf16 %v492_v8, %v491_v7  ;;  %v494_v13 = vld [vmem:[%s4069_s17 + $0x18] sm:$0xff]  ;;  %v495_v15 = vld [vmem:[%s4069_s17 + $0x20] sm:$0xff]  ;;  %v496_v16 = vld [vmem:[%s4069_s17 + $0x28] sm:$0xff] }
  0x10   : > { %3329 = vmatprep.subr.bf16.mxu0 %v3946_v1  ;;  %v4092_v14 = vpack.c.bf16 %v494_v13, %v493_v12  ;;  %v4104_v17 = vpack.c.bf16 %v496_v16, %v495_v15  ;;  %v497_v18 = vld [vmem:[%s4069_s17 + $0x30] sm:$0xff]  ;;  %v498_v19 = vld [vmem:[%s4069_s17 + $0x38] sm:$0xff]  ;;  %v499_v21 = vld [vmem:[%s4069_s17 + $0x40] sm:$0xff] }
  0x11   : > { %3358 = vmatpush3.bf16.msra.mxu1 %v3749_v2  ;;  %v4116_v20 = vpack.c.bf16 %v498_v19, %v497_v18  ;;  %v500_v22 = vld [vmem:[%s4069_s17 + $0x48] sm:$0xff]  ;;  %v3757_v25 = vld [vmem:[%s5153_s2 + $0x90] sm:$0xff]   ;;  %v3759_v27 = vld [vmem:[%s5153_s2 + $0x80] sm:$0xff]  }
  0x12   : > { %3359 = vmatprep.subr.bf16.mxu1 %v3946_v1  ;;  %v4128_v23 = vpack.c.bf16 %v500_v22, %v499_v21  ;;  %v3758_v26 = vld [vmem:[%s5153_s2 + $0x88] sm:$0xff]   ;;  %v4181_v42 = vld [vmem:[%s5154_s3 + $0x2] ss:$0 sm:$0xff] }
  0x13   : > { %3330 = vmatpush3.bf16.msra.mxu0 %v3753_v5  ;;  %v3073_v5 = vld [vmem:[%s5154_s3] ss:$0 sm:$0xff] }
  0x14   : > { %3331 = vmatprep.subr.bf16.mxu0 %v3946_v1 }
  0x15   : > { %3360 = vmatpush3.bf16.msra.mxu1 %v3750_v4 }
  0x16   : > { %3361 = vmatprep.subr.bf16.mxu1 %v3946_v1 }
  0x17   : > { %3332 = vmatpush3.bf16.msra.mxu0 %v3754_v9 }
  0x18   : > { %3333 = vmatprep.subr.bf16.mxu0 %v3946_v1 }
  0x19   : > { %3362 = vmatpush3.bf16.msra.mxu1 %v3751_v6 }
  0x1a   : > { %3411 = vmatprep.subr.bf16.mxu1 %v3946_v1 }
  0x1b   : > { %3334 = vmatpush3.bf16.msra.mxu0 %v3755_v11 }
  0x1c   : > { %3364 = vmatmul.mubr.msk.bf16.vlgmr.msra.gmra.mxu1 %vm592_vm1, %v4078_v10  ;;  %3383 = vmatprep.subr.bf16.mxu0 %v3946_v1 }
  0x1d   : > { %3367 = vmatprep.mubr.msk.bf16.mxu1 %vm3947_vm0, %v3946_v1 }
  0x1e   : > { %3336 = vmatmul.mubr.msk.bf16.vlgmr.msra.gmra.mxu0 %vm592_vm1, %v4078_v10 }
  0x1f   : > { %3339 = vmatprep.mubr.msk.bf16.mxu0 %vm3947_vm0, %v3946_v1  ;;  %3384 = vmatpush3.bf16.msra.mxu0 %v3756_v24 }
  0x20   : > { %3385 = vmatprep.subr.bf16.mxu0 %v3946_v1 }
  0x23   : > { %3386 = vmatpush3.bf16.msra.mxu0 %v3757_v25 }
  0x24   : > { %3368 = vmatmul.mubr.msk.bf16.gmra.mxu1 %vm592_vm1, %v4092_v14  ;;  %3387 = vmatprep.subr.bf16.mxu0 %v3946_v1 }
  0x25   : > { %3371 = vmatprep.mubr.msk.bf16.mxu1 %vm3947_vm0, %v3946_v1 }
  0x26   : > { %3340 = vmatmul.mubr.msk.bf16.gmra.mxu0 %vm592_vm1, %v4092_v14 }
  0x27   : > { %3343 = vmatprep.mubr.msk.bf16.mxu0 %vm3947_vm0, %v3946_v1  ;;  %3388 = vmatpush3.bf16.msra.mxu0 %v3758_v26 }
  0x28   : > { %3389 = vmatprep.subr.bf16.mxu0 %v3946_v1 }
  0x2b   : > { %3390 = vmatpush3.bf16.msra.mxu0 %v3759_v27 }
  0x2c   : > { %3372 = vmatmul.mubr.msk.bf16.gmra.mxu1 %vm592_vm1, %v4104_v17  ;;  %3447 = vmatprep.subr.bf16.mxu0 %v3946_v1 }
  0x2d   : > { %3375 = vmatprep.mubr.msk.bf16.mxu1 %vm3947_vm0, %v3946_v1 }
  0x2e   : > { %3344 = vmatmul.mubr.msk.bf16.gmra.mxu0 %vm592_vm1, %v4104_v17 }
  0x2f   : > { %3347 = vmatprep.mubr.msk.bf16.mxu0 %vm3947_vm0, %v3946_v1 }
  0x34   : > { %3376 = vmatmul.mubr.msk.bf16.gmra.mxu1 %vm592_vm1, %v4116_v20 }
  0x35   : > { %3379 = vmatprep.mubr.msk.bf16.mxu1 %vm3947_vm0, %v3946_v1 }
  0x36   : > { %3348 = vmatmul.mubr.msk.bf16.gmra.mxu0 %vm592_vm1, %v4116_v20 }
  0x37   : > { %3351 = vmatprep.mubr.msk.bf16.mxu0 %vm3947_vm0, %v3946_v1 }
  0x3c   : > { %3380 = vmatmul.mubr.msk.bf16.gmra.mxu1 %vm592_vm1, %v4128_v23 }
  0x3d   : > { %3417 = vmatprep.mubr.msk.bf16.mxu1 %vm3947_vm0, %v3946_v1 }
  0x3e   : > { %3352 = vmatmul.mubr.msk.bf16.gmra.mxu0 %vm592_vm1, %v4128_v23 }
  0x3f   : > { %3391 = vmatprep.mubr.msk.bf16.mxu0 %vm3947_vm0, %v3946_v1 }
  0x46   : > { %3392 = vmatmul.mubr.msk.bf16.vlgmr.msra.gmra.mxu0 %vm592_vm1, %v4078_v10 }
  0x47   : > { %3395 = vmatprep.mubr.msk.bf16.mxu0 %vm3947_vm0, %v3946_v1 }
  0x4e   : > { %3396 = vmatmul.mubr.msk.bf16.gmra.mxu0 %vm592_vm1, %v4092_v14 }
  0x4f   : > { %3399 = vmatprep.mubr.msk.bf16.mxu0 %vm3947_vm0, %v3946_v1 }
  0x56   : > { %3400 = vmatmul.mubr.msk.bf16.gmra.mxu0 %vm592_vm1, %v4104_v17 }
  0x57   : > { %3403 = vmatprep.mubr.msk.bf16.mxu0 %vm3947_vm0, %v3946_v1 }
  0x5e   : > { %3404 = vmatmul.mubr.msk.bf16.gmra.mxu0 %vm592_vm1, %v4116_v20 }
  0x5f   : > { %3407 = vmatprep.mubr.msk.bf16.mxu0 %vm3947_vm0, %v3946_v1 }
  0x66   : > { %3408 = vmatmul.mubr.msk.bf16.gmra.mxu0 %vm592_vm1, %v4128_v23 }
  0x67   : > { %3453 = vmatprep.mubr.msk.bf16.mxu0 %vm3947_vm0, %v3946_v1 }
  0xdc   : > { %v745_v28 = vpop.f32.mrf.mxu1 }
  0xdd   : > { %v746_v4 = vadd.f32 %v4181_v42, %v745_v28 }
  0xde   : > { %v3365_v29 = vpop.f32.mrf.mxu1  ;;  %v642_v31 = vpop.f32.mrf.mxu0 }
  0xdf   : > { %v643_v9 = vadd.f32 %v3073_v5, %v642_v31 }
  0xe0   : > { %v748_v30 = vpop.f32.mrf.mxu1  ;;  %v3337_v33 = vpop.f32.mrf.mxu0 }
  0xe1   : > { %v749_v63 = vadd.f32 %v4181_v42, %v748_v30  ;;  %v887_v21 = vmul.f32 0.17677669, %v643_v9 }
  0xe2   : > { %v3366_v32 = vpop.f32.mrf.mxu1  ;;  %v645_v35 = vpop.f32.mrf.mxu0 }
  0xe3   : > { %v900_v8 = vpack.c.bf16 %v749_v63, %v746_v4  ;;  %v646_v13 = vadd.f32 %v3073_v5, %v645_v35 }
  0xe4   : > { %v753_v34 = vpop.f32.mrf.mxu1  ;;  %v3338_v37 = vpop.f32.mrf.mxu0 }
  0xe5   : > { %v754_v55 = vadd.f32 %v4181_v42, %v753_v34  ;;  %v923_v19 = vsel %vm912_vm2, %v900_v8, 0  ;;  %v888_v26 = vmul.f32 0.17677669, %v646_v13 }
  0xe6   : > { %v3369_v36 = vpop.f32.mrf.mxu1  ;;  %v650_v39 = vpop.f32.mrf.mxu0 }
  0xe7   : > { %v897_v33 = vpack.c.bf16 %v888_v26, %v887_v21  ;;  %v651_v35 = vadd.f32 %v3073_v5, %v650_v39 }
  0xe8   : > { %v756_v38 = vpop.f32.mrf.mxu1  ;;  %v3341_v41 = vpop.f32.mrf.mxu0 }
  0xe9   : > { %v757_v51 = vadd.f32 %v4181_v42, %v756_v38  ;;  %v889_v37 = vmul.f32 0.17677669, %v651_v35 }
  0xea   : > { %v3370_v40 = vpop.f32.mrf.mxu1  ;;  %v653_v44 = vpop.f32.mrf.mxu0 }
  0xeb   : > { %v901_v58 = vpack.c.bf16 %v757_v51, %v754_v55  ;;  %v654_v36 = vadd.f32 %v3073_v5, %v653_v44 }
  0xec   : > { %v761_v43 = vpop.f32.mrf.mxu1  ;;  %v3342_v47 = vpop.f32.mrf.mxu0 }
  0xed   : > { %v762_v45 = vadd.f32 %v4181_v42, %v761_v43  ;;  %v926_v0 = vsel %vm912_vm2, %v901_v58, 0  ;;  %v890_v38 = vmul.f32 0.17677669, %v654_v36 }
  0xee   : > { %v3373_v46 = vpop.f32.mrf.mxu1  ;;  %v658_v50 = vpop.f32.mrf.mxu0 }
  0xef   : > { %v902_v48 = vpack.c.bf16 %v762_v45, %v762_v45  ;;  %v659_v43 = vadd.f32 %v3073_v5, %v658_v50  ;;  %v898_v44 = vpack.c.bf16 %v890_v38, %v889_v37 }
  0xf0   : > { %v764_v49 = vpop.f32.mrf.mxu1  ;;  %v3345_v54 = vpop.f32.mrf.mxu0 }
  0xf1   : > { %v929_v52 = vsel %vm912_vm2, %v902_v48, 0  ;;  %v765_v39 = vadd.f32 %v4181_v42, %v764_v49  ;;  %v891_v46 = vmul.f32 0.17677669, %v659_v43 }
  0xf2   : > { %v3374_v53 = vpop.f32.mrf.mxu1  ;;  %3412 = vmatpush3.bf16.xpose.msra.mxu1 %v929_v52  ;;  %v661_v57 = vpop.f32.mrf.mxu0 }
  0xf3   : > { %3413 = vmatprep.subr.bf16.mxu1 %v3946_v1  ;;  %v662_v47 = vadd.f32 %v3073_v5, %v661_v57  ;;  %v899_v51 = vpack.c.bf16 %v891_v46, %v891_v46 }
  0xf4   : > { %v769_v56 = vpop.f32.mrf.mxu1  ;;  %v3346_v60 = vpop.f32.mrf.mxu0 }
  0xf5   : > { %v770_v41 = vadd.f32 %v4181_v42, %v769_v56  ;;  %v892_v52 = vmul.f32 0.17677669, %v662_v47 }
  0xf6   : > { %v3377_v59 = vpop.f32.mrf.mxu1  ;;  %v666_v62 = vpop.f32.mrf.mxu0 }
  0xf7   : > { %v1123_v45 = vpack.c.bf16 %v770_v41, %v765_v39  ;;  %v667_v48 = vadd.f32 %v3073_v5, %v666_v62  ;;  %v4263_v41 = vld [vmem:[%s4260_s16] ss:$0 sm:$0xff] }
  0xf8   : > { %v772_v61 = vpop.f32.mrf.mxu1  ;;  %v3349_v3 = vpop.f32.mrf.mxu0 }
  0xf9   : > { %v773_v25 = vadd.f32 %v4181_v42, %v772_v61  ;;  %v893_v53 = vmul.f32 0.17677669, %v667_v48  ;;  %v4221_v50 = vsel %vm912_vm2, %v1123_v45, 0 }
  0xfa   : > { %v3378_v2 = vpop.f32.mrf.mxu1  ;;  %3414 = vmatpush3.bf16.xpose.msra.mxu1 %v926_v0  ;;  %v669_v7 = vpop.f32.mrf.mxu0 }
  0xfb   : > { %3415 = vmatprep.subr.bf16.mxu1 %v3946_v1  ;;  %v670_v49 = vadd.f32 %v3073_v5, %v669_v7  ;;  %v3093_v2 = vld [vmem:[%s5154_s3 + $0x4] ss:$0 sm:$0xff] }
  0xfc   : > { %v777_v6 = vpop.f32.mrf.mxu1  ;;  %v3350_v12 = vpop.f32.mrf.mxu0 }
  0xfd   : > { %v778_v27 = vadd.f32 %v4181_v42, %v777_v6  ;;  %v894_v55 = vmul.f32 0.17677669, %v670_v49 }
  0xfe   : > { %v3381_v11 = vpop.f32.mrf.mxu1  ;;  %v674_v16 = vpop.f32.mrf.mxu0 }
  0xff   : > { %v1124_v34 = vpack.c.bf16 %v778_v27, %v773_v25  ;;  %v675_v54 = vadd.f32 %v3073_v5, %v674_v16 }
 0x100   : > { %v780_v15 = vpop.f32.mrf.mxu1  ;;  %v3353_v22 = vpop.f32.mrf.mxu0 }
 0x101   : > { %v781_v18 = vadd.f32 %v4181_v42, %v780_v15  ;;  %v4211_v40 = vsel %vm912_vm2, %v1124_v34, 0  ;;  %v1120_v42 = vpack.c.bf16 %v893_v53, %v892_v52  ;;  %v895_v56 = vmul.f32 0.17677669, %v675_v54 }
 0x102   : > { %3416 = vmatpush3.bf16.xpose.msra.mxu1 %v923_v19  ;;  %v3382_v24 = vpop.f32.mrf.mxu1  ;;  %v677_v29 = vpop.f32.mrf.mxu0 }
 0x103   : > { %v1125_v28 = vpack.c.bf16 %v781_v18, %v781_v18  ;;  %3429 = vmatprep.subr.bf16.mxu1 %v3946_v1  ;;  %v4203_v31 = vadd.f32 %v3073_v5, %v677_v29  ;;  %v1121_v57 = vpack.c.bf16 %v895_v56, %v894_v55 }
 0x104   : > { %v3354_v32 = vpop.f32.mrf.mxu0 }
 0x105   : > { %v4201_v30 = vsel %vm912_vm2, %v1125_v28, 0 }
 0x106   : > { %3448 = vmatpush3.bf16.xpose.msra.mxu0 %v4201_v30  ;;  %v848_v58 = vpop.f32.mrf.mxu0 }
 0x107   : > { %3449 = vmatprep.subr.bf16.mxu0 %v3946_v1  ;;  %v849_v15 = vadd.f32 %v3093_v2, %v848_v58 }
 0x108   : > { %v3393_v59 = vpop.f32.mrf.mxu0 }
 0x109   : > { %3418 = vmatmul.mubr.msk.bf16.vlgmr.msra.gmra.mxu1 %vm912_vm2, %v897_v33 }
 0x10a   : > { %3421 = vmatprep.mubr.msk.bf16.mxu1 %vm3947_vm0, %v3946_v1  ;;  %v851_v60 = vpop.f32.mrf.mxu0 }
 0x10b   : > { %v852_v16 = vadd.f32 %v3093_v2, %v851_v60 }
 0x10c   : > { %v3394_v61 = vpop.f32.mrf.mxu0 }
 0x10d   : > { %v903_v24 = vpack.c.bf16 %v852_v16, %v849_v15 }
 0x10e   : > { %3450 = vmatpush3.bf16.xpose.msra.mxu0 %v4211_v40  ;;  %v856_v62 = vpop.f32.mrf.mxu0 }
 0x10f   : > { %3451 = vmatprep.subr.bf16.mxu0 %v3946_v1  ;;  %v857_v6 = vadd.f32 %v3093_v2, %v856_v62 }
 0x110   : > { %v3397_v63 = vpop.f32.mrf.mxu0 }
 0x111   : > { %3422 = vmatmul.mubr.msk.bf16.gmra.mxu1 %vm912_vm2, %v898_v44 }
 0x112   : > { %3425 = vmatprep.mubr.msk.bf16.mxu1 %vm3947_vm0, %v3946_v1  ;;  %v859_v0 = vpop.f32.mrf.mxu0 }
 0x113   : > { %v860_v7 = vadd.f32 %v3093_v2, %v859_v0 }
 0x114   : > { %v3398_v3 = vpop.f32.mrf.mxu0 }
 0x115   : > { %v904_v18 = vpack.c.bf16 %v860_v7, %v857_v6 }
 0x116   : > { %3452 = vmatpush3.bf16.xpose.msra.mxu0 %v4221_v50  ;;  %v864_v4 = vpop.f32.mrf.mxu0 }
 0x117   : > { %3483 = vmatprep.subr.bf16.mxu0 %v3946_v1  ;;  %v865_v5 = vadd.f32 %v3093_v2, %v864_v4 }
 0x118   : > { %v3401_v8 = vpop.f32.mrf.mxu0 }
 0x119   : > { %3426 = vmatmul.mubr.msk.bf16.gmra.mxu1 %vm912_vm2, %v899_v51  ;;  %v905_v9 = vpack.c.bf16 %v865_v5, %v865_v5 }
 0x11a   : > { %3435 = vmatprep.mubr.msk.bf16.mxu1 %vm3947_vm0, %v3946_v1  ;;  %v867_v11 = vpop.f32.mrf.mxu0 }
 0x11b   : > { %v1057_v12 = vsel %vm1055_vm3, %v905_v9, 0  ;;  %v4238_v13 = vadd.f32 %v3093_v2, %v867_v11 }
 0x11c   : > { %v3402_v19 = vpop.f32.mrf.mxu0  ;;  %3430 = vmatpush3.bf16.msra.mxu1 %v1057_v12 }
 0x11d   : > { %3454 = vmatmul.mubr.msk.bf16.vlgmr.msra.gmra.mxu0 %vm912_vm2, %v1120_v42  ;;  %3431 = vmatprep.subr.bf16.mxu1 %v3946_v1 }
 0x11e   : > { %3457 = vmatprep.mubr.msk.bf16.mxu0 %vm3947_vm0, %v3946_v1  ;;  %v872_v21 = vpop.f32.mrf.mxu0 }
 0x11f   : > { %v4241_v22 = vadd.f32 %v3093_v2, %v872_v21 }
 0x120   : > { %v3405_v25 = vpop.f32.mrf.mxu0  ;;  %3432 = vmatpush3.bf16.msra.mxu1 %v904_v18 }
 0x121   : > { %v1126_v26 = vpack.c.bf16 %v4241_v22, %v4238_v13  ;;  %3433 = vmatprep.subr.bf16.mxu1 %v3946_v1 }
 0x122   : > { %v875_v27 = vpop.f32.mrf.mxu0 }
 0x123   : > { %v4246_v28 = vadd.f32 %v3093_v2, %v875_v27 }
 0x124   : > { %v3406_v29 = vpop.f32.mrf.mxu0  ;;  %3434 = vmatpush3.bf16.msra.mxu1 %v903_v24 }
 0x125   : > { %3458 = vmatmul.mubr.msk.bf16.gmra.mxu0 %vm912_vm2, %v1121_v57  ;;  %3731 = vmatprep.subr.bf16.mxu1 %v3946_v1 }
 0x126   : > { %3491 = vmatprep.mubr.msk.bf16.mxu0 %vm3947_vm0, %v3946_v1  ;;  %v880_v32 = vpop.f32.mrf.mxu0 }
 0x127   : > { %v4249_v33 = vadd.f32 %v3093_v2, %v880_v32 }
 0x128   : > { %v3409_v34 = vpop.f32.mrf.mxu0 }
 0x129   : > { %v1127_v35 = vpack.c.bf16 %v4249_v33, %v4246_v28 }
 0x12a   : > { %v883_v36 = vpop.f32.mrf.mxu0 }
 0x12b   : > { %v4253_v37 = vadd.f32 %v3093_v2, %v883_v36 }
 0x12c   : > { %v3410_v38 = vpop.f32.mrf.mxu0 }
 0x1c9   : > { %v965_v43 = vpop.f32.mrf.mxu1 }
 0x1ca   : > { %v966_v39 = vadd.f32 %v4263_v41, %v965_v43 }
 0x1cb   : > { %v3419_v44 = vpop.f32.mrf.mxu1 }
 0x1cc   : > { %v988_v45 = vsel %vm987_vm4, %v966_v39, -inf }
 0x1cd   : > { %989 = vmax.xlane.f32.xlu0 %v988_v45  ;;  %v968_v46 = vpop.f32.mrf.mxu1  ;;  %v4279_v45 = vld [vmem:[%s4260_s16 + $0x1] ss:$0 sm:$0xff] }
 0x1ce   : > { %v969_v47 = vadd.f32 %v4263_v41, %v968_v46 }
 0x1cf   : > { %v3420_v48 = vpop.f32.mrf.mxu1 }
 0x1d0   : > { %v991_v51 = vsel %vm987_vm4, %v969_v47, -inf }
 0x1d1   : > { %992 = vmax.xlane.f32.xlu0 %v991_v51  ;;  %v973_v52 = vpop.f32.mrf.mxu1 }
 0x1d2   : > { %v974_v53 = vadd.f32 %v4263_v41, %v973_v52 }
 0x1d3   : > { %v3423_v42 = vpop.f32.mrf.mxu1 }
 0x1d4   : > { %v994_v49 = vsel %vm987_vm4, %v974_v53, -inf }
 0x1d5   : > { %995 = vmax.xlane.f32.xlu1 %v994_v49  ;;  %v976_v54 = vpop.f32.mrf.mxu1 }
 0x1d6   : > { %v977_v55 = vadd.f32 %v4263_v41, %v976_v54 }
 0x1d7   : > { %v3424_v56 = vpop.f32.mrf.mxu1 }
 0x1d8   : > { %v997_v57 = vsel %vm987_vm4, %v977_v55, -inf }
 0x1d9   : > { %998 = vmax.xlane.f32.xlu1 %v997_v57  ;;  %v981_v58 = vpop.f32.mrf.mxu1 }
 0x1da   : > { %v982_v59 = vadd.f32 %v4263_v41, %v981_v58 }
 0x1db   : > { %v3427_v60 = vpop.f32.mrf.mxu1 }
 0x1dc   : > { %v1000_v61 = vsel %vm987_vm4, %v982_v59, -inf }
 0x1dd   : > { %1001 = vmax.xlane.f32.xlu0 %v1000_v61  ;;  %v984_v62 = vpop.f32.mrf.mxu1  ;;  %v1187_v63 = vpop.f32.mrf.mxu0 }
 0x1df   : > { %v3428_v0 = vpop.f32.mrf.mxu1  ;;  %v3455_v2 = vpop.f32.mrf.mxu0 }
 0x1e1   : > { %v1190_v3 = vpop.f32.mrf.mxu0 }
 0x1e3   : > { %v3456_v4 = vpop.f32.mrf.mxu0 }
 0x1e5   : > { %v1195_v5 = vpop.f32.mrf.mxu0 }
 0x1e6   : > { %v1196_v51 = vadd.f32 %v4279_v45, %v1195_v5 }
 0x1e7   : > { %v3459_v6 = vpop.f32.mrf.mxu0 }
 0x1e8   : > { %v1215_v54 = vsel %vm987_vm4, %v1196_v51, -inf }
 0x1e9   : > { %v1198_v56 = vpop.f32.mrf.mxu0 }
 0x1ea   : > { %v4293_v57 = vadd.f32 %v4279_v45, %v1198_v56 }
 0x1eb   : > { %v3460_v58 = vpop.f32.mrf.mxu0 }
 0x256   : > { %v990_v7 = vpop.xlane.xlu0 %989 }
 0x257   : > { %v1003_v8 = vsub.f32 %v966_v39, %v990_v7 }
 0x259   : > { %v1008_v9 = vmul.f32 1.442695, %v1003_v8 }
 0x25a   : > { %v993_v11 = vpop.xlane.xlu0 %992 }
 0x25b   : > { %3788 = vpow2.f32 %v1008_v9  ;;  %v1004_v12 = vsub.f32 %v969_v47, %v993_v11  ;;  %v1188_v47 = vadd.f32 %v4279_v45, %v1187_v63 }
 0x25d   : > { %v1010_v15 = vmul.f32 1.442695, %v1004_v12  ;;  %v1209_v49 = vsel %vm987_vm4, %v1188_v47, -inf }
 0x25e   : > { %v996_v16 = vpop.xlane.xlu1 %995 }
 0x25f   : > { %3790 = vpow2.f32 %v1010_v15  ;;  %v1005_v18 = vsub.f32 %v974_v53, %v996_v16  ;;  %v4285_v53 = vadd.f32 %v4279_v45, %v1190_v3 }
 0x261   : > { %v1012_v19 = vmul.f32 1.442695, %v1005_v18 }
 0x262   : > { %v999_v21 = vpop.xlane.xlu1 %998 }
 0x263   : > { %3792 = vpow2.f32 %v1012_v19  ;;  %v1006_v24 = vsub.f32 %v977_v55, %v999_v21  ;;  %v1212_v55 = vsel %vm987_vm4, %v4285_v53, -inf }
 0x265   : > { %v1014_v25 = vmul.f32 1.442695, %v1006_v24 }
 0x266   : > { %v1002_v27 = vpop.xlane.xlu0 %1001 }
 0x267   : > { %3794 = vpow2.f32 %v1014_v25  ;;  %v1007_v29 = vsub.f32 %v982_v59, %v1002_v27  ;;  %v1218_v59 = vsel %vm987_vm4, %v4293_v57, -inf }
 0x268   : > { %v3789_v32 = vpop.eup %3788 }
 0x269   : > { %v1016_v34 = vmul.f32 1.442695, %v1007_v29  ;;  %v1018_v36 = vsel %vm987_vm4, %v3789_v32, 0.0 }
 0x26a   : > { %1019 = vadd.xlane.f32.xlu1 %v1018_v36  ;;  %v896_v36 = vmul.f32 0.17677669, %v4203_v31 }
 0x26b   : > { %3796 = vpow2.f32 %v1016_v34 }
 0x26c   : > { %v3791_v38 = vpop.eup %3790 }
 0x26d   : > { %v1021_v43 = vsel %vm987_vm4, %v3791_v38, 0.0 }
 0x26e   : > { %1022 = vadd.xlane.f32.xlu0 %v1021_v43  ;;  %v1122_v43 = vpack.c.bf16 %v896_v36, %v896_v36  ;;  %v3765_v36 = vld [vmem:[%s5153_s2 + $0x30] sm:$0xff]  }
 0x270   : > { %v3793_v39 = vpop.eup %3792 }
 0x271   : > { %v1024_v44 = vsel %vm987_vm4, %v3793_v39, 0.0 }
 0x272   : > { %1025 = vadd.xlane.f32.xlu1 %v1024_v44 }
 0x274   : > { %v3795_v46 = vpop.eup %3794 }
 0x275   : > { %v1027_v48 = vsel %vm987_vm4, %v3795_v46, 0.0 }
 0x276   : > { %1028 = vadd.xlane.f32.xlu0 %v1027_v48 }
 0x278   : > { %v3797_v52 = vpop.eup %3796 }
 0x279   : > { %v1030_v42 = vsel %vm987_vm4, %v3797_v52, 0.0 }
 0x27a   : > { %1031 = vadd.xlane.f32.xlu1 %v1030_v42  ;;  %1210 = vmax.xlane.f32.xlu0 %v1209_v49 }
 0x27e   : > { %1213 = vmax.xlane.f32.xlu1 %v1212_v55  ;;  %1216 = vmax.xlane.f32.xlu0 %v1215_v54 }
 0x282   : > { %1219 = vmax.xlane.f32.xlu1 %v1218_v59 }
 0x2f3   : > { %v1020_v60 = vpop.xlane.xlu1 %1019 }
 0x2f4   : > { %3798 = vrcp.f32 %v1020_v60 }
 0x2f7   : > { %v1023_v61 = vpop.xlane.xlu0 %1022 }
 0x2f8   : > { %3800 = vrcp.f32 %v1023_v61 }
 0x2fb   : > { %v1026_v62 = vpop.xlane.xlu1 %1025 }
 0x2fc   : > { %3802 = vrcp.f32 %v1026_v62 }
 0x2ff   : > { %v1029_v63 = vpop.xlane.xlu0 %1028 }
 0x300   : > { %3804 = vrcp.f32 %v1029_v63 }
 0x301   : > { %v3799_v0 = vpop.eup %3798 }
 0x302   : > { %v1038_v6 = vmul.f32 %v3799_v0, %v3789_v32 }
 0x303   : > { %v1032_v2 = vpop.xlane.xlu1 %1031  ;;  %v1211_v3 = vpop.xlane.xlu0 %1210 }
 0x304   : > { %3806 = vrcp.f32 %v1032_v2  ;;  %v1224_v4 = vsub.f32 %v1188_v47, %v1211_v3 }
 0x305   : > { %v3801_v5 = vpop.eup %3800 }
 0x306   : > { %v1039_v7 = vmul.f32 %v3801_v5, %v3791_v38  ;;  %v1229_v8 = vmul.f32 1.442695, %v1224_v4  ;;  %v1128_v38 = vpack.c.bf16 %v4253_v37, %v4253_v37 }
 0x307   : > { %v1217_v9 = vpop.xlane.xlu0 %1216  ;;  %v1214_v37 = vpop.xlane.xlu1 %1213 }
 0x308   : > { %v1043_v11 = vpack.c.bf16 %v1039_v7, %v1038_v6  ;;  %3808 = vpow2.f32 %v1229_v8  ;;  %v1226_v12 = vsub.f32 %v1196_v51, %v1217_v9  ;;  %v1225_v28 = vsub.f32 %v4285_v53, %v1214_v37 }
 0x309   : > { %v3803_v16 = vpop.eup %3802 }
 0x30a   : > { %v1233_v15 = vmul.f32 1.442695, %v1226_v12  ;;  %3436 = vmatmul.mubr.msk.bf16.vlgmr.msra.gmra.mxu1 %vm987_vm4, %v1043_v11  ;;  %v1040_v19 = vmul.f32 %v3803_v16, %v3793_v39  ;;  %v1277_v39 = vsel %vm1055_vm3, %v1128_v38, 0  ;;  %v1231_v13 = vmul.f32 1.442695, %v1225_v28  ;;  %v3766_v38 = vld [vmem:[%s5153_s2 + $0x28] sm:$0xff]  }
 0x30b   : > { %3734 = vmatpush3.bf16.xpose.msra.mxu1 %v4201_v30  ;;  %3439 = vmatprep.mubr.msk.bf16.mxu1 %vm3947_vm0, %v3946_v1 }
 0x30c   : > { %3732 = vmatprep.subr.bf16.mxu1 %v3946_v1  ;;  %3810 = vpow2.f32 %v1233_v15 }
 0x30d   : > { %v3805_v18 = vpop.eup %3804  ;;  %3812 = vpow2.f32 %v1231_v13 }
 0x30e   : > { %v1041_v21 = vmul.f32 %v3805_v18, %v3795_v46 }
 0x310   : > { %v1044_v24 = vpack.c.bf16 %v1041_v21, %v1040_v19 }
 0x311   : > { %v3807_v25 = vpop.eup %3806 }
 0x312   : > { %3440 = vmatmul.mubr.msk.bf16.gmra.mxu1 %vm987_vm4, %v1044_v24  ;;  %v1042_v30 = vmul.f32 %v3807_v25, %v3797_v52 }
 0x313   : > { %3735 = vmatpush3.bf16.xpose.msra.mxu1 %v4211_v40  ;;  %3443 = vmatprep.mubr.msk.bf16.mxu1 %vm3947_vm0, %v3946_v1 }
 0x314   : > { %3733 = vmatprep.subr.bf16.mxu1 %v3946_v1  ;;  %v1045_v32 = vpack.c.bf16 %v1042_v30, %v1042_v30 }
 0x315   : > { %v4307_v27 = vpop.eup %3808 }
 0x316   : > { %v1239_v29 = vsel %vm987_vm4, %v4307_v27, 0.0 }
 0x317   : > { %1240 = vadd.xlane.f32.xlu1 %v1239_v29  ;;  %v3760_v29 = vld [vmem:[%s5153_s2 + $0x78] sm:$0xff]  }
 0x319   : > { %v4311_v34 = vpop.eup %3810 }
 0x31a   : > { %3444 = vmatmul.mubr.msk.bf16.gmra.mxu1 %vm987_vm4, %v1045_v32  ;;  %v1245_v40 = vsel %vm987_vm4, %v4311_v34, 0.0  ;;  %v3762_v32 = vld [vmem:[%s5153_s2 + $0x68] sm:$0xff]  }
 0x31b   : > { %3736 = vmatpush3.bf16.xpose.msra.mxu1 %v4221_v50  ;;  %3461 = vmatprep.mubr.msk.bf16.mxu1 %vm3947_vm0, %v3946_v1 }
 0x31c   : > { %1246 = vadd.xlane.f32.xlu1 %v1245_v40  ;;  %3465 = vmatprep.subr.bf16.mxu1 %v3946_v1  ;;  %v3764_v40 = vld [vmem:[%s5153_s2 + $0x38] sm:$0xff]  }
 0x31d   : > { %3484 = vmatpush3.bf16.msra.mxu0 %v3764_v40 }
 0x31e   : > { %3485 = vmatprep.subr.bf16.mxu0 %v3946_v1 }
 0x321   : > { %3486 = vmatpush3.bf16.msra.mxu0 %v3765_v36 }
 0x322   : > { %3462 = vmatmul.mubr.msk.bf16.vlgmr.msra.gmra.mxu1 %vm912_vm2, %v1122_v43  ;;  %3487 = vmatprep.subr.bf16.mxu0 %v3946_v1  ;;  %v3767_v43 = vld [vmem:[%s5153_s2 + $0x20] sm:$0xff]  }
 0x323   : > { %3466 = vmatpush3.bf16.msra.mxu1 %v1277_v39  ;;  %3471 = vmatprep.mubr.msk.bf16.mxu1 %vm3947_vm0, %v3946_v1 }
 0x324   : > { %3467 = vmatprep.subr.bf16.mxu1 %v3946_v1 }
 0x325   : > { %3488 = vmatpush3.bf16.msra.mxu0 %v3766_v38 }
 0x326   : > { %3489 = vmatprep.subr.bf16.mxu0 %v3946_v1 }
 0x327   : > { %3468 = vmatpush3.bf16.msra.mxu1 %v1127_v35  ;;  %v1220_v35 = vpop.xlane.xlu1 %1219 }
 0x328   : > { %3469 = vmatprep.subr.bf16.mxu1 %v3946_v1  ;;  %v1227_v22 = vsub.f32 %v4293_v57, %v1220_v35  ;;  %v3813_v57 = vpop.eup %3812 }
 0x329   : > { %v1242_v61 = vsel %vm987_vm4, %v3813_v57, 0.0  ;;  %3490 = vmatpush3.bf16.msra.mxu0 %v3767_v43 }
 0x32a   : > { %v1235_v51 = vmul.f32 1.442695, %v1227_v22  ;;  %3539 = vmatprep.subr.bf16.mxu0 %v3946_v1 }
 0x32b   : > { %3470 = vmatpush3.bf16.msra.mxu1 %v1126_v26 }
 0x32c   : > { %3511 = vmatprep.subr.bf16.mxu1 %v3946_v1  ;;  %3814 = vpow2.f32 %v1235_v51  ;;  %3492 = vmatmul.mubr.msk.bf16.vlgmr.msra.gmra.mxu0 %vm592_vm1, %v4078_v10  ;;  %v3770_v51 = vld [vmem:[%s5153_s2 + $0xa8] sm:$0xff]  }
 0x32d   : > { %3495 = vmatprep.mubr.msk.bf16.mxu0 %vm3947_vm0, %v3946_v1 }
 0x334   : > { %3496 = vmatmul.mubr.msk.bf16.gmra.mxu0 %vm592_vm1, %v4092_v14 }
 0x335   : > { %3499 = vmatprep.mubr.msk.bf16.mxu0 %vm3947_vm0, %v3946_v1 }
 0x339   : > { %v3815_v62 = vpop.eup %3814 }
 0x33a   : > { %v1248_v63 = vsel %vm987_vm4, %v3815_v62, 0.0 }
 0x33c   : > { %3500 = vmatmul.mubr.msk.bf16.gmra.mxu0 %vm592_vm1, %v4104_v17 }
 0x33d   : > { %3503 = vmatprep.mubr.msk.bf16.mxu0 %vm3947_vm0, %v3946_v1 }
 0x344   : > { %3504 = vmatmul.mubr.msk.bf16.gmra.mxu0 %vm592_vm1, %v4116_v20 }
 0x345   : > { %3507 = vmatprep.mubr.msk.bf16.mxu0 %vm3947_vm0, %v3946_v1 }
 0x34c   : > { %3508 = vmatmul.mubr.msk.bf16.gmra.mxu0 %vm592_vm1, %v4128_v23 }
 0x34d   : > { %3547 = vmatprep.mubr.msk.bf16.mxu0 %vm3947_vm0, %v3946_v1 }
 0x3a0   : > { %v1241_v2 = vpop.xlane.xlu1 %1240 }
 0x3a1   : > { %3816 = vrcp.f32 %v1241_v2 }
 0x3a5   : > { %v1247_v7 = vpop.xlane.xlu1 %1246 }
 0x3ae   : > { %v3817_v8 = vpop.eup %3816 }
 0x3af   : > { %v1259_v15 = vmul.f32 %v3817_v8, %v4307_v27  ;;  %v3761_v27 = vld [vmem:[%s5153_s2 + $0x70] sm:$0xff]  }
 0x3ca   : > { %v1093_v31 = vpop.f32.mrf.mxu1 }
 0x3cb   : > { %1115 = vst.msk [vmem:[#allocation2] sm:$0xff] %vm912_vm2, %v1093_v31 }
 0x3cc   : > { %v3437_v50 = vpop.f32.mrf.mxu1 }
 0x3ce   : > { %v1096_v44 = vpop.f32.mrf.mxu1 }
 0x3cf   : > { %1116 = vst.msk [vmem:[#allocation2 + $0x8] sm:$0xff] %vm912_vm2, %v1096_v44 }
 0x3d0   : > { %v3438_v46 = vpop.f32.mrf.mxu1 }
 0x3d2   : > { %v1101_v33 = vpop.f32.mrf.mxu1 }
 0x3d3   : > { %1117 = vst.msk [vmem:[#allocation2 + $0x10] sm:$0xff] %vm912_vm2, %v1101_v33 }
 0x3d4   : > { %v3441_v47 = vpop.f32.mrf.mxu1 }
 0x3d6   : > { %v1104_v26 = vpop.f32.mrf.mxu1 }
 0x3d7   : > { %1118 = vst.msk [vmem:[#allocation2 + $0x18] sm:$0xff] %vm912_vm2, %v1104_v26  ;;  %v3768_v26 = vld [vmem:[%s5153_s2 + $0xb8] sm:$0xff]  }
 0x3d8   : > { %v3442_v48 = vpop.f32.mrf.mxu1  ;;  %3540 = vmatpush3.bf16.msra.mxu0 %v3768_v26 }
 0x3d9   : > { %3541 = vmatprep.subr.bf16.mxu0 %v3946_v1  ;;  %v3769_v48 = vld [vmem:[%s5153_s2 + $0xb0] sm:$0xff]  }
 0x3da   : > { %v1109_v52 = vpop.f32.mrf.mxu1 }
 0x3db   : > { %1119 = vst.msk [vmem:[#allocation2 + $0x20] sm:$0xff] %vm912_vm2, %v1109_v52  ;;  %v3771_v52 = vld [vmem:[%s5153_s2 + $0xa0] sm:$0xff]  }
 0x3dc   : > { %v3445_v42 = vpop.f32.mrf.mxu1  ;;  %3542 = vmatpush3.bf16.msra.mxu0 %v3769_v48 }
 0x3dd   : > { %3543 = vmatprep.subr.bf16.mxu0 %v3946_v1 }
 0x3de   : > { %v1112_v53 = vpop.f32.mrf.mxu1 }
 0x3e0   : > { %v3446_v49 = vpop.f32.mrf.mxu1  ;;  %3544 = vmatpush3.bf16.msra.mxu0 %v3770_v51 }
 0x3e1   : > { %3545 = vmatprep.subr.bf16.mxu0 %v3946_v1 }
 0x3e2   : > { %v1203_v54 = vpop.f32.mrf.mxu1 }
 0x3e3   : > { %v1204_v55 = vadd.f32 %v4279_v45, %v1203_v54 }
 0x3e4   : > { %v3463_v56 = vpop.f32.mrf.mxu1  ;;  %3546 = vmatpush3.bf16.msra.mxu0 %v3771_v52 }
 0x3e5   : > { %v1221_v58 = vsel %vm987_vm4, %v1204_v55, -inf  ;;  %3603 = vmatprep.subr.bf16.mxu0 %v3946_v1 }
 0x3e6   : > { %v1206_v59 = vpop.f32.mrf.mxu1  ;;  %1222 = vmax.xlane.f32.xlu0 %v1221_v58 }
 0x3e7   : > { %3548 = vmatmul.mubr.msk.bf16.vlgmr.msra.gmra.mxu0 %vm592_vm1, %v4078_v10 }
 0x3e8   : > { %v3464_v60 = vpop.f32.mrf.mxu1  ;;  %3551 = vmatprep.mubr.msk.bf16.mxu0 %vm3947_vm0, %v3946_v1 }
 0x3ea   : > { %1243 = vadd.xlane.f32.xlu0 %v1242_v61 }
 0x3ec   : > { %v1404_v42 = vpop.f32.mrf.mxu0 }
 0x3ee   : > { %1249 = vadd.xlane.f32.xlu0 %v1248_v63 }
 0x3ef   : > { %3552 = vmatmul.mubr.msk.bf16.gmra.mxu0 %vm592_vm1, %v4092_v14 }
 0x3f0   : > { %3555 = vmatprep.mubr.msk.bf16.mxu0 %vm3947_vm0, %v3946_v1 }
 0x3f7   : > { %3556 = vmatmul.mubr.msk.bf16.gmra.mxu0 %vm592_vm1, %v4104_v17 }
 0x3f8   : > { %3559 = vmatprep.mubr.msk.bf16.mxu0 %vm3947_vm0, %v3946_v1 }
 0x3ff   : > { %3560 = vmatmul.mubr.msk.bf16.gmra.mxu0 %vm592_vm1, %v4116_v20 }
 0x400   : > { %3563 = vmatprep.mubr.msk.bf16.mxu0 %vm3947_vm0, %v3946_v1 }
 0x407   : > { %3564 = vmatmul.mubr.msk.bf16.gmra.mxu0 %vm592_vm1, %v4128_v23 }
 0x408   : > { %3609 = vmatprep.mubr.msk.bf16.mxu0 %vm3947_vm0, %v3946_v1 }
 0x46f   : > { %v1223_v0 = vpop.xlane.xlu0 %1222 }
 0x470   : > { %v1228_v3 = vsub.f32 %v1204_v55, %v1223_v0 }
 0x472   : > { %v1237_v4 = vmul.f32 1.442695, %v1228_v3 }
 0x473   : > { %v1244_v5 = vpop.xlane.xlu0 %1243 }
 0x474   : > { %3818 = vpow2.f32 %v1237_v4 }
 0x475   : > { %3820 = vrcp.f32 %v1244_v5 }
 0x477   : > { %v1250_v6 = vpop.xlane.xlu0 %1249 }
 0x478   : > { %3822 = vrcp.f32 %v1250_v6 }
 0x479   : > { %3824 = vrcp.f32 %v1247_v7 }
 0x481   : > { %v3819_v9 = vpop.eup %3818 }
 0x482   : > { %v3821_v11 = vpop.eup %3820  ;;  %v1251_v12 = vsel %vm987_vm4, %v3819_v9, 0.0 }
 0x483   : > { %1252 = vadd.xlane.f32.xlu1 %v1251_v12  ;;  %v1260_v16 = vmul.f32 %v3821_v11, %v3813_v57 }
 0x485   : > { %v1264_v18 = vpack.c.bf16 %v1260_v16, %v1259_v15  ;;  %v3823_v19 = vpop.eup %3822 }
 0x486   : > { %v3825_v21 = vpop.eup %3824  ;;  %v1262_v24 = vmul.f32 %v3823_v19, %v3815_v62 }
 0x487   : > { %3472 = vmatmul.mubr.msk.bf16.vlgmr.msra.gmra.mxu1 %vm987_vm4, %v1264_v18  ;;  %v1261_v25 = vmul.f32 %v3825_v21, %v4311_v34  ;;  %v3763_v34 = vld [vmem:[%s5153_s2 + $0x60] sm:$0xff]  }
 0x488   : > { %3475 = vmatprep.mubr.msk.bf16.mxu1 %vm3947_vm0, %v3946_v1  ;;  %3512 = vmatpush3.bf16.msra.mxu1 %v3760_v29 }
 0x489   : > { %v1265_v30 = vpack.c.bf16 %v1262_v24, %v1261_v25  ;;  %3513 = vmatprep.subr.bf16.mxu1 %v3946_v1 }
 0x48c   : > { %3514 = vmatpush3.bf16.msra.mxu1 %v3761_v27 }
 0x48d   : > { %3515 = vmatprep.subr.bf16.mxu1 %v3946_v1 }
 0x48f   : > { %3476 = vmatmul.mubr.msk.bf16.gmra.mxu1 %vm987_vm4, %v1265_v30 }
 0x490   : > { %3479 = vmatprep.mubr.msk.bf16.mxu1 %vm3947_vm0, %v3946_v1  ;;  %3516 = vmatpush3.bf16.msra.mxu1 %v3762_v32 }
 0x491   : > { %3517 = vmatprep.subr.bf16.mxu1 %v3946_v1 }
 0x494   : > { %3518 = vmatpush3.bf16.msra.mxu1 %v3763_v34 }
 0x495   : > { %3567 = vmatprep.subr.bf16.mxu1 %v3946_v1 }
 0x50c   : > { %v1253_v39 = vpop.xlane.xlu1 %1252 }
 0x50d   : > { %3826 = vrcp.f32 %v1253_v39 }
 0x51a   : > { %v3827_v31 = vpop.eup %3826 }
 0x51b   : > { %v1263_v50 = vmul.f32 %v3827_v31, %v3819_v9 }
 0x51d   : > { %v1266_v37 = vpack.c.bf16 %v1263_v50, %v1263_v50 }
 0x51f   : > { %3480 = vmatmul.mubr.msk.bf16.gmra.mxu1 %vm987_vm4, %v1266_v37 }
 0x520   : > { %3519 = vmatprep.mubr.msk.bf16.mxu1 %vm3947_vm0, %v3946_v1 }
 0x527   : > { %3520 = vmatmul.mubr.msk.bf16.vlgmr.msra.gmra.mxu1 %vm592_vm1, %v4078_v10  ;;  %v3493_v10 = vpop.f32.mrf.mxu0 }
 0x528   : > { %3523 = vmatprep.mubr.msk.bf16.mxu1 %vm3947_vm0, %v3946_v1 }
 0x529   : > { %v1407_v53 = vpop.f32.mrf.mxu0 }
 0x52b   : > { %v3494_v49 = vpop.f32.mrf.mxu0 }
 0x52d   : > { %v1412_v55 = vpop.f32.mrf.mxu0 }
 0x52f   : > { %3524 = vmatmul.mubr.msk.bf16.gmra.mxu1 %vm592_vm1, %v4092_v14  ;;  %v4470_v14 = vld [vmem:[%s5154_s3 + $0x1] ss:$0 sm:$0xff]  ;;  %v3497_v58 = vpop.f32.mrf.mxu0 }
 0x530   : > { %3527 = vmatprep.mubr.msk.bf16.mxu1 %vm3947_vm0, %v3946_v1  ;;  %v1408_v54 = vadd.f32 %v4470_v14, %v1407_v53  ;;  %v1413_v59 = vadd.f32 %v4470_v14, %v1412_v55 }
 0x531   : > { %v1415_v60 = vpop.f32.mrf.mxu0 }
 0x532   : > { %v4478_v56 = vmul.f32 0.17677669, %v1408_v54  ;;  %v4485_v62 = vmul.f32 0.17677669, %v1413_v59  ;;  %v1416_v63 = vadd.f32 %v4470_v14, %v1415_v60 }
 0x533   : > { %v3498_v61 = vpop.f32.mrf.mxu0 }
 0x534   : > { %v4490_v0 = vmul.f32 0.17677669, %v1416_v63 }
 0x536   : > { %v1660_v3 = vpack.c.bf16 %v4490_v0, %v4485_v62 }
 0x537   : > { %3528 = vmatmul.mubr.msk.bf16.gmra.mxu1 %vm592_vm1, %v4104_v17  ;;  %v1405_v17 = vadd.f32 %v4470_v14, %v1404_v42 }
 0x538   : > { %3531 = vmatprep.mubr.msk.bf16.mxu1 %vm3947_vm0, %v3946_v1 }
 0x53f   : > { %3532 = vmatmul.mubr.msk.bf16.gmra.mxu1 %vm592_vm1, %v4116_v20  ;;  %v4476_v20 = vmul.f32 0.17677669, %v1405_v17 }
 0x540   : > { %3535 = vmatprep.mubr.msk.bf16.mxu1 %vm3947_vm0, %v3946_v1 }
 0x541   : > { %v1659_v57 = vpack.c.bf16 %v4478_v56, %v4476_v20 }
 0x547   : > { %v1313_v44 = vpop.f32.mrf.mxu1  ;;  %3536 = vmatmul.mubr.msk.bf16.gmra.mxu1 %vm592_vm1, %v4128_v23  ;;  %v4488_v23 = vpop.f32.mrf.mxu0 }
 0x548   : > { %1335 = vst.msk [vmem:[#allocation2 + $0x28] sm:$0xff] %vm912_vm2, %v1313_v44  ;;  %3573 = vmatprep.mubr.msk.bf16.mxu1 %vm3947_vm0, %v3946_v1 }
 0x549   : > { %v3473_v46 = vpop.f32.mrf.mxu1  ;;  %v3501_v2 = vpop.f32.mrf.mxu0 }
 0x54b   : > { %v1316_v28 = vpop.f32.mrf.mxu1  ;;  %v1423_v4 = vpop.f32.mrf.mxu0 }
 0x54c   : > { %1336 = vst.msk [vmem:[#allocation2 + $0x30] sm:$0xff] %vm912_vm2, %v1316_v28  ;;  %v1424_v5 = vadd.f32 %v4470_v14, %v1423_v4 }
 0x54d   : > { %v3474_v33 = vpop.f32.mrf.mxu1  ;;  %v3502_v6 = vpop.f32.mrf.mxu0 }
 0x54e   : > { %v4495_v8 = vmul.f32 0.17677669, %v1424_v5 }
 0x54f   : > { %v1321_v35 = vpop.f32.mrf.mxu1  ;;  %v1428_v7 = vpop.f32.mrf.mxu0 }
 0x550   : > { %1337 = vst.msk [vmem:[#allocation2 + $0x38] sm:$0xff] %vm912_vm2, %v1321_v35  ;;  %v1429_v9 = vadd.f32 %v4470_v14, %v1428_v7  ;;  %v3127_v35 = vld [vmem:[%s5154_s3 + $0x3] ss:$0 sm:$0xff] }
 0x551   : > { %v3477_v47 = vpop.f32.mrf.mxu1  ;;  %v3505_v11 = vpop.f32.mrf.mxu0 }
 0x552   : > { %v4498_v12 = vmul.f32 0.17677669, %v1429_v9 }
 0x553   : > { %v1324_v13 = vpop.f32.mrf.mxu1  ;;  %v1431_v15 = vpop.f32.mrf.mxu0 }
 0x554   : > { %1338 = vst.msk [vmem:[#allocation2 + $0x40] sm:$0xff] %vm912_vm2, %v1324_v13  ;;  %v1894_v16 = vpack.c.bf16 %v4498_v12, %v4495_v8  ;;  %v1432_v18 = vadd.f32 %v4470_v14, %v1431_v15 }
 0x555   : > { %v3478_v22 = vpop.f32.mrf.mxu1  ;;  %v3506_v19 = vpop.f32.mrf.mxu0 }
 0x556   : > { %v4503_v24 = vmul.f32 0.17677669, %v1432_v18 }
 0x557   : > { %v1436_v21 = vpop.f32.mrf.mxu0 }
 0x558   : > { %v1437_v25 = vadd.f32 %v4470_v14, %v1436_v21 }
 0x559   : > { %v3509_v30 = vpop.f32.mrf.mxu0 }
 0x55a   : > { %v4506_v29 = vmul.f32 0.17677669, %v1437_v25  ;;  %v1421_v25 = vadd.f32 %v4470_v14, %v4488_v23 }
 0x55b   : > { %v4510_v32 = vpop.f32.mrf.mxu0 }
 0x55c   : > { %v1895_v27 = vpack.c.bf16 %v4506_v29, %v4503_v24  ;;  %v1440_v62 = vadd.f32 %v4470_v14, %v4510_v32  ;;  %v3137_v14 = vld [vmem:[%s5154_s3 + $0x5] ss:$0 sm:$0xff] }
 0x55d   : > { %v3510_v34 = vpop.f32.mrf.mxu0 }
 0x5df   : > { %v1329_v40 = vpop.f32.mrf.mxu1 }
 0x5e0   : > { %1339 = vst.msk [vmem:[#allocation2 + $0x48] sm:$0xff] %vm912_vm2, %v1329_v40 }
 0x5e1   : > { %v3481_v36 = vpop.f32.mrf.mxu1 }
 0x5e2   : > { %v1653_v36 = vmul.f32 0.17677669, %v1421_v25 }
 0x5e3   : > { %v1332_v38 = vpop.f32.mrf.mxu1 }
 0x5e4   : > { %v1661_v20 = vpack.c.bf16 %v1653_v36, %v1653_v36 }
 0x5e5   : > { %v3482_v43 = vpop.f32.mrf.mxu1 }
 0x5e7   : > { %v1507_v39 = vpop.f32.mrf.mxu1 }
 0x5e8   : > { %v1508_v60 = vadd.f32 %v3127_v35, %v1507_v39 }
 0x5e9   : > { %v3521_v31 = vpop.f32.mrf.mxu1 }
 0x5eb   : > { %v1510_v50 = vpop.f32.mrf.mxu1 }
 0x5ec   : > { %v1511_v55 = vadd.f32 %v3127_v35, %v1510_v50 }
 0x5ed   : > { %v3522_v37 = vpop.f32.mrf.mxu1 }
 0x5ee   : > { %v1662_v63 = vpack.c.bf16 %v1511_v55, %v1508_v60 }
 0x5ef   : > { %v1515_v44 = vpop.f32.mrf.mxu1 }
 0x5f0   : > { %v1516_v10 = vadd.f32 %v3127_v35, %v1515_v44  ;;  %v1678_v6 = vsel %vm912_vm2, %v1662_v63, 0 }
 0x5f1   : > { %v3525_v46 = vpop.f32.mrf.mxu1 }
 0x5f3   : > { %v1518_v28 = vpop.f32.mrf.mxu1 }
 0x5f4   : > { %v1519_v51 = vadd.f32 %v3127_v35, %v1518_v28 }
 0x5f5   : > { %v3526_v33 = vpop.f32.mrf.mxu1 }
 0x5f6   : > { %v1663_v49 = vpack.c.bf16 %v1519_v51, %v1516_v10 }
 0x5f7   : > { %v1523_v47 = vpop.f32.mrf.mxu1 }
 0x5f8   : > { %v1524_v13 = vadd.f32 %v3127_v35, %v1523_v47  ;;  %v1681_v58 = vsel %vm912_vm2, %v1663_v49, 0 }
 0x5f9   : > { %v3529_v22 = vpop.f32.mrf.mxu1 }
 0x5fa   : > { %v1664_v26 = vpack.c.bf16 %v1524_v13, %v1524_v13 }
 0x5fb   : > { %v1526_v48 = vpop.f32.mrf.mxu1 }
 0x5fc   : > { %v1684_v52 = vsel %vm912_vm2, %v1664_v26, 0  ;;  %v1527_v34 = vadd.f32 %v3127_v35, %v1526_v48 }
 0x5fd   : > { %v3530_v42 = vpop.f32.mrf.mxu1  ;;  %3568 = vmatpush3.bf16.xpose.msra.mxu1 %v1684_v52 }
 0x5fe   : > { %3569 = vmatprep.subr.bf16.mxu1 %v3946_v1 }
 0x5ff   : > { %v1531_v53 = vpop.f32.mrf.mxu1 }
 0x600   : > { %v1532_v21 = vadd.f32 %v3127_v35, %v1531_v53 }
 0x601   : > { %v3533_v17 = vpop.f32.mrf.mxu1 }
 0x602   : > { %v1897_v40 = vpack.c.bf16 %v1532_v21, %v1527_v34 }
 0x603   : > { %v1534_v54 = vpop.f32.mrf.mxu1 }
 0x604   : > { %v1535_v18 = vadd.f32 %v3127_v35, %v1534_v54  ;;  %v1913_v56 = vsel %vm912_vm2, %v1897_v40, 0 }
 0x605   : > { %v3534_v59 = vpop.f32.mrf.mxu1  ;;  %3570 = vmatpush3.bf16.xpose.msra.mxu1 %v1681_v58 }
 0x606   : > { %3571 = vmatprep.subr.bf16.mxu1 %v3946_v1 }
 0x607   : > { %v1539_v61 = vpop.f32.mrf.mxu1 }
 0x608   : > { %v1540_v11 = vadd.f32 %v3127_v35, %v1539_v61 }
 0x609   : > { %v3537_v2 = vpop.f32.mrf.mxu1 }
 0x60a   : > { %v1898_v19 = vpack.c.bf16 %v1540_v11, %v1535_v18 }
 0x60b   : > { %v1542_v4 = vpop.f32.mrf.mxu1 }
 0x60c   : > { %v1543_v5 = vadd.f32 %v3127_v35, %v1542_v4  ;;  %v1916_v30 = vsel %vm912_vm2, %v1898_v19, 0 }
 0x60d   : > { %v3538_v7 = vpop.f32.mrf.mxu1  ;;  %3572 = vmatpush3.bf16.xpose.msra.mxu1 %v1678_v6 }
 0x60e   : > { %v1899_v9 = vpack.c.bf16 %v1543_v5, %v1543_v5  ;;  %3585 = vmatprep.subr.bf16.mxu1 %v3946_v1 }
 0x610   : > { %v1919_v15 = vsel %vm912_vm2, %v1899_v9, 0 }
 0x611   : > { %3604 = vmatpush3.bf16.xpose.msra.mxu0 %v1919_v15 }
 0x612   : > { %3605 = vmatprep.subr.bf16.mxu0 %v3946_v1 }
 0x614   : > { %3574 = vmatmul.mubr.msk.bf16.vlgmr.msra.gmra.mxu1 %vm912_vm2, %v1659_v57  ;;  %v1610_v57 = vpop.f32.mrf.mxu0 }
 0x615   : > { %3577 = vmatprep.mubr.msk.bf16.mxu1 %vm3947_vm0, %v3946_v1  ;;  %v1611_v28 = vadd.f32 %v3137_v14, %v1610_v57 }
 0x616   : > { %v3549_v23 = vpop.f32.mrf.mxu0 }
 0x618   : > { %v1613_v0 = vpop.f32.mrf.mxu0 }
 0x619   : > { %3606 = vmatpush3.bf16.xpose.msra.mxu0 %v1916_v30  ;;  %v1614_v33 = vadd.f32 %v3137_v14, %v1613_v0 }
 0x61a   : > { %3607 = vmatprep.subr.bf16.mxu0 %v3946_v1  ;;  %v3550_v8 = vpop.f32.mrf.mxu0 }
 0x61b   : > { %v1665_v13 = vpack.c.bf16 %v1614_v33, %v1611_v28 }
 0x61c   : > { %3578 = vmatmul.mubr.msk.bf16.gmra.mxu1 %vm912_vm2, %v1660_v3  ;;  %v1658_v3 = vmul.f32 0.17677669, %v1440_v62  ;;  %v1618_v12 = vpop.f32.mrf.mxu0 }
 0x61d   : > { %3581 = vmatprep.mubr.msk.bf16.mxu1 %vm3947_vm0, %v3946_v1  ;;  %v1619_v32 = vadd.f32 %v3137_v14, %v1618_v12 }
 0x61e   : > { %v3553_v38 = vpop.f32.mrf.mxu0 }
 0x620   : > { %v1621_v43 = vpop.f32.mrf.mxu0 }
 0x621   : > { %3608 = vmatpush3.bf16.xpose.msra.mxu0 %v1913_v56  ;;  %v1622_v39 = vadd.f32 %v3137_v14, %v1621_v43 }
 0x622   : > { %3639 = vmatprep.subr.bf16.mxu0 %v3946_v1  ;;  %v3554_v24 = vpop.f32.mrf.mxu0 }
 0x623   : > { %v1666_v35 = vpack.c.bf16 %v1622_v39, %v1619_v32 }
 0x624   : > { %3582 = vmatmul.mubr.msk.bf16.gmra.mxu1 %vm912_vm2, %v1661_v20  ;;  %v1626_v29 = vpop.f32.mrf.mxu0 }
 0x625   : > { %3591 = vmatprep.mubr.msk.bf16.mxu1 %vm3947_vm0, %v3946_v1 }
 0x626   : > { %v3557_v31 = vpop.f32.mrf.mxu0 }
 0x628   : > { %3610 = vmatmul.mubr.msk.bf16.vlgmr.msra.gmra.mxu0 %vm912_vm2, %v1894_v16  ;;  %v1896_v16 = vpack.c.bf16 %v1658_v3, %v1658_v3  ;;  %v1629_v37 = vpop.f32.mrf.mxu0 }
 0x629   : > { %3613 = vmatprep.mubr.msk.bf16.mxu0 %vm3947_vm0, %v3946_v1  ;;  %v4566_v46 = vadd.f32 %v3137_v14, %v1629_v37 }
 0x62a   : > { %v3558_v47 = vpop.f32.mrf.mxu0 }
 0x62c   : > { %v1634_v22 = vpop.f32.mrf.mxu0 }
 0x62d   : > { %v4571_v26 = vadd.f32 %v3137_v14, %v1634_v22 }
 0x62e   : > { %v3561_v48 = vpop.f32.mrf.mxu0 }
 0x62f   : > { %v1900_v51 = vpack.c.bf16 %v4571_v26, %v4566_v46 }
 0x630   : > { %3614 = vmatmul.mubr.msk.bf16.gmra.mxu0 %vm912_vm2, %v1895_v27  ;;  %v1627_v27 = vadd.f32 %v3137_v14, %v1626_v29  ;;  %v1637_v52 = vpop.f32.mrf.mxu0 }
 0x631   : > { %3617 = vmatprep.mubr.msk.bf16.mxu0 %vm3947_vm0, %v3946_v1  ;;  %v4575_v10 = vadd.f32 %v3137_v14, %v1637_v52 }
 0x632   : > { %v1667_v50 = vpack.c.bf16 %v1627_v27, %v1627_v27  ;;  %v3562_v42 = vpop.f32.mrf.mxu0 }
 0x634   : > { %v1810_v44 = vsel %vm1055_vm3, %v1667_v50, 0  ;;  %v1642_v53 = vpop.f32.mrf.mxu0 }
 0x635   : > { %3586 = vmatpush3.bf16.msra.mxu1 %v1810_v44  ;;  %v4577_v49 = vadd.f32 %v3137_v14, %v1642_v53 }
 0x636   : > { %3587 = vmatprep.subr.bf16.mxu1 %v3946_v1  ;;  %v3565_v17 = vpop.f32.mrf.mxu0 }
 0x637   : > { %v1901_v54 = vpack.c.bf16 %v4577_v49, %v4575_v10 }
 0x638   : > { %3618 = vmatmul.mubr.msk.bf16.gmra.mxu0 %vm912_vm2, %v1896_v16  ;;  %v1645_v55 = vpop.f32.mrf.mxu0 }
 0x639   : > { %3647 = vmatprep.mubr.msk.bf16.mxu0 %vm3947_vm0, %v3946_v1  ;;  %3588 = vmatpush3.bf16.msra.mxu1 %v1666_v35  ;;  %v4581_v58 = vadd.f32 %v3137_v14, %v1645_v55 }
 0x63a   : > { %3589 = vmatprep.subr.bf16.mxu1 %v3946_v1  ;;  %v3566_v59 = vpop.f32.mrf.mxu0 }
 0x63d   : > { %3590 = vmatpush3.bf16.msra.mxu1 %v1665_v13 }
 0x63e   : > { %3621 = vmatprep.subr.bf16.mxu1 %v3946_v1 }
 0x6d4   : > { %v1720_v60 = vpop.f32.mrf.mxu1 }
 0x6d5   : > { %v1721_v61 = vadd.f32 %v4263_v41, %v1720_v60 }
 0x6d6   : > { %v3575_v63 = vpop.f32.mrf.mxu1 }
 0x6d7   : > { %v1742_v2 = vsel %vm987_vm4, %v1721_v61, -inf }
 0x6d8   : > { %1743 = vmax.xlane.f32.xlu0 %v1742_v2  ;;  %v1723_v4 = vpop.f32.mrf.mxu1 }
 0x6d9   : > { %v1724_v5 = vadd.f32 %v4263_v41, %v1723_v4 }
 0x6da   : > { %v3576_v6 = vpop.f32.mrf.mxu1 }
 0x6db   : > { %v1745_v7 = vsel %vm987_vm4, %v1724_v5, -inf }
 0x6dc   : > { %1746 = vmax.xlane.f32.xlu1 %v1745_v7  ;;  %v1728_v9 = vpop.f32.mrf.mxu1 }
 0x6dd   : > { %v1729_v11 = vadd.f32 %v4263_v41, %v1728_v9 }
 0x6de   : > { %v3579_v15 = vpop.f32.mrf.mxu1 }
 0x6df   : > { %v1748_v18 = vsel %vm987_vm4, %v1729_v11, -inf }
 0x6e0   : > { %1749 = vmax.xlane.f32.xlu0 %v1748_v18  ;;  %v1731_v19 = vpop.f32.mrf.mxu1 }
 0x6e1   : > { %v1732_v21 = vadd.f32 %v4263_v41, %v1731_v19 }
 0x6e2   : > { %v3580_v25 = vpop.f32.mrf.mxu1 }
 0x6e3   : > { %v1751_v30 = vsel %vm987_vm4, %v1732_v21, -inf }
 0x6e4   : > { %1752 = vmax.xlane.f32.xlu1 %v1751_v30  ;;  %v1736_v34 = vpop.f32.mrf.mxu1 }
 0x6e5   : > { %v1737_v40 = vadd.f32 %v4263_v41, %v1736_v34 }
 0x6e6   : > { %v3583_v36 = vpop.f32.mrf.mxu1 }
 0x6e7   : > { %v1754_v20 = vsel %vm987_vm4, %v1737_v40, -inf }
 0x6e8   : > { %1755 = vmax.xlane.f32.xlu0 %v1754_v20  ;;  %v1955_v56 = vpop.f32.mrf.mxu0  ;;  %v1739_v57 = vpop.f32.mrf.mxu1 }
 0x6e9   : > { %v1956_v62 = vadd.f32 %v4279_v45, %v1955_v56 }
 0x6ea   : > { %v3611_v23 = vpop.f32.mrf.mxu0  ;;  %v3584_v0 = vpop.f32.mrf.mxu1 }
 0x6eb   : > { %v1977_v3 = vsel %vm987_vm4, %v1956_v62, -inf }
 0x6ec   : > { %1978 = vmax.xlane.f32.xlu1 %v1977_v3  ;;  %v1958_v8 = vpop.f32.mrf.mxu0 }
 0x6ed   : > { %v1959_v12 = vadd.f32 %v4279_v45, %v1958_v8 }
 0x6ee   : > { %v3612_v16 = vpop.f32.mrf.mxu0 }
 0x6ef   : > { %v1980_v38 = vsel %vm987_vm4, %v1959_v12, -inf }
 0x6f0   : > { %1981 = vmax.xlane.f32.xlu0 %v1980_v38  ;;  %v1963_v41 = vpop.f32.mrf.mxu0 }
 0x6f1   : > { %v1964_v43 = vadd.f32 %v4279_v45, %v1963_v41 }
 0x6f2   : > { %v3615_v14 = vpop.f32.mrf.mxu0 }
 0x6f3   : > { %v1983_v24 = vsel %vm987_vm4, %v1964_v43, -inf }
 0x6f4   : > { %1984 = vmax.xlane.f32.xlu1 %v1983_v24  ;;  %v1966_v29 = vpop.f32.mrf.mxu0 }
 0x6f5   : > { %v1967_v27 = vadd.f32 %v4279_v45, %v1966_v29 }
 0x6f6   : > { %v3616_v32 = vpop.f32.mrf.mxu0 }
 0x6f7   : > { %v1986_v39 = vsel %vm987_vm4, %v1967_v27, -inf }
 0x6f8   : > { %1987 = vmax.xlane.f32.xlu0 %v1986_v39  ;;  %v1971_v31 = vpop.f32.mrf.mxu0 }
 0x6f9   : > { %v1972_v50 = vadd.f32 %v4279_v45, %v1971_v31 }
 0x6fa   : > { %v3619_v37 = vpop.f32.mrf.mxu0 }
 0x6fb   : > { %v1989_v44 = vsel %vm987_vm4, %v1972_v50, -inf }
 0x6fc   : > { %1990 = vmax.xlane.f32.xlu1 %v1989_v44  ;;  %v1974_v28 = vpop.f32.mrf.mxu0 }
 0x6fe   : > { %v3620_v33 = vpop.f32.mrf.mxu0 }
 0x761   : > { %v1744_v35 = vpop.xlane.xlu0 %1743 }
 0x762   : > { %v1757_v47 = vsub.f32 %v1721_v61, %v1744_v35 }
 0x764   : > { %v1762_v13 = vmul.f32 1.442695, %v1757_v47  ;;  %v1902_v47 = vpack.c.bf16 %v4581_v58, %v4581_v58 }
 0x765   : > { %v1747_v22 = vpop.xlane.xlu1 %1746 }
 0x766   : > { %3828 = vpow2.f32 %v1762_v13  ;;  %v1758_v48 = vsub.f32 %v1724_v5, %v1747_v22 }
 0x768   : > { %v1764_v52 = vmul.f32 1.442695, %v1758_v48 }
 0x769   : > { %v1750_v42 = vpop.xlane.xlu0 %1749 }
 0x76a   : > { %3830 = vpow2.f32 %v1764_v52  ;;  %v1759_v53 = vsub.f32 %v1729_v11, %v1750_v42  ;;  %v2045_v52 = vsel %vm1055_vm3, %v1902_v47, 0 }
 0x76c   : > { %v1766_v17 = vmul.f32 1.442695, %v1759_v53 }
 0x76d   : > { %v1753_v55 = vpop.xlane.xlu1 %1752 }
 0x76e   : > { %3832 = vpow2.f32 %v1766_v17  ;;  %v1760_v45 = vsub.f32 %v1732_v21, %v1753_v55 }
 0x770   : > { %v1768_v59 = vmul.f32 1.442695, %v1760_v45 }
 0x771   : > { %v1756_v60 = vpop.xlane.xlu0 %1755 }
 0x772   : > { %3834 = vpow2.f32 %v1768_v59  ;;  %v1761_v63 = vsub.f32 %v1737_v40, %v1756_v60 }
 0x773   : > { %v4603_v2 = vpop.eup %3828 }
 0x774   : > { %v1770_v4 = vmul.f32 1.442695, %v1761_v63  ;;  %v1772_v61 = vsel %vm987_vm4, %v4603_v2, 0.0 }
 0x775   : > { %v1979_v6 = vpop.xlane.xlu1 %1978  ;;  %1773 = vadd.xlane.f32.xlu0 %v1772_v61 }
 0x776   : > { %3836 = vpow2.f32 %v1770_v4  ;;  %v1992_v5 = vsub.f32 %v1956_v62, %v1979_v6 }
 0x777   : > { %v3831_v7 = vpop.eup %3830 }
 0x778   : > { %v1997_v9 = vmul.f32 1.442695, %v1992_v5  ;;  %v1775_v11 = vsel %vm987_vm4, %v3831_v7, 0.0 }
 0x779   : > { %v1982_v15 = vpop.xlane.xlu0 %1981  ;;  %1776 = vadd.xlane.f32.xlu1 %v1775_v11 }
 0x77a   : > { %3838 = vpow2.f32 %v1997_v9  ;;  %v1993_v18 = vsub.f32 %v1959_v12, %v1982_v15 }
 0x77b   : > { %v4608_v19 = vpop.eup %3832 }
 0x77c   : > { %v1999_v21 = vmul.f32 1.442695, %v1993_v18  ;;  %v1778_v25 = vsel %vm987_vm4, %v4608_v19, 0.0 }
 0x77d   : > { %v1985_v30 = vpop.xlane.xlu1 %1984  ;;  %1779 = vadd.xlane.f32.xlu0 %v1778_v25  ;;  %v3773_v25 = vld [vmem:[%s5155_s4 + $0x10] sm:$0xff]  }
 0x77e   : > { %3840 = vpow2.f32 %v1999_v21  ;;  %v1994_v34 = vsub.f32 %v1964_v43, %v1985_v30  ;;  %v3772_v21 = vld [vmem:[%s5155_s4 + $0x18] sm:$0xff]   ;;  %v3774_v30 = vld [vmem:[%s5155_s4 + $0x8] sm:$0xff]  }
 0x77f   : > { %v3835_v40 = vpop.eup %3834  ;;  %3640 = vmatpush3.bf16.msra.mxu0 %v3772_v21  ;;  %v3929_v21 = vld [vmem:[%s4069_s17 + $0x8] sm:$0xff] }
 0x780   : > { %v2001_v36 = vmul.f32 1.442695, %v1994_v34  ;;  %v1781_v20 = vsel %vm987_vm4, %v3835_v40, 0.0  ;;  %3641 = vmatprep.subr.bf16.mxu0 %v3946_v1  ;;  %v3775_v34 = vld [vmem:[%s5155_s4] sm:$0xff]  }
 0x781   : > { %v1988_v56 = vpop.xlane.xlu0 %1987  ;;  %1782 = vadd.xlane.f32.xlu1 %v1781_v20 }
 0x782   : > { %3842 = vpow2.f32 %v2001_v36  ;;  %v1995_v57 = vsub.f32 %v1967_v27, %v1988_v56 }
 0x783   : > { %v4613_v62 = vpop.eup %3836  ;;  %3642 = vmatpush3.bf16.msra.mxu0 %v3773_v25 }
 0x784   : > { %v2003_v23 = vmul.f32 1.442695, %v1995_v57  ;;  %v1784_v0 = vsel %vm987_vm4, %v4613_v62, 0.0  ;;  %3643 = vmatprep.subr.bf16.mxu0 %v3946_v1 }
 0x785   : > { %1785 = vadd.xlane.f32.xlu0 %v1784_v0  ;;  %v1991_v3 = vpop.xlane.xlu1 %1990 }
 0x786   : > { %3844 = vpow2.f32 %v2003_v23  ;;  %v1996_v8 = vsub.f32 %v1972_v50, %v1991_v3 }
 0x787   : > { %v4617_v12 = vpop.eup %3838  ;;  %3644 = vmatpush3.bf16.msra.mxu0 %v3774_v30 }
 0x788   : > { %v2005_v16 = vmul.f32 1.442695, %v1996_v8  ;;  %v2007_v38 = vsel %vm987_vm4, %v4617_v12, 0.0  ;;  %3645 = vmatprep.subr.bf16.mxu0 %v3946_v1 }
 0x789   : > { %2008 = vadd.xlane.f32.xlu1 %v2007_v38 }
 0x78a   : > { %3846 = vpow2.f32 %v2005_v16 }
 0x78b   : > { %v3841_v41 = vpop.eup %3840  ;;  %3646 = vmatpush3.bf16.msra.mxu0 %v3775_v34 }
 0x78c   : > { %v2010_v43 = vsel %vm987_vm4, %v3841_v41, 0.0  ;;  %3695 = vmatprep.subr.bf16.mxu0 %v3946_v1 }
 0x78d   : > { %2011 = vadd.xlane.f32.xlu0 %v2010_v43 }
 0x78f   : > { %v4622_v14 = vpop.eup %3842 }
 0x790   : > { %v2013_v24 = vsel %vm987_vm4, %v4622_v14, 0.0 }
 0x791   : > { %2014 = vadd.xlane.f32.xlu1 %v2013_v24 }
 0x793   : > { %v3845_v29 = vpop.eup %3844 }
 0x794   : > { %v2016_v27 = vsel %vm987_vm4, %v3845_v29, 0.0 }
 0x795   : > { %2017 = vadd.xlane.f32.xlu0 %v2016_v27 }
 0x797   : > { %v4627_v32 = vpop.eup %3846 }
 0x798   : > { %v2019_v39 = vsel %vm987_vm4, %v4627_v32, 0.0 }
 0x799   : > { %2020 = vadd.xlane.f32.xlu1 %v2019_v39 }
 0x7fe   : > { %v1774_v31 = vpop.xlane.xlu0 %1773 }
 0x7ff   : > { %3848 = vrcp.f32 %v1774_v31 }
 0x802   : > { %v1777_v50 = vpop.xlane.xlu1 %1776 }
 0x803   : > { %3850 = vrcp.f32 %v1777_v50 }
 0x806   : > { %v1780_v37 = vpop.xlane.xlu0 %1779 }
 0x807   : > { %3852 = vrcp.f32 %v1780_v37 }
 0x80a   : > { %v1783_v44 = vpop.xlane.xlu1 %1782 }
 0x80b   : > { %3854 = vrcp.f32 %v1783_v44 }
 0x80c   : > { %v3849_v28 = vpop.eup %3848 }
 0x80d   : > { %v1792_v13 = vmul.f32 %v3849_v28, %v4603_v2 }
 0x80e   : > { %v1786_v33 = vpop.xlane.xlu0 %1785 }
 0x80f   : > { %3856 = vrcp.f32 %v1786_v33 }
 0x810   : > { %v3851_v35 = vpop.eup %3850 }
 0x811   : > { %v1793_v22 = vmul.f32 %v3851_v35, %v3831_v7 }
 0x812   : > { %v2009_v53 = vpop.xlane.xlu1 %2008 }
 0x813   : > { %v1797_v48 = vpack.c.bf16 %v1793_v22, %v1792_v13 }
 0x814   : > { %v3853_v42 = vpop.eup %3852 }
 0x815   : > { %3592 = vmatmul.mubr.msk.bf16.vlgmr.msra.gmra.mxu1 %vm987_vm4, %v1797_v48  ;;  %v1794_v58 = vmul.f32 %v3853_v42, %v4608_v19 }
 0x816   : > { %3622 = vmatpush3.bf16.msra.mxu1 %v2045_v52  ;;  %v2012_v17 = vpop.xlane.xlu0 %2011  ;;  %3595 = vmatprep.mubr.msk.bf16.mxu1 %vm3947_vm0, %v3946_v1 }
 0x817   : > { %3858 = vrcp.f32 %v2012_v17  ;;  %3623 = vmatprep.subr.bf16.mxu1 %v3946_v1 }
 0x818   : > { %v3855_v55 = vpop.eup %3854  ;;  %3860 = vrcp.f32 %v2009_v53 }
 0x819   : > { %v1795_v45 = vmul.f32 %v3855_v55, %v3835_v40 }
 0x81a   : > { %3624 = vmatpush3.bf16.msra.mxu1 %v1901_v54  ;;  %v2015_v63 = vpop.xlane.xlu1 %2014 }
 0x81b   : > { %3625 = vmatprep.subr.bf16.mxu1 %v3946_v1  ;;  %v1798_v59 = vpack.c.bf16 %v1795_v45, %v1794_v58 }
 0x81c   : > { %v3857_v60 = vpop.eup %3856 }
 0x81d   : > { %3596 = vmatmul.mubr.msk.bf16.gmra.mxu1 %vm987_vm4, %v1798_v59  ;;  %v1796_v4 = vmul.f32 %v3857_v60, %v4613_v62 }
 0x81e   : > { %3626 = vmatpush3.bf16.msra.mxu1 %v1900_v51  ;;  %v2018_v2 = vpop.xlane.xlu0 %2017  ;;  %3599 = vmatprep.mubr.msk.bf16.mxu1 %vm3947_vm0, %v3946_v1 }
 0x81f   : > { %3862 = vrcp.f32 %v2018_v2  ;;  %3667 = vmatprep.subr.bf16.mxu1 %v3946_v1  ;;  %v1799_v10 = vpack.c.bf16 %v1796_v4, %v1796_v4 }
 0x820   : > { %3864 = vrcp.f32 %v2015_v63 }
 0x822   : > { %v2021_v54 = vpop.xlane.xlu1 %2020 }
 0x823   : > { %3866 = vrcp.f32 %v2021_v54 }
 0x824   : > { %v3859_v49 = vpop.eup %3858 }
 0x825   : > { %3600 = vmatmul.mubr.msk.bf16.gmra.mxu1 %vm987_vm4, %v1799_v10  ;;  %v3861_v61 = vpop.eup %3860  ;;  %v2028_v46 = vmul.f32 %v3859_v49, %v3841_v41 }
 0x826   : > { %3627 = vmatprep.mubr.msk.bf16.mxu1 %vm3947_vm0, %v3946_v1  ;;  %v2027_v26 = vmul.f32 %v3861_v61, %v4617_v12 }
 0x828   : > { %v2032_v51 = vpack.c.bf16 %v2028_v46, %v2027_v26  ;;  %v4711_v26 = vld [vmem:[%s5156_s5] ss:$0 sm:$0xff] }
 0x82c   : > { %v3863_v6 = vpop.eup %3862 }
 0x82d   : > { %3628 = vmatmul.mubr.msk.bf16.vlgmr.msra.gmra.mxu1 %vm987_vm4, %v2032_v51  ;;  %v3865_v5 = vpop.eup %3864  ;;  %v2030_v7 = vmul.f32 %v3863_v6, %v3845_v29 }
 0x82e   : > { %3631 = vmatprep.mubr.msk.bf16.mxu1 %vm3947_vm0, %v3946_v1  ;;  %v2029_v9 = vmul.f32 %v3865_v5, %v4622_v14 }
 0x830   : > { %v2033_v11 = vpack.c.bf16 %v2030_v7, %v2029_v9  ;;  %v3867_v15 = vpop.eup %3866  ;;  %v3928_v7 = vld [vmem:[%s4069_s17] sm:$0xff] }
 0x831   : > { %v2031_v18 = vmul.f32 %v3867_v15, %v4627_v32 }
 0x833   : > { %v2034_v19 = vpack.c.bf16 %v2031_v18, %v2031_v18 }
 0x835   : > { %3632 = vmatmul.mubr.msk.bf16.gmra.mxu1 %vm987_vm4, %v2033_v11 }
 0x836   : > { %3635 = vmatprep.mubr.msk.bf16.mxu1 %vm3947_vm0, %v3946_v1 }
 0x83d   : > { %3636 = vmatmul.mubr.msk.bf16.gmra.mxu1 %vm987_vm4, %v2034_v19 }
 0x83e   : > { %3675 = vmatprep.mubr.msk.bf16.mxu1 %vm3947_vm0, %v3946_v1 }
 0x8d5   : > { %v1846_v40 = vpop.f32.mrf.mxu1 }
 0x8d6   : > { %1873 = vrot.lane.b32.xlu0 %v1846_v40, %s3948_s20 }
 0x8d7   : > { %v3593_v36 = vpop.f32.mrf.mxu1 }
 0x8d9   : > { %v1849_v20 = vpop.f32.mrf.mxu1 }
 0x8da   : > { %1875 = vrot.lane.b32.xlu1 %v1849_v20, %s3948_s20  ;;  %v3930_v20 = vld [vmem:[%s4069_s17 + $0x10] sm:$0xff] }
 0x8db   : > { %v3594_v56 = vpop.f32.mrf.mxu1 }
 0x8dd   : > { %v1854_v57 = vpop.f32.mrf.mxu1 }
 0x8de   : > { %1877 = vrot.lane.b32.xlu1 %v1854_v57, %s3948_s20 }
 0x8df   : > { %v3597_v62 = vpop.f32.mrf.mxu1 }
 0x8e1   : > { %v1857_v23 = vpop.f32.mrf.mxu1 }
 0x8e2   : > { %1879 = vrot.lane.b32.xlu1 %v1857_v23, %s3948_s20 }
 0x8e3   : > { %v3598_v0 = vpop.f32.mrf.mxu1 }
 0x8e5   : > { %v1862_v3 = vpop.f32.mrf.mxu1 }
 0x8e6   : > { %1881 = vrot.lane.b32.xlu0 %v1862_v3, %s3948_s20  ;;  %v3931_v3 = vld [vmem:[%s4069_s17 + $0x18] sm:$0xff] }
 0x8e7   : > { %v3601_v8 = vpop.f32.mrf.mxu1 }
 0x8e9   : > { %v1865_v12 = vpop.f32.mrf.mxu1 }
 0x8eb   : > { %v3602_v16 = vpop.f32.mrf.mxu1 }
 0x8ed   : > { %v2081_v38 = vpop.f32.mrf.mxu1 }
 0x8ee   : > { %2108 = vrot.lane.b32.xlu1 %v2081_v38, %s3948_s20 }
 0x8ef   : > { %v3629_v41 = vpop.f32.mrf.mxu1 }
 0x8f1   : > { %v2084_v43 = vpop.f32.mrf.mxu1 }
 0x8f2   : > { %2110 = vrot.lane.b32.xlu0 %v2084_v43, %s3948_s20  ;;  %v3932_v43 = vld [vmem:[%s4069_s17 + $0x20] sm:$0xff] }
 0x8f3   : > { %v3630_v14 = vpop.f32.mrf.mxu1 }
 0x8f5   : > { %v2089_v24 = vpop.f32.mrf.mxu1 }
 0x8f6   : > { %2112 = vrot.lane.b32.xlu1 %v2089_v24, %s3948_s20 }
 0x8f7   : > { %v3633_v29 = vpop.f32.mrf.mxu1 }
 0x8f9   : > { %v2092_v27 = vpop.f32.mrf.mxu1 }
 0x8fa   : > { %2114 = vrot.lane.b32.xlu0 %v2092_v27, %s3948_s20 }
 0x8fb   : > { %v3634_v32 = vpop.f32.mrf.mxu1 }
 0x8fd   : > { %v2097_v39 = vpop.f32.mrf.mxu1 }
 0x8fe   : > { %2116 = vrot.lane.b32.xlu1 %v2097_v39, %s3948_s20  ;;  %v3933_v39 = vld [vmem:[%s4069_s17 + $0x28] sm:$0xff] }
 0x8ff   : > { %v3637_v31 = vpop.f32.mrf.mxu1 }
 0x901   : > { %v2100_v50 = vpop.f32.mrf.mxu1 }
 0x903   : > { %v3638_v37 = vpop.f32.mrf.mxu1 }
 0x948   : > { %v1874_v44 = vpop.permute.xlu0 %1873 }
 0x949   : > { %1889 = vst.msk [vmem:[#allocation2] sm:$0xff] %vm1888_vm5, %v1874_v44 }
 0x94c   : > { %v1876_v28 = vpop.permute.xlu1 %1875 }
 0x94d   : > { %1890 = vst.msk [vmem:[#allocation2 + $0x8] sm:$0xff] %vm1888_vm5, %v1876_v28 }
 0x950   : > { %v1878_v33 = vpop.permute.xlu1 %1877  ;;  %v2128_v47 = vld [vmem:[#allocation2] sm:$0xff] }
 0x951   : > { %1891 = vst.msk [vmem:[#allocation2 + $0x10] sm:$0xff] %vm1888_vm5, %v1878_v33  ;;  %v3934_v33 = vld [vmem:[%s4069_s17 + $0x30] sm:$0xff] }
 0x954   : > { %v1880_v35 = vpop.permute.xlu1 %1879  ;;  %v2129_v13 = vld [vmem:[#allocation2 + $0x8] sm:$0xff] }
 0x955   : > { %1892 = vst.msk [vmem:[#allocation2 + $0x18] sm:$0xff] %vm1888_vm5, %v1880_v35  ;;  %v2138_v22 = vpack.c.bf16 %v2129_v13, %v2128_v47 }
 0x957   : > { %3648 = vmatmul.mubr.msk.bf16.vlgmr.msra.gmra.mxu0 %vm592_vm1, %v2138_v22 }
 0x958   : > { %v1882_v48 = vpop.permute.xlu0 %1881  ;;  %3651 = vmatprep.mubr.msk.bf16.mxu0 %vm3947_vm0, %v3946_v1  ;;  %v2130_v52 = vld [vmem:[#allocation2 + $0x10] sm:$0xff] }
 0x959   : > { %1893 = vst.msk [vmem:[#allocation2 + $0x20] sm:$0xff] %vm1888_vm5, %v1882_v48 }
 0x95c   : > { %v2131_v42 = vld [vmem:[#allocation2 + $0x18] sm:$0xff] }
 0x95d   : > { %v2139_v53 = vpack.c.bf16 %v2131_v42, %v2130_v52  ;;  %v3935_v52 = vld [vmem:[%s4069_s17 + $0x38] sm:$0xff] }
 0x95f   : > { %3652 = vmatmul.mubr.msk.bf16.gmra.mxu0 %vm592_vm1, %v2139_v53 }
 0x960   : > { %v2109_v17 = vpop.permute.xlu1 %2108  ;;  %3655 = vmatprep.mubr.msk.bf16.mxu0 %vm3947_vm0, %v3946_v1  ;;  %v2132_v45 = vld [vmem:[#allocation2 + $0x20] sm:$0xff] }
 0x961   : > { %2123 = vst.msk [vmem:[#allocation2 + $0x28] sm:$0xff] %vm1888_vm5, %v2109_v17 }
 0x964   : > { %v2111_v55 = vpop.permute.xlu0 %2110 }
 0x965   : > { %2124 = vst.msk [vmem:[#allocation2 + $0x30] sm:$0xff] %vm1888_vm5, %v2111_v55 }
 0x968   : > { %v2113_v58 = vpop.permute.xlu1 %2112  ;;  %v2133_v59 = vld [vmem:[#allocation2 + $0x28] sm:$0xff] }
 0x969   : > { %2125 = vst.msk [vmem:[#allocation2 + $0x38] sm:$0xff] %vm1888_vm5, %v2113_v58  ;;  %v2140_v60 = vpack.c.bf16 %v2133_v59, %v2132_v45  ;;  %v3936_v45 = vld [vmem:[%s4069_s17 + $0x40] sm:$0xff] }
 0x96b   : > { %3656 = vmatmul.mubr.msk.bf16.gmra.mxu0 %vm592_vm1, %v2140_v60 }
 0x96c   : > { %v2115_v63 = vpop.permute.xlu0 %2114  ;;  %3659 = vmatprep.mubr.msk.bf16.mxu0 %vm3947_vm0, %v3946_v1  ;;  %v2134_v4 = vld [vmem:[#allocation2 + $0x30] sm:$0xff] }
 0x96d   : > { %2126 = vst.msk [vmem:[#allocation2 + $0x40] sm:$0xff] %vm1888_vm5, %v2115_v63 }
 0x970   : > { %v2117_v2 = vpop.permute.xlu1 %2116  ;;  %v2135_v10 = vld [vmem:[#allocation2 + $0x38] sm:$0xff] }
 0x971   : > { %2127 = vst.msk [vmem:[#allocation2 + $0x48] sm:$0xff] %vm1888_vm5, %v2117_v2  ;;  %v2141_v49 = vpack.c.bf16 %v2135_v10, %v2134_v4  ;;  %v3937_v10 = vld [vmem:[%s4069_s17 + $0x48] sm:$0xff] }
 0x973   : > { %3660 = vmatmul.mubr.msk.bf16.gmra.mxu0 %vm592_vm1, %v2141_v49 }
 0x974   : > { %3663 = vmatprep.mubr.msk.bf16.mxu0 %vm3947_vm0, %v3946_v1  ;;  %v2136_v54 = vld [vmem:[#allocation2 + $0x40] sm:$0xff] }
 0x978   : > { %v2137_v61 = vld [vmem:[#allocation2 + $0x48] sm:$0xff] }
 0x979   : > { %v2142_v46 = vpack.c.bf16 %v2137_v61, %v2136_v54 }
 0x97b   : > { %3664 = vmatmul.mubr.msk.bf16.gmra.mxu0 %vm592_vm1, %v2142_v46 }
 0x97c   : > { %3711 = vmatprep.mubr.msk.bf16.mxu0 %vm3947_vm0, %v3946_v1 }
 0xa17   : > { %v2231_v51 = vpop.f32.mrf.mxu0 }
 0xa18   : > { %v2232_v6 = vadd.f32 %v4711_v26, %v2231_v51 }
 0xa19   : > { %v3649_v5 = vpop.f32.mrf.mxu0 }
 0xa1a   : > { %v4715_v9 = vadd.f32 %v3928_v7, %v2232_v6 }
 0xa1b   : > { %v2234_v11 = vpop.f32.mrf.mxu0 }
 0xa1c   : > { %v2235_v15 = vadd.f32 %v4711_v26, %v2234_v11  ;;  %v2282_v18 = vsel %vm592_vm1, %v4715_v9, 0.0 }
 0xa1d   : > { %2283 = vadd.xlane.f32.xlu0 %v2282_v18  ;;  %v3650_v19 = vpop.f32.mrf.mxu0 }
 0xa1e   : > { %v4721_v25 = vadd.f32 %v3929_v21, %v2235_v15 }
 0xa1f   : > { %v2239_v30 = vpop.f32.mrf.mxu0 }
 0xa20   : > { %v2240_v34 = vadd.f32 %v4711_v26, %v2239_v30  ;;  %v2285_v40 = vsel %vm592_vm1, %v4721_v25, 0.0 }
 0xa21   : > { %2286 = vadd.xlane.f32.xlu1 %v2285_v40  ;;  %v3653_v36 = vpop.f32.mrf.mxu0 }
 0xa22   : > { %v4727_v56 = vadd.f32 %v3930_v20, %v2240_v34 }
 0xa23   : > { %v2242_v57 = vpop.f32.mrf.mxu0 }
 0xa24   : > { %v2243_v62 = vadd.f32 %v4711_v26, %v2242_v57  ;;  %v2288_v23 = vsel %vm592_vm1, %v4727_v56, 0.0 }
 0xa25   : > { %2289 = vadd.xlane.f32.xlu0 %v2288_v23  ;;  %v3654_v0 = vpop.f32.mrf.mxu0 }
 0xa26   : > { %v4733_v8 = vadd.f32 %v3931_v3, %v2243_v62 }
 0xa28   : > { %v2291_v12 = vsel %vm592_vm1, %v4733_v8, 0.0 }
 0xa29   : > { %2292 = vadd.xlane.f32.xlu0 %v2291_v12 }
 0xa2b   : > { %v2247_v16 = vpop.f32.mrf.mxu0 }
 0xa2c   : > { %v2248_v38 = vadd.f32 %v4711_v26, %v2247_v16 }
 0xa2d   : > { %v3657_v41 = vpop.f32.mrf.mxu0 }
 0xa2e   : > { %v4739_v14 = vadd.f32 %v3932_v43, %v2248_v38 }
 0xa2f   : > { %v2250_v24 = vpop.f32.mrf.mxu0 }
 0xa30   : > { %v2251_v29 = vadd.f32 %v4711_v26, %v2250_v24  ;;  %v2294_v27 = vsel %vm592_vm1, %v4739_v14, 0.0 }
 0xa31   : > { %2295 = vadd.xlane.f32.xlu0 %v2294_v27  ;;  %v3658_v32 = vpop.f32.mrf.mxu0  ;;  %v3776_v27 = vld [vmem:[%s5159_s8 + $0x18] sm:$0xff]  }
 0xa32   : > { %v2275_v31 = vadd.f32 %v3933_v39, %v2251_v29  ;;  %3668 = vmatpush3.bf16.msra.mxu1 %v3776_v27 }
 0xa33   : > { %v2255_v50 = vpop.f32.mrf.mxu0  ;;  %3669 = vmatprep.subr.bf16.mxu1 %v3946_v1 }
 0xa34   : > { %v2256_v37 = vadd.f32 %v4711_v26, %v2255_v50  ;;  %v2297_v44 = vsel %vm592_vm1, %v2275_v31, 0.0 }
 0xa35   : > { %2298 = vadd.xlane.f32.xlu1 %v2297_v44  ;;  %v3661_v28 = vpop.f32.mrf.mxu0  ;;  %v3777_v44 = vld [vmem:[%s5159_s8 + $0x10] sm:$0xff]  }
 0xa36   : > { %v2276_v35 = vadd.f32 %v3934_v33, %v2256_v37  ;;  %3670 = vmatpush3.bf16.msra.mxu1 %v3777_v44 }
 0xa37   : > { %v2258_v47 = vpop.f32.mrf.mxu0  ;;  %3671 = vmatprep.subr.bf16.mxu1 %v3946_v1 }
 0xa38   : > { %v2259_v13 = vadd.f32 %v4711_v26, %v2258_v47  ;;  %v2300_v22 = vsel %vm592_vm1, %v2276_v35, 0.0 }
 0xa39   : > { %2301 = vadd.xlane.f32.xlu0 %v2300_v22  ;;  %v3662_v48 = vpop.f32.mrf.mxu0  ;;  %v3778_v22 = vld [vmem:[%s5159_s8 + $0x8] sm:$0xff]  }
 0xa3a   : > { %v2277_v42 = vadd.f32 %v3935_v52, %v2259_v13  ;;  %3672 = vmatpush3.bf16.msra.mxu1 %v3778_v22 }
 0xa3b   : > { %v2263_v53 = vpop.f32.mrf.mxu0  ;;  %3673 = vmatprep.subr.bf16.mxu1 %v3946_v1 }
 0xa3c   : > { %v2264_v17 = vadd.f32 %v4711_v26, %v2263_v53  ;;  %v2303_v55 = vsel %vm592_vm1, %v2277_v42, 0.0 }
 0xa3d   : > { %2304 = vadd.xlane.f32.xlu1 %v2303_v55  ;;  %v3665_v58 = vpop.f32.mrf.mxu0 }
 0xa3e   : > { %v4754_v59 = vadd.f32 %v3936_v45, %v2264_v17  ;;  %v3779_v17 = vld [vmem:[%s5159_s8] sm:$0xff]  }
 0xa3f   : > { %v2266_v60 = vpop.f32.mrf.mxu0  ;;  %3674 = vmatpush3.bf16.msra.mxu1 %v3779_v17 }
 0xa40   : > { %v2267_v63 = vadd.f32 %v4711_v26, %v2266_v60  ;;  %v2306_v2 = vsel %vm592_vm1, %v4754_v59, 0.0 }
 0xa41   : > { %2307 = vadd.xlane.f32.xlu0 %v2306_v2  ;;  %v3666_v4 = vpop.f32.mrf.mxu0 }
 0xa42   : > { %v4760_v49 = vadd.f32 %v3937_v10, %v2267_v63 }
 0xa44   : > { %v2309_v54 = vsel %vm592_vm1, %v4760_v49, 0.0 }
 0xa45   : > { %2310 = vadd.xlane.f32.xlu1 %v2309_v54 }
 0xaa6   : > { %v2284_v61 = vpop.xlane.xlu0 %2283 }
 0xaa7   : > { %v2313_v46 = vmul.f32 0.015625, %v2284_v61 }
 0xaa9   : > { %v4765_v51 = vsub.f32 %v4715_v9, %v2313_v46 }
 0xaaa   : > { %v2287_v6 = vpop.xlane.xlu1 %2286 }
 0xaab   : > { %v2314_v5 = vmul.f32 0.015625, %v2287_v6  ;;  %v2333_v26 = vmul.f32 %v4765_v51, %v4765_v51 }
 0xaad   : > { %v4770_v7 = vsub.f32 %v4721_v25, %v2314_v5  ;;  %v2343_v11 = vsel %vm592_vm1, %v2333_v26, 0.0 }
 0xaae   : > { %v2290_v15 = vpop.xlane.xlu0 %2289  ;;  %2344 = vadd.xlane.f32.xlu0 %v2343_v11  ;;  %v4840_v11 = vld [vmem:[%s5157_s6] ss:$0 sm:$0xff] }
 0xaaf   : > { %v2315_v18 = vmul.f32 0.015625, %v2290_v15  ;;  %v2334_v19 = vmul.f32 %v4770_v7, %v4770_v7 }
 0xab1   : > { %v4776_v21 = vsub.f32 %v4727_v56, %v2315_v18  ;;  %v2346_v9 = vsel %vm592_vm1, %v2334_v19, 0.0 }
 0xab2   : > { %v2293_v30 = vpop.xlane.xlu0 %2292  ;;  %2347 = vadd.xlane.f32.xlu1 %v2346_v9 }
 0xab3   : > { %v2316_v34 = vmul.f32 0.015625, %v2293_v30  ;;  %v2335_v25 = vmul.f32 %v4776_v21, %v4776_v21 }
 0xab5   : > { %v4782_v40 = vsub.f32 %v4733_v8, %v2316_v34  ;;  %v2349_v36 = vsel %vm592_vm1, %v2335_v25, 0.0  ;;  %v4847_v25 = vld [vmem:[%s5158_s7] ss:$0 sm:$0xff] }
 0xab6   : > { %2350 = vadd.xlane.f32.xlu0 %v2349_v36 }
 0xab7   : > { %v2336_v20 = vmul.f32 %v4782_v40, %v4782_v40 }
 0xab9   : > { %v2352_v56 = vsel %vm592_vm1, %v2336_v20, 0.0 }
 0xaba   : > { %v2296_v57 = vpop.xlane.xlu0 %2295  ;;  %2353 = vadd.xlane.f32.xlu1 %v2352_v56 }
 0xabb   : > { %v2317_v62 = vmul.f32 0.015625, %v2296_v57 }
 0xabd   : > { %v4789_v23 = vsub.f32 %v4739_v14, %v2317_v62 }
 0xabe   : > { %v2299_v0 = vpop.xlane.xlu1 %2298 }
 0xabf   : > { %v2318_v3 = vmul.f32 0.015625, %v2299_v0  ;;  %v2337_v8 = vmul.f32 %v4789_v23, %v4789_v23 }
 0xac1   : > { %v4793_v12 = vsub.f32 %v2275_v31, %v2318_v3  ;;  %v2355_v16 = vsel %vm592_vm1, %v2337_v8, 0.0 }
 0xac2   : > { %v2302_v38 = vpop.xlane.xlu0 %2301  ;;  %2356 = vadd.xlane.f32.xlu0 %v2355_v16 }
 0xac3   : > { %v2319_v41 = vmul.f32 0.015625, %v2302_v38  ;;  %v2338_v43 = vmul.f32 %v4793_v12, %v4793_v12 }
 0xac5   : > { %v4798_v24 = vsub.f32 %v2276_v35, %v2319_v41  ;;  %v2358_v14 = vsel %vm592_vm1, %v2338_v43, 0.0 }
 0xac6   : > { %v2305_v29 = vpop.xlane.xlu1 %2304  ;;  %2359 = vadd.xlane.f32.xlu1 %v2358_v14 }
 0xac7   : > { %v2320_v32 = vmul.f32 0.015625, %v2305_v29  ;;  %v2339_v39 = vmul.f32 %v4798_v24, %v4798_v24 }
 0xac9   : > { %v4806_v31 = vsub.f32 %v2277_v42, %v2320_v32  ;;  %v2361_v50 = vsel %vm592_vm1, %v2339_v39, 0.0 }
 0xaca   : > { %2362 = vadd.xlane.f32.xlu0 %v2361_v50  ;;  %v2308_v37 = vpop.xlane.xlu0 %2307 }
 0xacb   : > { %v2321_v28 = vmul.f32 0.015625, %v2308_v37  ;;  %v2340_v33 = vmul.f32 %v4806_v31, %v4806_v31 }
 0xacd   : > { %v4816_v35 = vsub.f32 %v4754_v59, %v2321_v28  ;;  %v2364_v47 = vsel %vm592_vm1, %v2340_v33, 0.0 }
 0xace   : > { %2365 = vadd.xlane.f32.xlu1 %v2364_v47  ;;  %v2311_v13 = vpop.xlane.xlu1 %2310 }
 0xacf   : > { %v2322_v48 = vmul.f32 0.015625, %v2311_v13  ;;  %v2341_v52 = vmul.f32 %v4816_v35, %v4816_v35 }
 0xad1   : > { %v4826_v42 = vsub.f32 %v4760_v49, %v2322_v48  ;;  %v2367_v53 = vsel %vm592_vm1, %v2341_v52, 0.0 }
 0xad2   : > { %2368 = vadd.xlane.f32.xlu0 %v2367_v53 }
 0xad3   : > { %v2342_v55 = vmul.f32 %v4826_v42, %v4826_v42 }
 0xad5   : > { %v2370_v58 = vsel %vm592_vm1, %v2342_v55, 0.0 }
 0xad6   : > { %2371 = vadd.xlane.f32.xlu1 %v2370_v58 }
 0xb37   : > { %v2345_v45 = vpop.xlane.xlu0 %2344 }
 0xb38   : > { %v2373_v59 = vmul.f32 0.015625, %v2345_v45 }
 0xb3a   : > { %v2383_v60 = vadd.f32 1e-12, %v2373_v59 }
 0xb3b   : > { %v2348_v63 = vpop.xlane.xlu1 %2347 }
 0xb3c   : > { %3868 = vrsqrt.f32 %v2383_v60  ;;  %v2374_v2 = vmul.f32 0.015625, %v2348_v63 }
 0xb3e   : > { %v2384_v4 = vadd.f32 1e-12, %v2374_v2 }
 0xb3f   : > { %v2351_v10 = vpop.xlane.xlu0 %2350 }
 0xb40   : > { %3870 = vrsqrt.f32 %v2384_v4  ;;  %v2375_v49 = vmul.f32 0.015625, %v2351_v10 }
 0xb42   : > { %v2385_v54 = vadd.f32 1e-12, %v2375_v49 }
 0xb43   : > { %v2354_v61 = vpop.xlane.xlu1 %2353 }
 0xb44   : > { %3872 = vrsqrt.f32 %v2385_v54  ;;  %v2376_v46 = vmul.f32 0.015625, %v2354_v61 }
 0xb46   : > { %v2386_v6 = vadd.f32 1e-12, %v2376_v46 }
 0xb48   : > { %3874 = vrsqrt.f32 %v2386_v6 }
 0xb49   : > { %v3869_v5 = vpop.eup %3868 }
 0xb4a   : > { %v2403_v26 = vmul.f32 %v3869_v5, %v4765_v51 }
 0xb4b   : > { %v2357_v15 = vpop.xlane.xlu0 %2356 }
 0xb4c   : > { %v2377_v18 = vmul.f32 0.015625, %v2357_v15  ;;  %v2419_v9 = vmul.f32 %v4840_v11, %v2403_v26 }
 0xb4d   : > { %v3871_v19 = vpop.eup %3870 }
 0xb4e   : > { %v2404_v30 = vmul.f32 %v3871_v19, %v4770_v7  ;;  %v2387_v34 = vadd.f32 1e-12, %v2377_v18  ;;  %v4851_v57 = vadd.f32 %v4847_v25, %v2419_v9  ;;  %v3782_v18 = vld [vmem:[%s5161_s10 + $0x28] sm:$0xff]   ;;  %v3783_v19 = vld [vmem:[%s5161_s10 + $0x20] sm:$0xff]   ;;  %v3784_v9 = vld [vmem:[%s5161_s10 + $0x18] sm:$0xff]  }
 0xb4f   : > { %v2360_v36 = vpop.xlane.xlu1 %2359 }
 0xb50   : > { %v2420_v51 = vmul.f32 %v4840_v11, %v2404_v30  ;;  %3876 = vrsqrt.f32 %v2387_v34  ;;  %v2378_v20 = vmul.f32 0.015625, %v2360_v36  ;;  %v3785_v30 = vld [vmem:[%s5161_s10 + $0x10] sm:$0xff]   ;;  %v3786_v34 = vld [vmem:[%s5161_s10 + $0x8] sm:$0xff]   ;;  %v4953_v36 = vld [vmem:[%s5160_s9] ss:$0 sm:$0xff] }
 0xb51   : > { %v3873_v56 = vpop.eup %3872 }
 0xb52   : > { %v4854_v62 = vadd.f32 %v4847_v25, %v2420_v51  ;;  %v2405_v7 = vmul.f32 %v3873_v56, %v4776_v21  ;;  %v2388_v0 = vadd.f32 1e-12, %v2378_v20 }
 0xb53   : > { %v2363_v3 = vpop.xlane.xlu0 %2362 }
 0xb54   : > { %v2445_v8 = vpack.c.bf16 %v4854_v62, %v4851_v57  ;;  %3878 = vrsqrt.f32 %v2388_v0  ;;  %v2379_v16 = vmul.f32 0.015625, %v2363_v3  ;;  %v2421_v14 = vmul.f32 %v4840_v11, %v2405_v7 }
 0xb55   : > { %v3875_v38 = vpop.eup %3874 }
 0xb56   : > { %v2406_v41 = vmul.f32 %v3875_v38, %v4782_v40  ;;  %v2389_v43 = vadd.f32 1e-12, %v2379_v16  ;;  %3676 = vmatmul.mubr.msk.bf16.vlgmr.msra.gmra.mxu1 %vm592_vm1, %v2445_v8  ;;  %v4866_v39 = vadd.f32 %v4847_v25, %v2421_v14 }
 0xb57   : > { %v2366_v29 = vpop.xlane.xlu1 %2365  ;;  %3679 = vmatprep.mubr.msk.bf16.mxu1 %vm3947_vm0, %v3946_v1 }
 0xb58   : > { %3880 = vrsqrt.f32 %v2389_v43  ;;  %v2380_v21 = vmul.f32 0.015625, %v2366_v29  ;;  %v2422_v27 = vmul.f32 %v4840_v11, %v2406_v41 }
 0xb5a   : > { %v2390_v32 = vadd.f32 1e-12, %v2380_v21  ;;  %v4869_v50 = vadd.f32 %v4847_v25, %v2422_v27 }
 0xb5b   : > { %v2369_v40 = vpop.xlane.xlu0 %2368 }
 0xb5c   : > { %3882 = vrsqrt.f32 %v2390_v32  ;;  %v2381_v37 = vmul.f32 0.015625, %v2369_v40  ;;  %v2446_v44 = vpack.c.bf16 %v4869_v50, %v4866_v39 }
 0xb5d   : > { %v3877_v28 = vpop.eup %3876 }
 0xb5e   : > { %v2407_v33 = vmul.f32 %v3877_v28, %v4789_v23  ;;  %v2391_v47 = vadd.f32 1e-12, %v2381_v37  ;;  %3680 = vmatmul.mubr.msk.bf16.gmra.mxu1 %vm592_vm1, %v2446_v44 }
 0xb5f   : > { %v2372_v13 = vpop.xlane.xlu1 %2371  ;;  %3683 = vmatprep.mubr.msk.bf16.mxu1 %vm3947_vm0, %v3946_v1 }
 0xb60   : > { %3884 = vrsqrt.f32 %v2391_v47  ;;  %v2382_v22 = vmul.f32 0.015625, %v2372_v13  ;;  %v2423_v17 = vmul.f32 %v4840_v11, %v2407_v33 }
 0xb61   : > { %v3879_v48 = vpop.eup %3878 }
 0xb62   : > { %v2408_v52 = vmul.f32 %v3879_v48, %v4793_v12  ;;  %v2392_v53 = vadd.f32 1e-12, %v2382_v22  ;;  %v4882_v45 = vadd.f32 %v4847_v25, %v2423_v17 }
 0xb64   : > { %3886 = vrsqrt.f32 %v2392_v53  ;;  %v2424_v55 = vmul.f32 %v4840_v11, %v2408_v52 }
 0xb65   : > { %v3881_v58 = vpop.eup %3880 }
 0xb66   : > { %v2409_v23 = vmul.f32 %v3881_v58, %v4798_v24  ;;  %v4885_v59 = vadd.f32 %v4847_v25, %v2424_v55 }
 0xb68   : > { %v2447_v60 = vpack.c.bf16 %v4885_v59, %v4882_v45  ;;  %v2425_v2 = vmul.f32 %v4840_v11, %v2409_v23 }
 0xb69   : > { %v3883_v63 = vpop.eup %3882 }
 0xb6a   : > { %v2410_v12 = vmul.f32 %v3883_v63, %v4806_v31  ;;  %3684 = vmatmul.mubr.msk.bf16.gmra.mxu1 %vm592_vm1, %v2447_v60  ;;  %v4897_v49 = vadd.f32 %v4847_v25, %v2425_v2 }
 0xb6b   : > { %3687 = vmatprep.mubr.msk.bf16.mxu1 %vm3947_vm0, %v3946_v1 }
 0xb6c   : > { %v2426_v24 = vmul.f32 %v4840_v11, %v2410_v12 }
 0xb6d   : > { %v3885_v4 = vpop.eup %3884 }
 0xb6e   : > { %v2411_v10 = vmul.f32 %v3885_v4, %v4816_v35  ;;  %v4900_v54 = vadd.f32 %v4847_v25, %v2426_v24 }
 0xb70   : > { %v2448_v31 = vpack.c.bf16 %v4900_v54, %v4897_v49  ;;  %v2427_v6 = vmul.f32 %v4840_v11, %v2411_v10 }
 0xb71   : > { %v3887_v61 = vpop.eup %3886 }
 0xb72   : > { %v2412_v46 = vmul.f32 %v3887_v61, %v4826_v42  ;;  %3688 = vmatmul.mubr.msk.bf16.gmra.mxu1 %vm592_vm1, %v2448_v31  ;;  %v4911_v5 = vadd.f32 %v4847_v25, %v2427_v6  ;;  %v3780_v42 = vld [vmem:[%s5161_s10 + $0x38] sm:$0xff]  }
 0xb73   : > { %3691 = vmatprep.mubr.msk.bf16.mxu1 %vm3947_vm0, %v3946_v1  ;;  %3696 = vmatpush3.bf16.msra.mxu0 %v3780_v42 }
 0xb74   : > { %v2428_v35 = vmul.f32 %v4840_v11, %v2412_v46  ;;  %3697 = vmatprep.subr.bf16.mxu0 %v3946_v1  ;;  %v3781_v11 = vld [vmem:[%s5161_s10 + $0x30] sm:$0xff]  }
 0xb76   : > { %v4914_v26 = vadd.f32 %v4847_v25, %v2428_v35  ;;  %v3787_v25 = vld [vmem:[%s5161_s10] sm:$0xff]  }
 0xb77   : > { %3698 = vmatpush3.bf16.msra.mxu0 %v3781_v11 }
 0xb78   : > { %v2449_v15 = vpack.c.bf16 %v4914_v26, %v4911_v5  ;;  %3699 = vmatprep.subr.bf16.mxu0 %v3946_v1 }
 0xb7a   : > { %3692 = vmatmul.mubr.msk.bf16.gmra.mxu1 %vm592_vm1, %v2449_v15 }
 0xb7b   : > { %3700 = vmatpush3.bf16.msra.mxu0 %v3782_v18 }
 0xb7c   : > { %3701 = vmatprep.subr.bf16.mxu0 %v3946_v1 }
 0xb7f   : > { %3702 = vmatpush3.bf16.msra.mxu0 %v3783_v19 }
 0xb80   : > { %3703 = vmatprep.subr.bf16.mxu0 %v3946_v1 }
 0xb83   : > { %3704 = vmatpush3.bf16.msra.mxu0 %v3784_v9 }
 0xb84   : > { %3705 = vmatprep.subr.bf16.mxu0 %v3946_v1 }
 0xb87   : > { %3706 = vmatpush3.bf16.msra.mxu0 %v3785_v30 }
 0xb88   : > { %3707 = vmatprep.subr.bf16.mxu0 %v3946_v1 }
 0xb8b   : > { %3708 = vmatpush3.bf16.msra.mxu0 %v3786_v34 }
 0xb8c   : > { %3709 = vmatprep.subr.bf16.mxu0 %v3946_v1 }
 0xb8f   : > { %3710 = vmatpush3.bf16.msra.mxu0 %v3787_v25 }
 0xc16   : > { %v2538_v51 = vpop.f32.mrf.mxu1 }
 0xc17   : > { %v2539_v20 = vadd.f32 %v4953_v36, %v2538_v51 }
 0xc18   : > { %v3677_v56 = vpop.f32.mrf.mxu1 }
 0xc19   : > { %v2587_v7 = vmul.f32 0.044715, %v2539_v20  ;;  %v2577_v30 = vmul.f32 0.5, %v2539_v20 }
 0xc1a   : > { %v2541_v0 = vpop.f32.mrf.mxu1 }
 0xc1b   : > { %v2597_v3 = vmul.f32 %v2587_v7, %v2539_v20  ;;  %v2542_v8 = vadd.f32 %v4953_v36, %v2541_v0 }
 0xc1c   : > { %v3678_v16 = vpop.f32.mrf.mxu1 }
 0xc1d   : > { %v2607_v38 = vmul.f32 %v2597_v3, %v2539_v20  ;;  %v2588_v41 = vmul.f32 0.044715, %v2542_v8  ;;  %v2578_v34 = vmul.f32 0.5, %v2542_v8 }
 0xc1e   : > { %v2546_v43 = vpop.f32.mrf.mxu1 }
 0xc1f   : > { %v2617_v14 = vadd.f32 %v2607_v38, %v2539_v20  ;;  %v2598_v29 = vmul.f32 %v2588_v41, %v2542_v8  ;;  %v4958_v21 = vadd.f32 %v4953_v36, %v2546_v43 }
 0xc20   : > { %v3681_v27 = vpop.f32.mrf.mxu1 }
 0xc21   : > { %v2627_v32 = vmul.f32 0.7978846, %v2617_v14  ;;  %v2608_v40 = vmul.f32 %v2598_v29, %v2542_v8  ;;  %v2589_v37 = vmul.f32 0.044715, %v4958_v21 }
 0xc22   : > { %v2549_v44 = vpop.f32.mrf.mxu1 }
 0xc23   : > { %3888 = vtanh.f32 %v2627_v32  ;;  %v2618_v28 = vadd.f32 %v2608_v40, %v2542_v8  ;;  %v2599_v33 = vmul.f32 %v2589_v37, %v4958_v21  ;;  %v4963_v47 = vadd.f32 %v4953_v36, %v2549_v44 }
 0xc24   : > { %v3682_v13 = vpop.f32.mrf.mxu1 }
 0xc25   : > { %v2628_v22 = vmul.f32 0.7978846, %v2618_v28  ;;  %v2609_v48 = vmul.f32 %v2599_v33, %v4958_v21  ;;  %v2590_v52 = vmul.f32 0.044715, %v4963_v47 }
 0xc27   : > { %3890 = vtanh.f32 %v2628_v22  ;;  %v2619_v53 = vadd.f32 %v2609_v48, %v4958_v21  ;;  %v2600_v17 = vmul.f32 %v2590_v52, %v4963_v47  ;;  %v2579_v52 = vmul.f32 0.5, %v4958_v21 }
 0xc29   : > { %v2629_v55 = vmul.f32 0.7978846, %v2619_v53  ;;  %v2610_v58 = vmul.f32 %v2600_v17, %v4963_v47 }
 0xc2a   : > { %v2554_v23 = vpop.f32.mrf.mxu1 }
 0xc2b   : > { %3892 = vtanh.f32 %v2629_v55  ;;  %v2620_v60 = vadd.f32 %v2610_v58, %v4963_v47  ;;  %v4972_v63 = vadd.f32 %v4953_v36, %v2554_v23  ;;  %v2580_v55 = vmul.f32 0.5, %v4963_v47 }
 0xc2c   : > { %v3685_v12 = vpop.f32.mrf.mxu1 }
 0xc2d   : > { %v2630_v2 = vmul.f32 0.7978846, %v2620_v60  ;;  %v2591_v24 = vmul.f32 0.044715, %v4972_v63 }
 0xc2e   : > { %v2557_v4 = vpop.f32.mrf.mxu1 }
 0xc2f   : > { %3894 = vtanh.f32 %v2630_v2  ;;  %v2601_v10 = vmul.f32 %v2591_v24, %v4972_v63  ;;  %v4977_v31 = vadd.f32 %v4953_v36, %v2557_v4 }
 0xc30   : > { %v3889_v61 = vpop.eup %3888  ;;  %v3686_v46 = vpop.f32.mrf.mxu1 }
 0xc31   : > { %v2611_v6 = vmul.f32 %v2601_v10, %v4972_v63  ;;  %v2592_v35 = vmul.f32 0.044715, %v4977_v31  ;;  %v2647_v15 = vadd.f32 1.0, %v3889_v61 }
 0xc32   : > { %v2562_v42 = vpop.f32.mrf.mxu1 }
 0xc33   : > { %v2621_v11 = vadd.f32 %v2611_v6, %v4972_v63  ;;  %v2602_v18 = vmul.f32 %v2592_v35, %v4977_v31  ;;  %v4984_v19 = vadd.f32 %v4953_v36, %v2562_v42  ;;  %v2657_v3 = vmul.f32 %v2647_v15, %v2577_v30 }
 0xc34   : > { %v3891_v9 = vpop.eup %3890  ;;  %v3689_v25 = vpop.f32.mrf.mxu1 }
 0xc35   : > { %v2648_v51 = vadd.f32 1.0, %v3891_v9  ;;  %v2631_v56 = vmul.f32 0.7978846, %v2621_v11  ;;  %v2612_v7 = vmul.f32 %v2602_v18, %v4977_v31  ;;  %v2593_v0 = vmul.f32 0.044715, %v4984_v19 }
 0xc36   : > { %v2565_v16 = vpop.f32.mrf.mxu1  ;;  %v2581_v25 = vmul.f32 0.5, %v4972_v63 }
 0xc37   : > { %v2658_v38 = vmul.f32 %v2648_v51, %v2578_v34  ;;  %3896 = vtanh.f32 %v2631_v56  ;;  %v2622_v41 = vadd.f32 %v2612_v7, %v4977_v31  ;;  %v2603_v43 = vmul.f32 %v2593_v0, %v4984_v19 }
 0xc38   : > { %v3893_v14 = vpop.eup %3892  ;;  %v2566_v29 = vadd.f32 %v4953_v36, %v2565_v16  ;;  %v3690_v20 = vpop.f32.mrf.mxu1  ;;  %v2582_v51 = vmul.f32 0.5, %v4977_v31 }
 0xc39   : > { %v2667_v8 = vpack.c.bf16 %v2658_v38, %v2657_v3  ;;  %v2632_v27 = vmul.f32 0.7978846, %v2622_v41  ;;  %v2613_v32 = vmul.f32 %v2603_v43, %v4984_v19  ;;  %v2649_v33 = vadd.f32 1.0, %v3893_v14 }
 0xc3a   : > { %v2594_v40 = vmul.f32 0.044715, %v2566_v29  ;;  %v2570_v37 = vpop.f32.mrf.mxu1  ;;  %v2583_v43 = vmul.f32 0.5, %v4984_v19  ;;  %v2584_v14 = vmul.f32 0.5, %v2566_v29 }
 0xc3b   : > { %3898 = vtanh.f32 %v2632_v27  ;;  %v2623_v44 = vadd.f32 %v2613_v32, %v4984_v19  ;;  %v2571_v28 = vadd.f32 %v4953_v36, %v2570_v37  ;;  %3712 = vmatmul.mubr.bf16.vlgmr.msra.gmra.mxu0 %v2667_v8  ;;  %v2659_v24 = vmul.f32 %v2649_v33, %v2579_v52  ;;  %v3181_v19 = vld [vmem:[%s5162_s11] ss:$0 sm:$0xff] }
 0xc3c   : > { %v3895_v13 = vpop.eup %3894  ;;  %v2604_v22 = vmul.f32 %v2594_v40, %v2566_v29  ;;  %v3693_v48 = vpop.f32.mrf.mxu1  ;;  %3715 = vmatprep.mubr.msk.bf16.mxu0 %vm3947_vm0, %v3946_v1 }
 0xc3d   : > { %v2633_v53 = vmul.f32 0.7978846, %v2623_v44  ;;  %v2595_v17 = vmul.f32 0.044715, %v2571_v28  ;;  %v2650_v58 = vadd.f32 1.0, %v3895_v13  ;;  %v2585_v37 = vmul.f32 0.5, %v2571_v28 }
 0xc3e   : > { %v2614_v23 = vmul.f32 %v2604_v22, %v2566_v29  ;;  %v2573_v60 = vpop.f32.mrf.mxu1 }
 0xc3f   : > { %v2605_v12 = vmul.f32 %v2595_v17, %v2571_v28  ;;  %v2574_v2 = vadd.f32 %v4953_v36, %v2573_v60  ;;  %v2660_v4 = vmul.f32 %v2650_v58, %v2580_v55  ;;  %3900 = vtanh.f32 %v2633_v53 }
 0xc40   : > { %v2624_v10 = vadd.f32 %v2614_v23, %v2566_v29  ;;  %v3694_v61 = vpop.f32.mrf.mxu1 }
 0xc41   : > { %v2615_v46 = vmul.f32 %v2605_v12, %v2571_v28  ;;  %v2596_v6 = vmul.f32 0.044715, %v2574_v2  ;;  %v2668_v35 = vpack.c.bf16 %v2660_v4, %v2659_v24  ;;  %v2586_v44 = vmul.f32 0.5, %v2574_v2 }
 0xc42   : > { %v2634_v15 = vmul.f32 0.7978846, %v2624_v10 }
 0xc43   : > { %v2625_v21 = vadd.f32 %v2615_v46, %v2571_v28  ;;  %v2606_v42 = vmul.f32 %v2596_v6, %v2574_v2  ;;  %3716 = vmatmul.mubr.bf16.gmra.mxu0 %v2668_v35 }
 0xc44   : > { %v3897_v11 = vpop.eup %3896  ;;  %3902 = vtanh.f32 %v2634_v15  ;;  %3719 = vmatprep.mubr.msk.bf16.mxu0 %vm3947_vm0, %v3946_v1 }
 0xc45   : > { %v2635_v47 = vmul.f32 0.7978846, %v2625_v21  ;;  %v2616_v18 = vmul.f32 %v2606_v42, %v2574_v2  ;;  %v2651_v9 = vadd.f32 1.0, %v3897_v11 }
 0xc47   : > { %3904 = vtanh.f32 %v2635_v47  ;;  %v2626_v36 = vadd.f32 %v2616_v18, %v2574_v2  ;;  %v2661_v7 = vmul.f32 %v2651_v9, %v2581_v25 }
 0xc48   : > { %v3899_v30 = vpop.eup %3898 }
 0xc49   : > { %v2636_v34 = vmul.f32 0.7978846, %v2626_v36  ;;  %v2652_v56 = vadd.f32 1.0, %v3899_v30 }
 0xc4b   : > { %3906 = vtanh.f32 %v2636_v34  ;;  %v2662_v0 = vmul.f32 %v2652_v56, %v2582_v51 }
 0xc4c   : > { %v3901_v3 = vpop.eup %3900 }
 0xc4d   : > { %v2669_v16 = vpack.c.bf16 %v2662_v0, %v2661_v7  ;;  %v2653_v38 = vadd.f32 1.0, %v3901_v3 }
 0xc4f   : > { %3720 = vmatmul.mubr.bf16.gmra.mxu0 %v2669_v16  ;;  %v2663_v63 = vmul.f32 %v2653_v38, %v2583_v43 }
 0xc50   : > { %3723 = vmatprep.mubr.msk.bf16.mxu0 %vm3947_vm0, %v3946_v1 }
 0xc51   : > { %v3903_v41 = vpop.eup %3902 }
 0xc52   : > { %v2654_v20 = vadd.f32 1.0, %v3903_v41 }
 0xc54   : > { %v3905_v8 = vpop.eup %3904  ;;  %v2664_v27 = vmul.f32 %v2654_v20, %v2584_v14 }
 0xc55   : > { %v2655_v32 = vadd.f32 1.0, %v3905_v8 }
 0xc56   : > { %v2670_v31 = vpack.c.bf16 %v2664_v27, %v2663_v63 }
 0xc57   : > { %v2665_v13 = vmul.f32 %v2655_v32, %v2585_v37 }
 0xc58   : > { %v3907_v40 = vpop.eup %3906  ;;  %3724 = vmatmul.mubr.bf16.gmra.mxu0 %v2670_v31 }
 0xc59   : > { %3727 = vmatprep.mubr.msk.bf16.mxu0 %vm3947_vm0, %v3946_v1  ;;  %v2656_v33 = vadd.f32 1.0, %v3907_v40 }
 0xc5b   : > { %v2666_v22 = vmul.f32 %v2656_v33, %v2586_v44 }
 0xc5d   : > { %v2671_v48 = vpack.c.bf16 %v2666_v22, %v2665_v13 }
 0xc60   : > { %3728 = vmatmul.mubr.bf16.gmra.mxu0 %v2671_v48 }
 0xcfb   : > { %v2777_v29 = vpop.f32.mrf.mxu0 }
 0xcfc   : > { %v2778_v52 = vadd.f32 %v3181_v19, %v2777_v29 }
 0xcfd   : > { %v3713_v53 = vpop.f32.mrf.mxu0 }
 0xcfe   : > { %v2816_v17 = vadd.f32 %v2778_v52, %v4851_v57 }
 0xcff   : > { %v2780_v55 = vpop.f32.mrf.mxu0 }
 0xd00   : > { %v2781_v58 = vadd.f32 %v3181_v19, %v2780_v55  ;;  %v2828_v1 = vsel %vm592_vm1, %v2816_v17, 0.0 }
 0xd01   : > { %2829 = vadd.xlane.f32.xlu0 %v2828_v1  ;;  %v3714_v28 = vpop.f32.mrf.mxu0 }
 0xd02   : > { %v2817_v23 = vadd.f32 %v2781_v58, %v4854_v62 }
 0xd03   : > { %v2785_v60 = vpop.f32.mrf.mxu0 }
 0xd04   : > { %v2786_v12 = vadd.f32 %v3181_v19, %v2785_v60  ;;  %v2831_v2 = vsel %vm592_vm1, %v2817_v23, 0.0 }
 0xd05   : > { %2832 = vadd.xlane.f32.xlu1 %v2831_v2  ;;  %v3717_v24 = vpop.f32.mrf.mxu0 }
 0xd06   : > { %v2818_v4 = vadd.f32 %v2786_v12, %v4866_v39 }
 0xd07   : > { %v2788_v10 = vpop.f32.mrf.mxu0 }
 0xd08   : > { %v2789_v61 = vadd.f32 %v3181_v19, %v2788_v10  ;;  %v2834_v57 = vsel %vm592_vm1, %v2818_v4, 0.0 }
 0xd09   : > { %2835 = vadd.xlane.f32.xlu0 %v2834_v57  ;;  %v3718_v46 = vpop.f32.mrf.mxu0 }
 0xd0a   : > { %v2819_v6 = vadd.f32 %v2789_v61, %v4869_v50 }
 0xd0c   : > { %v2837_v35 = vsel %vm592_vm1, %v2819_v6, 0.0 }
 0xd0d   : > { %2838 = vadd.xlane.f32.xlu1 %v2837_v35 }
 0xd0f   : > { %v2793_v62 = vpop.f32.mrf.mxu0 }
 0xd10   : > { %v2794_v15 = vadd.f32 %v3181_v19, %v2793_v62 }
 0xd11   : > { %v3721_v21 = vpop.f32.mrf.mxu0 }
 0xd12   : > { %v2820_v42 = vadd.f32 %v2794_v15, %v4882_v45 }
 0xd13   : > { %v2796_v11 = vpop.f32.mrf.mxu0 }
 0xd14   : > { %v2797_v47 = vadd.f32 %v3181_v19, %v2796_v11  ;;  %v2840_v39 = vsel %vm592_vm1, %v2820_v42, 0.0 }
 0xd15   : > { %2841 = vadd.xlane.f32.xlu0 %v2840_v39  ;;  %v3722_v18 = vpop.f32.mrf.mxu0 }
 0xd16   : > { %v2821_v36 = vadd.f32 %v2797_v47, %v4885_v59 }
 0xd18   : > { %v2801_v9 = vpop.f32.mrf.mxu0  ;;  %v2843_v30 = vsel %vm592_vm1, %v2821_v36, 0.0 }
 0xd19   : > { %v2802_v50 = vadd.f32 %v3181_v19, %v2801_v9  ;;  %2844 = vadd.xlane.f32.xlu1 %v2843_v30 }
 0xd1a   : > { %v3725_v34 = vpop.f32.mrf.mxu0 }
 0xd1b   : > { %v2822_v25 = vadd.f32 %v2802_v50, %v4897_v49 }
 0xd1c   : > { %v2804_v51 = vpop.f32.mrf.mxu0 }
 0xd1d   : > { %v2805_v56 = vadd.f32 %v3181_v19, %v2804_v51  ;;  %v2846_v45 = vsel %vm592_vm1, %v2822_v25, 0.0 }
 0xd1e   : > { %2847 = vadd.xlane.f32.xlu0 %v2846_v45  ;;  %v3726_v7 = vpop.f32.mrf.mxu0 }
 0xd1f   : > { %v2823_v0 = vadd.f32 %v2805_v56, %v4900_v54 }
 0xd20   : > { %v2809_v3 = vpop.f32.mrf.mxu0 }
 0xd21   : > { %v2810_v16 = vadd.f32 %v3181_v19, %v2809_v3  ;;  %v2849_v59 = vsel %vm592_vm1, %v2823_v0, 0.0 }
 0xd22   : > { %2850 = vadd.xlane.f32.xlu1 %v2849_v59  ;;  %v3729_v38 = vpop.f32.mrf.mxu0 }
 0xd23   : > { %v2824_v41 = vadd.f32 %v2810_v16, %v4911_v5 }
 0xd24   : > { %v2812_v43 = vpop.f32.mrf.mxu0 }
 0xd25   : > { %v2813_v14 = vadd.f32 %v3181_v19, %v2812_v43  ;;  %v2852_v49 = vsel %vm592_vm1, %v2824_v41, 0.0 }
 0xd26   : > { %2853 = vadd.xlane.f32.xlu0 %v2852_v49  ;;  %v3730_v20 = vpop.f32.mrf.mxu0 }
 0xd27   : > { %v2825_v8 = vadd.f32 %v2813_v14, %v4914_v26 }
 0xd29   : > { %v2855_v63 = vsel %vm592_vm1, %v2825_v8, 0.0 }
 0xd2a   : > { %2856 = vadd.xlane.f32.xlu1 %v2855_v63  ;;  %v5084_v63 = vld [vmem:[%s5163_s12] ss:$0 sm:$0xff] }
 0xd8a   : > { %v2830_v54 = vpop.xlane.xlu0 %2829 }
 0xd8b   : > { %v2858_v27 = vmul.f32 0.015625, %v2830_v54 }
 0xd8d   : > { %v5031_v31 = vsub.f32 %v2816_v17, %v2858_v27  ;;  %v5090_v27 = vld [vmem:[%s5164_s13] ss:$0 sm:$0xff] }
 0xd8e   : > { %v2833_v32 = vpop.xlane.xlu1 %2832 }
 0xd8f   : > { %v2859_v40 = vmul.f32 0.015625, %v2833_v32  ;;  %v2878_v5 = vmul.f32 %v5031_v31, %v5031_v31 }
 0xd91   : > { %v5035_v37 = vsub.f32 %v2817_v23, %v2859_v40  ;;  %v2888_v44 = vsel %vm592_vm1, %v2878_v5, 0.0 }
 0xd92   : > { %v2836_v33 = vpop.xlane.xlu0 %2835  ;;  %2889 = vadd.xlane.f32.xlu0 %v2888_v44 }
 0xd93   : > { %v2860_v13 = vmul.f32 0.015625, %v2836_v33  ;;  %v2879_v26 = vmul.f32 %v5035_v37, %v5035_v37 }
 0xd95   : > { %v5040_v22 = vsub.f32 %v2818_v4, %v2860_v13  ;;  %v2891_v48 = vsel %vm592_vm1, %v2879_v26, 0.0 }
 0xd96   : > { %v2839_v19 = vpop.xlane.xlu1 %2838  ;;  %2892 = vadd.xlane.f32.xlu1 %v2891_v48 }
 0xd97   : > { %v2861_v29 = vmul.f32 0.015625, %v2839_v19  ;;  %v2880_v52 = vmul.f32 %v5040_v22, %v5040_v22 }
 0xd99   : > { %v5045_v53 = vsub.f32 %v2819_v6, %v2861_v29  ;;  %v2894_v17 = vsel %vm592_vm1, %v2880_v52, 0.0 }
 0xd9a   : > { %2895 = vadd.xlane.f32.xlu0 %v2894_v17 }
 0xd9b   : > { %v2881_v55 = vmul.f32 %v5045_v53, %v5045_v53 }
 0xd9d   : > { %v2897_v58 = vsel %vm592_vm1, %v2881_v55, 0.0 }
 0xd9e   : > { %v2842_v1 = vpop.xlane.xlu0 %2841  ;;  %2898 = vadd.xlane.f32.xlu1 %v2897_v58 }
 0xd9f   : > { %v2862_v28 = vmul.f32 0.015625, %v2842_v1 }
 0xda1   : > { %v5051_v23 = vsub.f32 %v2820_v42, %v2862_v28 }
 0xda2   : > { %v2845_v60 = vpop.xlane.xlu1 %2844 }
 0xda3   : > { %v2863_v12 = vmul.f32 0.015625, %v2845_v60  ;;  %v2882_v2 = vmul.f32 %v5051_v23, %v5051_v23 }
 0xda5   : > { %v5055_v24 = vsub.f32 %v2821_v36, %v2863_v12  ;;  %v2900_v4 = vsel %vm592_vm1, %v2882_v2, 0.0 }
 0xda6   : > { %2901 = vadd.xlane.f32.xlu0 %v2900_v4 }
 0xda7   : > { %v2848_v10 = vpop.xlane.xlu0 %2847  ;;  %v2883_v61 = vmul.f32 %v5055_v24, %v5055_v24 }
 0xda8   : > { %v2864_v57 = vmul.f32 0.015625, %v2848_v10 }
 0xda9   : > { %v2903_v46 = vsel %vm592_vm1, %v2883_v61, 0.0 }
 0xdaa   : > { %v5061_v6 = vsub.f32 %v2822_v25, %v2864_v57  ;;  %2904 = vadd.xlane.f32.xlu1 %v2903_v46 }
 0xdab   : > { %v2851_v35 = vpop.xlane.xlu1 %2850 }
 0xdac   : > { %v2865_v62 = vmul.f32 0.015625, %v2851_v35  ;;  %v2884_v15 = vmul.f32 %v5061_v6, %v5061_v6 }
 0xdae   : > { %v5065_v21 = vsub.f32 %v2823_v0, %v2865_v62  ;;  %v2906_v42 = vsel %vm592_vm1, %v2884_v15, 0.0 }
 0xdaf   : > { %2907 = vadd.xlane.f32.xlu0 %v2906_v42  ;;  %v2854_v11 = vpop.xlane.xlu0 %2853 }
 0xdb0   : > { %v2866_v47 = vmul.f32 0.015625, %v2854_v11  ;;  %v2885_v39 = vmul.f32 %v5065_v21, %v5065_v21 }
 0xdb2   : > { %v5070_v18 = vsub.f32 %v2824_v41, %v2866_v47  ;;  %v2909_v36 = vsel %vm592_vm1, %v2885_v39, 0.0 }
 0xdb3   : > { %2910 = vadd.xlane.f32.xlu1 %v2909_v36  ;;  %v2857_v9 = vpop.xlane.xlu1 %2856 }
 0xdb4   : > { %v2867_v30 = vmul.f32 0.015625, %v2857_v9  ;;  %v2886_v50 = vmul.f32 %v5070_v18, %v5070_v18 }
 0xdb6   : > { %v5075_v34 = vsub.f32 %v2825_v8, %v2867_v30  ;;  %v2912_v25 = vsel %vm592_vm1, %v2886_v50, 0.0 }
 0xdb7   : > { %2913 = vadd.xlane.f32.xlu0 %v2912_v25 }
 0xdb8   : > { %v2887_v51 = vmul.f32 %v5075_v34, %v5075_v34 }
 0xdba   : > { %v2915_v56 = vsel %vm592_vm1, %v2887_v51, 0.0 }
 0xdbb   : > { %2916 = vadd.xlane.f32.xlu1 %v2915_v56 }
 0xe1b   : > { %v2890_v45 = vpop.xlane.xlu0 %2889 }
 0xe1c   : > { %v2918_v7 = vmul.f32 0.015625, %v2890_v45 }
 0xe1e   : > { %v2928_v0 = vadd.f32 1e-12, %v2918_v7 }
 0xe1f   : > { %v2893_v3 = vpop.xlane.xlu1 %2892 }
 0xe20   : > { %3908 = vrsqrt.f32 %v2928_v0  ;;  %v2919_v16 = vmul.f32 0.015625, %v2893_v3 }
 0xe22   : > { %v2929_v59 = vadd.f32 1e-12, %v2919_v16 }
 0xe23   : > { %v2896_v38 = vpop.xlane.xlu0 %2895 }
 0xe24   : > { %3910 = vrsqrt.f32 %v2929_v59  ;;  %v2920_v41 = vmul.f32 0.015625, %v2896_v38 }
 0xe26   : > { %v2930_v43 = vadd.f32 1e-12, %v2920_v41 }
 0xe27   : > { %v2899_v14 = vpop.xlane.xlu1 %2898 }
 0xe28   : > { %3912 = vrsqrt.f32 %v2930_v43  ;;  %v2921_v49 = vmul.f32 0.015625, %v2899_v14 }
 0xe2a   : > { %v2931_v20 = vadd.f32 1e-12, %v2921_v49 }
 0xe2c   : > { %3914 = vrsqrt.f32 %v2931_v20 }
 0xe2d   : > { %v3909_v8 = vpop.eup %3908 }
 0xe2e   : > { %v2948_v54 = vmul.f32 %v3909_v8, %v5031_v31 }
 0xe2f   : > { %v2902_v32 = vpop.xlane.xlu0 %2901 }
 0xe30   : > { %v2964_v40 = vmul.f32 %v5084_v63, %v2948_v54  ;;  %v2922_v5 = vmul.f32 0.015625, %v2902_v32 }
 0xe31   : > { %v3911_v44 = vpop.eup %3910 }
 0xe32   : > { %v2980_v31 = vadd.f32 %v5090_v27, %v2964_v40  ;;  %v2949_v33 = vmul.f32 %v3911_v44, %v5035_v37  ;;  %v2932_v13 = vadd.f32 1e-12, %v2922_v5 }
 0xe33   : > { %v2905_v26 = vpop.xlane.xlu1 %2904 }
 0xe34   : > { %2990 = vst.msk [vmem:[%s5098_s22] sm:$0xff] %vm592_vm1, %v2980_v31  ;;  %v2965_v48 = vmul.f32 %v5084_v63, %v2949_v33  ;;  %3916 = vrsqrt.f32 %v2932_v13  ;;  %v2923_v19 = vmul.f32 0.015625, %v2905_v26 }
 0xe35   : > { %v3913_v29 = vpop.eup %3912 }
 0xe36   : > { %v2981_v52 = vadd.f32 %v5090_v27, %v2965_v48  ;;  %v2950_v17 = vmul.f32 %v3913_v29, %v5040_v22  ;;  %v2933_v55 = vadd.f32 1e-12, %v2923_v19 }
 0xe38   : > { %2991 = vst.msk [vmem:[%s5098_s22 + $0x8] sm:$0xff] %vm592_vm1, %v2981_v52  ;;  %v2966_v37 = vmul.f32 %v5084_v63, %v2950_v17  ;;  %3918 = vrsqrt.f32 %v2933_v55  ;;  %v2908_v58 = vpop.xlane.xlu0 %2907 }
 0xe39   : > { %v3915_v1 = vpop.eup %3914  ;;  %v2924_v28 = vmul.f32 0.015625, %v2908_v58 }
 0xe3a   : > { %v2982_v60 = vadd.f32 %v5090_v27, %v2966_v37  ;;  %v2951_v12 = vmul.f32 %v3915_v1, %v5045_v53 }
 0xe3b   : > { %v2934_v2 = vadd.f32 1e-12, %v2924_v28 }
 0xe3c   : > { %2992 = vst.msk [vmem:[%s5098_s22 + $0x10] sm:$0xff] %vm592_vm1, %v2982_v60  ;;  %v2967_v4 = vmul.f32 %v5084_v63, %v2951_v12  ;;  %v2911_v22 = vpop.xlane.xlu1 %2910 }
 0xe3d   : > { %3920 = vrsqrt.f32 %v2934_v2  ;;  %v2925_v10 = vmul.f32 0.015625, %v2911_v22 }
 0xe3e   : > { %v2983_v61 = vadd.f32 %v5090_v27, %v2967_v4 }
 0xe3f   : > { %v2935_v57 = vadd.f32 1e-12, %v2925_v10 }
 0xe40   : > { %2993 = vst.msk [vmem:[%s5098_s22 + $0x18] sm:$0xff] %vm592_vm1, %v2983_v61  ;;  %v2914_v46 = vpop.xlane.xlu0 %2913 }
 0xe41   : > { %v3917_v35 = vpop.eup %3916  ;;  %3922 = vrsqrt.f32 %v2935_v57  ;;  %v2926_v62 = vmul.f32 0.015625, %v2914_v46 }
 0xe42   : > { %v2952_v53 = vmul.f32 %v3917_v35, %v5051_v23 }
 0xe43   : > { %v2936_v15 = vadd.f32 1e-12, %v2926_v62 }
 0xe44   : > { %v2968_v42 = vmul.f32 %v5084_v63, %v2952_v53  ;;  %v2917_v11 = vpop.xlane.xlu1 %2916 }
 0xe45   : > { %v3919_v47 = vpop.eup %3918  ;;  %3924 = vrsqrt.f32 %v2936_v15  ;;  %v2927_v39 = vmul.f32 0.015625, %v2917_v11 }
 0xe46   : > { %v2984_v36 = vadd.f32 %v5090_v27, %v2968_v42  ;;  %v2953_v9 = vmul.f32 %v3919_v47, %v5055_v24 }
 0xe47   : > { %v2937_v30 = vadd.f32 1e-12, %v2927_v39 }
 0xe48   : > { %2994 = vst.msk [vmem:[%s5098_s22 + $0x20] sm:$0xff] %vm592_vm1, %v2984_v36  ;;  %v2969_v50 = vmul.f32 %v5084_v63, %v2953_v9 }
 0xe49   : > { %3926 = vrsqrt.f32 %v2937_v30 }
 0xe4a   : > { %v3921_v23 = vpop.eup %3920  ;;  %v2985_v25 = vadd.f32 %v5090_v27, %v2969_v50 }
 0xe4b   : > { %v2954_v51 = vmul.f32 %v3921_v23, %v5061_v6 }
 0xe4c   : > { %2995 = vst.msk [vmem:[%s5098_s22 + $0x28] sm:$0xff] %vm592_vm1, %v2985_v25 }
 0xe4d   : > { %v2970_v56 = vmul.f32 %v5084_v63, %v2954_v51 }
 0xe4e   : > { %v3923_v45 = vpop.eup %3922 }
 0xe4f   : > { %v2986_v24 = vadd.f32 %v5090_v27, %v2970_v56  ;;  %v2955_v7 = vmul.f32 %v3923_v45, %v5065_v21 }
 0xe51   : > { %2996 = vst.msk [vmem:[%s5098_s22 + $0x30] sm:$0xff] %vm592_vm1, %v2986_v24  ;;  %v2971_v0 = vmul.f32 %v5084_v63, %v2955_v7 }
 0xe52   : > { %v3925_v3 = vpop.eup %3924 }
 0xe53   : > { %v2987_v16 = vadd.f32 %v5090_v27, %v2971_v0  ;;  %v2956_v6 = vmul.f32 %v3925_v3, %v5070_v18 }
 0xe55   : > { %2997 = vst.msk [vmem:[%s5098_s22 + $0x38] sm:$0xff] %vm592_vm1, %v2987_v16  ;;  %v2972_v59 = vmul.f32 %v5084_v63, %v2956_v6 }
 0xe56   : > { %v3927_v38 = vpop.eup %3926 }
 0xe57   : > { %v2988_v41 = vadd.f32 %v5090_v27, %v2972_v59  ;;  %v2957_v43 = vmul.f32 %v3927_v38, %v5075_v34 }
 0xe59   : > { %2998 = vst.msk [vmem:[%s5098_s22 + $0x40] sm:$0xff] %vm592_vm1, %v2988_v41  ;;  %v2973_v21 = vmul.f32 %v5084_v63, %v2957_v43 }
 0xe5b   : > { %v2989_v14 = vadd.f32 %v5090_v27, %v2973_v21 }
 0xe5d   : > { %2999 = vst.msk [vmem:[%s5098_s22 + $0x48] sm:$0xff] %vm592_vm1, %v2989_v14 }
 0xe5e PF: > { %s24_s29 = sadd.s32 1, %s3944_s29  }
 0xe5f   : > { %p21_p5 = scmp.ge.s32.totalorder %s24_s29, 4  }
 0xe61   :  { %23 = sbr.rel (!%p21_p5) target bundleno = 1 (0x1), region = 109 }

</bundles_post_ra>
